<compile_context>
chip_gen: v5e
topology: v5e:2x2
jax: 0.10.0
libtpu: 0.0.40
codegen_flags: <defaults>
</compile_context>

<pallas_src>
import functools

import jax
import jax.numpy as jnp
from jax.experimental import pallas as pl
from jax.experimental.pallas import tpu as pltpu

NEG = -1e9


def _hoisted_q_const(params, D):
    """Constant part of the context q-projection: [first,last] @ Wq^T + bq."""
    wq_T = params["q_proj_w"].T
    hi = jax.lax.Precision.HIGHEST
    return (jnp.dot(params["first_node"], wq_T[D:2 * D], precision=hi)
            + jnp.dot(params["last_node"], wq_T[2 * D:3 * D], precision=hi)
            + params["bq"][None, :]).astype(jnp.float32)


def prepare_decoder_params(params, *, emb_dim=128, num_heads=8):
    """One-time weight preprocessing (transposes, bf16 casts, fused K|V weight,
    head-membership matrix, hoisted q_const).  Call ONCE outside the rollout
    loop; the per-step forward only ships these already-prepared arrays."""
    D = emb_dim
    E = 3 * D
    H = num_heads
    assert E % H == 0, "3*emb_dim must be divisible by num_heads"
    bf16 = lambda a: a.astype(jnp.bfloat16)
    f32 = lambda a: a.astype(jnp.float32)
    # seg[e, h] = 1 iff feature e belongs to head h (0/1, kept f32 -> exact)
    seg = (jnp.arange(E)[:, None] // (E // H)
           == jnp.arange(H)[None, :]).astype(jnp.float32)
    w_kv = jnp.concatenate([params["k_proj_w"].T, params["v_proj_w"].T], axis=1)
    b_kv = jnp.concatenate([params["bk"], params["bv"]])[None, :]
    return {
        "w_kp": bf16(params["w_kp"].T),             # (D, D)
        "w_qg": bf16(params["q_proj_w"].T[:D]),     # (D, E) graph part of q_proj
        "q_const": _hoisted_q_const(params, D),     # (1, E) f32
        "w_kv": bf16(w_kv),                         # (D, 2E) fused K|V projection
        "b_kv": f32(b_kv),                          # (1, 2E)
        "w_out": bf16(params["out_proj_w"].T),      # (E, E)
        "b_out": f32(params["bo"][None, :]),        # (1, E)
        "w_att": bf16(params["att_output_w"].T),    # (E, D)
        "seg": seg,                                 # (E, H) f32
    }


def _decoder_kernel(x_ref, mattn_ref, mu_ref,
                    wkp_ref, wqg_ref, qc_ref, wkv_ref, bkv_ref,
                    wo_ref, bo_ref, watt_ref, seg_ref,
                    u_ref, *, C):
    x = x_ref[...]                                    # (B, N, D) f32
    B, N, D = x.shape
    E = wqg_ref.shape[1]                              # 3 * D
    H = seg_ref.shape[1]
    hd = E // H

    # Flatten the batch for the big projections (N rows per batch is
    # sublane-aligned in f32, so this reshape is layout-free).
    x2 = x.reshape(B * N, D)
    xb = x2.astype(jnp.bfloat16)                      # MXU operand

    # graph embedding (mean over nodes), kept in f32
    graph = jnp.mean(x, axis=1)                       # (B, D)

    # query from context [graph_emb, first, last]; the constant [first, last]
    # part (+ q bias) is precomputed once as q_const.
    Q = jnp.dot(graph.astype(jnp.bfloat16), wqg_ref[...],
                preferred_element_type=jnp.float32) + qc_ref[...]           # (B, E)

    # fused K / V projection: one (B*N, D) @ (D, 2E) matmul, sliced at the
    # lane-tile-aligned boundary E (E % 128 == 0).
    KV = jnp.dot(xb, wkv_ref[...],
                 preferred_element_type=jnp.float32) + bkv_ref[...]         # (B*N, 2E)
    K3 = KV[:, :E].reshape(B, N, E)
    V3 = KV[:, E:].reshape(B, N, E)

    # per-head scores without head reshapes: seg is 0/1 so f32 is exact.
    qk = (Q[:, None, :] * K3).reshape(B * N, E)                             # f32
    scores = jnp.dot(qk, seg_ref[...], preferred_element_type=jnp.float32)  # (B*N, H)
    scores = scores.reshape(B, N, H) * (1.0 / (hd ** 0.5)) + mattn_ref[...]

    # softmax over the node (source) axis, per batch and head (f32)
    s_max = jnp.max(scores, axis=1, keepdims=True)                          # (B, 1, H)
    p = jnp.exp(scores - s_max)
    p = p / jnp.sum(p, axis=1, keepdims=True)                               # (B, N, H)

    # scatter head weights back onto the feature axis (f32, exact) and combine
    p_full = jax.lax.dot_general(p.reshape(B * N, H), seg_ref[...],
                                 (((1,), (1,)), ((), ())),
                                 preferred_element_type=jnp.float32)        # (B*N, E)
    attn = jnp.sum(p_full.reshape(B, N, E) * V3, axis=1)                    # (B, E)

    out = jnp.dot(attn.astype(jnp.bfloat16), wo_ref[...],
                  preferred_element_type=jnp.float32) + bo_ref[...]         # (B, E)
    qv = jnp.dot(out.astype(jnp.bfloat16), watt_ref[...],
                 preferred_element_type=jnp.float32)                        # (B, D)

    # compatibility keys: computed late (only consumer is below) so their
    # live range does not overlap the large attention intermediates.
    k2 = jnp.dot(xb, wkp_ref[...], preferred_element_type=jnp.float32)      # (B*N, D)

    # u[b, n] = qv[b] . k2[b*N + n]: compute the full (B, B*N) product on the
    # MXU and fold out the block diagonal with a sublane reduce, so the result
    # is produced directly in a lane-dense (1, B*N) layout (no masked 8-lane
    # stores, no sublane->lane reshape).
    u_all = jax.lax.dot_general(qv, k2, (((1,), (1,)), ((), ())),
                                preferred_element_type=jnp.float32)         # (B, B*N)
    rows = jax.lax.broadcasted_iota(jnp.int32, (B, B * N), 0)
    cols = jax.lax.broadcasted_iota(jnp.int32, (B, B * N), 1)
    sel = (cols >= rows * N) & (cols < rows * N + N)
    u_diag = jnp.sum(jnp.where(sel, u_all, 0.0), axis=0, keepdims=True)     # (1, B*N)

    u_ref[...] = jnp.tanh(u_diag * (1.0 / (D ** 0.5))) * C + mu_ref[...]


def _full_spec(shape):
    zeros = (0,) * len(shape)
    return pl.BlockSpec(shape, lambda g, _z=zeros: _z)


@functools.partial(jax.jit, static_argnames=("num_heads", "C"))
def graph_decoder_forward(node_embs, mask_bool, prep, *, num_heads=8, C=10.0):
    """Pallas implementation of GraphDecoder.forward (first step, rollout=True).

    `prep` comes from prepare_decoder_params (one-time).  Returns
    (nn_idx (B,1) int32, log_prob (B,) zeros, last_emb (B,1,D), u (B,N))."""
    B, N, D = node_embs.shape
    H = num_heads

    x = node_embs.astype(jnp.float32)

    # torch: attn_mask = mask.repeat(num_heads, 1) -> MHA consumes row b*H + h
    # for (batch b, head h), i.e. mask[(b*H + h) % B].  Bug-compat on purpose.
    row = (jnp.arange(B)[:, None] * H + jnp.arange(H)[None, :]) % B            # (B, H)
    mask_attn_bias = jnp.transpose(
        jnp.where(mask_bool[row], NEG, 0.0), (0, 2, 1)).astype(jnp.float32)    # (B, N, H)
    mask_u_bias = jnp.where(mask_bool, NEG, 0.0).astype(
        jnp.float32).reshape(1, B * N)                                         # (1, B*N)

    args = (x, mask_attn_bias, mask_u_bias,
            prep["w_kp"], prep["w_qg"], prep["q_const"],
            prep["w_kv"], prep["b_kv"],
            prep["w_out"], prep["b_out"], prep["w_att"], prep["seg"])

    kernel = functools.partial(_decoder_kernel, C=float(C))
    # Single grid step: v5e/v6e have one TensorCore, so a batch grid is pure
    # per-step overhead at this size.  For a v7x 2-TC split, reintroduce a
    # grid=(2,) batch axis with pltpu.CORE_PARALLEL (plain "parallel" does not
    # change codegen) -- not worth it for this overhead-bound kernel.
    u_flat = pl.pallas_call(
        kernel,
        grid=(1,),
        in_specs=[_full_spec(a.shape) for a in args],
        out_specs=pl.BlockSpec((1, B * N), lambda g: (0, 0)),
        out_shape=jax.ShapeDtypeStruct((1, B * N), jnp.float32),
        compiler_params=pltpu.CompilerParams(dimension_semantics=("arbitrary",)),
    )(*args)

    # Tiny epilogue (argmax + gather) done in the surrounding jit instead of
    # inside the kernel: removes two output DMAs and the one-hot VPU gather.
    u = u_flat.reshape(B, N)
    nn_idx = jnp.argmax(u, axis=-1).astype(jnp.int32)[:, None]                 # (B, 1)
    last_emb = jnp.take_along_axis(
        x, jnp.broadcast_to(nn_idx[:, :, None], (B, 1, D)), axis=1)            # new self.last_
    log_prob = jnp.zeros((B,), jnp.float32)                                    # rollout=True path
    return nn_idx, log_prob, last_emb, u


# ----------------------------------------------------------------------------
# Pure-JAX reference (standard multi-head attention with explicit head reshape)
# Mirrors the kernel numerics: weights and the activations feeding each MXU
# matmul rounded to bf16; accumulation / elementwise math in f32.
# ----------------------------------------------------------------------------
def reference_forward(node_embs, mask_bool, params, num_heads, C):
    B, N, D = node_embs.shape
    E = 3 * D
    H = num_heads
    hd = E // H
    r = lambda a: a.astype(jnp.bfloat16).astype(jnp.float32)

    x = node_embs.astype(jnp.float32)
    xb = r(x)
    graph_b = r(jnp.mean(x, axis=1))                                      # (B, D)

    k = xb @ r(params["w_kp"].T)                                          # (B, N, D)

    Q = graph_b @ r(params["q_proj_w"].T[:D]) + _hoisted_q_const(params, D)
    K = xb @ r(params["k_proj_w"].T) + params["bk"]                       # (B, N, E)
    V = xb @ r(params["v_proj_w"].T) + params["bv"]                       # (B, N, E)

    Qh = Q.reshape(B, H, hd)
    Kh = K.reshape(B, N, H, hd)
    Vh = V.reshape(B, N, H, hd)
    scores = jnp.einsum("bhd,bnhd->bnh", Qh, Kh) / (hd ** 0.5)            # (B, N, H)

    row = (jnp.arange(B)[:, None] * H + jnp.arange(H)[None, :]) % B
    scores = scores + jnp.where(mask_bool[row], NEG, 0.0).transpose(0, 2, 1)
    p = jax.nn.softmax(scores, axis=1)                                    # (B, N, H)
    attn = jnp.einsum("bnh,bnhd->bhd", p, Vh).reshape(B, E)

    out = r(attn) @ r(params["out_proj_w"].T) + params["bo"]              # (B, E)
    qv = r(out) @ r(params["att_output_w"].T)                             # (B, D)

    u = jnp.tanh(jnp.einsum("bd,bnd->bn", qv, k) / (D ** 0.5)) * C
    u = u + jnp.where(mask_bool, NEG, 0.0)

    nn_idx = jnp.argmax(u, axis=-1).astype(jnp.int32)[:, None]            # (B, 1)
    last_emb = jnp.take_along_axis(
        x, jnp.broadcast_to(nn_idx[..., None], (B, 1, D)), axis=1)
    log_prob = jnp.zeros((B,), jnp.float32)
    return nn_idx, log_prob, last_emb, u


def init_params(key, emb_dim=128, num_heads=8):
    D = emb_dim
    E = 3 * D
    ks = jax.random.split(key, 11)
    uni = lambda k, shape: jax.random.uniform(k, shape, jnp.float32)
    nrm = lambda k, shape, s=0.05: jax.random.normal(k, shape, jnp.float32) * s
    return {
        "first_node": uni(ks[0], (1, D)),     # nn.Parameter(torch.rand(1, 1, emb_dim))
        "last_node": uni(ks[1], (1, D)),
        "w_kp": nrm(ks[2], (D, D)),           # Linear(emb, emb, bias=False)
        "q_proj_w": nrm(ks[3], (E, E)),       # MHA q_proj_weight
        "k_proj_w": nrm(ks[4], (E, D)),       # MHA k_proj_weight (kdim=D)
        "v_proj_w": nrm(ks[5], (E, D)),       # MHA v_proj_weight (vdim=D)
        "bq": nrm(ks[6], (E,)),
        "bk": nrm(ks[7], (E,)),
        "bv": nrm(ks[8], (E,)),
        "out_proj_w": nrm(ks[9], (E, E)),
        "bo": jnp.zeros((E,), jnp.float32),   # MHA out_proj bias init = 0
        "att_output_w": nrm(ks[10], (D, E)),  # Linear(3*emb, emb, bias=False)
    }


if __name__ == "__main__":
    B, N, D, H = 16, 8, 128, 8
    key = jax.random.PRNGKey(0)
    k_node, k_mask, k_params = jax.random.split(key, 3)

    node_embs = jax.random.normal(k_node, (B, N, D), jnp.float32)
    mask_bool = jax.random.uniform(k_mask, (B, N)) < 0.3
    mask_bool = mask_bool.at[:, 0].set(False)   # keep at least one node available
    params = init_params(k_params, emb_dim=D, num_heads=H)

    # One-time weight preparation (hoisted out of the per-step forward).
    prep = prepare_decoder_params(params, emb_dim=D, num_heads=H)
    prep = jax.tree_util.tree_map(jax.block_until_ready, prep)

    nn_idx, log_prob, last_emb, u_k = graph_decoder_forward(
        node_embs, mask_bool, prep, num_heads=H, C=10.0)
    jax.block_until_ready((nn_idx, log_prob, last_emb, u_k))

    with jax.default_matmul_precision("highest"):
        r_idx, r_logp, r_last, u_r = reference_forward(node_embs, mask_bool, params, H, 10.0)

    # 1) logits match the (bf16-weight) reference on unmasked entries
    u_err = float(jnp.max(jnp.abs(jnp.where(mask_bool, 0.0, u_k - u_r))))
    assert u_err < 1e-1, f"logit mismatch: {u_err}"
    # 2) the chosen node is never a masked node
    assert not bool(jnp.any(jnp.take_along_axis(mask_bool, nn_idx, axis=1)))
    # 3) the chosen node maximizes the reference logits (up to numerical tol)
    picked = jnp.take_along_axis(u_r, nn_idx, axis=1)[:, 0]
    assert bool(jnp.all(picked >= jnp.max(u_r, axis=-1) - 2e-1)), "argmax mismatch"
    # 4) gathered embedding (new self.last_) is exactly node_embs[b, nn_idx[b]]
    expect_last = jnp.take_along_axis(
        node_embs, jnp.broadcast_to(nn_idx[:, :, None], (B, 1, D)), axis=1)
    assert bool(jnp.array_equal(last_emb, expect_last))
    # 5) rollout log-probs are zero
    assert bool(jnp.array_equal(log_prob, jnp.zeros((B,), jnp.float32)))

    print("KERNEL_OK")
</pallas_src>

<mosaic_0001>
module attributes {stable_mosaic.version = 11 : i64} {
  func.func @_decoder_kernel(%arg0: i32, %arg1: memref<16x8x128xf32, #tpu.memory_space<vmem>>, %arg2: memref<16x8x8xf32, #tpu.memory_space<vmem>>, %arg3: memref<1x128xf32, #tpu.memory_space<vmem>>, %arg4: memref<128x128xbf16, #tpu.memory_space<vmem>>, %arg5: memref<128x384xbf16, #tpu.memory_space<vmem>>, %arg6: memref<1x384xf32, #tpu.memory_space<vmem>>, %arg7: memref<128x768xbf16, #tpu.memory_space<vmem>>, %arg8: memref<1x768xf32, #tpu.memory_space<vmem>>, %arg9: memref<384x384xbf16, #tpu.memory_space<vmem>>, %arg10: memref<1x384xf32, #tpu.memory_space<vmem>>, %arg11: memref<384x128xbf16, #tpu.memory_space<vmem>>, %arg12: memref<384x8xf32, #tpu.memory_space<vmem>>, %arg13: memref<1x128xf32, #tpu.memory_space<vmem>>) attributes {dimension_semantics = [#tpu.dimension_semantics<arbitrary>], iteration_bounds = array<i64: 1>, scalar_prefetch = 0 : i64, scratch_operands = 0 : i64, tpu.core_type = #tpu.core_type<tc>, window_params = [{pipeline_mode = #tpu.pipeline_mode<synchronous>, transform_indices = @transform_0, window_bounds = array<i64: 16, 8, 128>}, {pipeline_mode = #tpu.pipeline_mode<synchronous>, transform_indices = @transform_1, window_bounds = array<i64: 16, 8, 8>}, {pipeline_mode = #tpu.pipeline_mode<synchronous>, transform_indices = @transform_2, window_bounds = array<i64: 1, 128>}, {pipeline_mode = #tpu.pipeline_mode<synchronous>, transform_indices = @transform_3, window_bounds = array<i64: 128, 128>}, {pipeline_mode = #tpu.pipeline_mode<synchronous>, transform_indices = @transform_4, window_bounds = array<i64: 128, 384>}, {pipeline_mode = #tpu.pipeline_mode<synchronous>, transform_indices = @transform_5, window_bounds = array<i64: 1, 384>}, {pipeline_mode = #tpu.pipeline_mode<synchronous>, transform_indices = @transform_6, window_bounds = array<i64: 128, 768>}, {pipeline_mode = #tpu.pipeline_mode<synchronous>, transform_indices = @transform_7, window_bounds = array<i64: 1, 768>}, {pipeline_mode = #tpu.pipeline_mode<synchronous>, transform_indices = @transform_8, window_bounds = array<i64: 384, 384>}, {pipeline_mode = #tpu.pipeline_mode<synchronous>, transform_indices = @transform_9, window_bounds = array<i64: 1, 384>}, {pipeline_mode = #tpu.pipeline_mode<synchronous>, transform_indices = @transform_10, window_bounds = array<i64: 384, 128>}, {pipeline_mode = #tpu.pipeline_mode<synchronous>, transform_indices = @transform_11, window_bounds = array<i64: 384, 8>}, {pipeline_mode = #tpu.pipeline_mode<synchronous>, transform_indices = @transform_12, window_bounds = array<i64: 1, 128>}]} {
    %c0 = arith.constant 0 : index
    %c0_0 = arith.constant 0 : index
    %c0_1 = arith.constant 0 : index
    %0 = vector.load %arg1[%c0, %c0_0, %c0_1] : memref<16x8x128xf32, #tpu.memory_space<vmem>>, vector<16x8x128xf32>
    %1 = vector.shape_cast %0 : vector<16x8x128xf32> to vector<128x128xf32>
    %2 = arith.truncf %1 : vector<128x128xf32> to vector<128x128xbf16>
    %cst = arith.constant dense<0.000000e+00> : vector<16x128xf32>
    %3 = vector.multi_reduction <add>, %0, %cst [1] : vector<16x8x128xf32> to vector<16x128xf32>
    %cst_2 = arith.constant 8.000000e+00 : f32
    %4 = vector.broadcast %cst_2 : f32 to vector<16x128xf32>
    %5 = arith.divf %3, %4 : vector<16x128xf32>
    %6 = arith.truncf %5 : vector<16x128xf32> to vector<16x128xbf16>
    %c0_3 = arith.constant 0 : index
    %c0_4 = arith.constant 0 : index
    %7 = vector.load %arg5[%c0_3, %c0_4] : memref<128x384xbf16, #tpu.memory_space<vmem>>, vector<128x384xbf16>
    %cst_5 = arith.constant dense<0.000000e+00> : vector<16x384xf32>
    %8 = tpu.matmul %6, %7, %cst_5 {dimension_numbers = #tpu.dot_dimension_numbers<[1], [0], [0], [1], [0, 0, 1, 1], [], []>} : vector<16x128xbf16>, vector<128x384xbf16>, vector<16x384xf32> -> vector<16x384xf32>
    %c0_6 = arith.constant 0 : index
    %c0_7 = arith.constant 0 : index
    %9 = vector.load %arg6[%c0_6, %c0_7] : memref<1x384xf32, #tpu.memory_space<vmem>>, vector<1x384xf32>
    %10 = vector.broadcast %9 : vector<1x384xf32> to vector<16x384xf32>
    %11 = arith.addf %8, %10 : vector<16x384xf32>
    %c0_8 = arith.constant 0 : index
    %c0_9 = arith.constant 0 : index
    %12 = vector.load %arg7[%c0_8, %c0_9] : memref<128x768xbf16, #tpu.memory_space<vmem>>, vector<128x768xbf16>
    %cst_10 = arith.constant dense<0.000000e+00> : vector<128x768xf32>
    %13 = tpu.matmul %2, %12, %cst_10 {dimension_numbers = #tpu.dot_dimension_numbers<[1], [0], [0], [1], [0, 0, 1, 1], [], []>} : vector<128x128xbf16>, vector<128x768xbf16>, vector<128x768xf32> -> vector<128x768xf32>
    %c0_11 = arith.constant 0 : index
    %c0_12 = arith.constant 0 : index
    %14 = vector.load %arg8[%c0_11, %c0_12] : memref<1x768xf32, #tpu.memory_space<vmem>>, vector<1x768xf32>
    %15 = vector.broadcast %14 : vector<1x768xf32> to vector<128x768xf32>
    %16 = arith.addf %13, %15 : vector<128x768xf32>
    %17 = vector.extract_strided_slice %16 {offsets = [0, 0], sizes = [128, 384], strides = [1, 1]} : vector<128x768xf32> to vector<128x384xf32>
    %18 = vector.shape_cast %17 : vector<128x384xf32> to vector<16x8x384xf32>
    %19 = vector.extract_strided_slice %16 {offsets = [0, 384], sizes = [128, 384], strides = [1, 1]} : vector<128x768xf32> to vector<128x384xf32>
    %20 = vector.shape_cast %19 : vector<128x384xf32> to vector<16x8x384xf32>
    %21 = vector.shape_cast %11 : vector<16x384xf32> to vector<16x1x384xf32>
    %22 = vector.broadcast %21 : vector<16x1x384xf32> to vector<16x8x384xf32>
    %23 = arith.mulf %22, %18 : vector<16x8x384xf32>
    %24 = vector.shape_cast %23 : vector<16x8x384xf32> to vector<128x384xf32>
    %c0_13 = arith.constant 0 : index
    %c0_14 = arith.constant 0 : index
    %25 = vector.load %arg12[%c0_13, %c0_14] : memref<384x8xf32, #tpu.memory_space<vmem>>, vector<384x8xf32>
    %cst_15 = arith.constant dense<0.000000e+00> : vector<128x8xf32>
    %26 = tpu.matmul %24, %25, %cst_15 {dimension_numbers = #tpu.dot_dimension_numbers<[1], [0], [0], [1], [0, 0, 1, 1], [], []>} : vector<128x384xf32>, vector<384x8xf32>, vector<128x8xf32> -> vector<128x8xf32>
    %27 = vector.shape_cast %26 : vector<128x8xf32> to vector<16x8x8xf32>
    %cst_16 = arith.constant 0.144337565 : f32
    %28 = vector.broadcast %cst_16 : f32 to vector<16x8x8xf32>
    %29 = arith.mulf %27, %28 : vector<16x8x8xf32>
    %c0_17 = arith.constant 0 : index
    %c0_18 = arith.constant 0 : index
    %c0_19 = arith.constant 0 : index
    %30 = vector.load %arg2[%c0_17, %c0_18, %c0_19] : memref<16x8x8xf32, #tpu.memory_space<vmem>>, vector<16x8x8xf32>
    %31 = arith.addf %29, %30 : vector<16x8x8xf32>
    %cst_20 = arith.constant dense<0xFF800000> : vector<16x8xf32>
    %32 = vector.multi_reduction <maximumf>, %31, %cst_20 [1] : vector<16x8x8xf32> to vector<16x8xf32>
    %33 = vector.shape_cast %32 : vector<16x8xf32> to vector<16x1x8xf32>
    %34 = vector.broadcast %33 : vector<16x1x8xf32> to vector<16x8x8xf32>
    %35 = arith.subf %31, %34 : vector<16x8x8xf32>
    %36 = math.exp %35 : vector<16x8x8xf32>
    %cst_21 = arith.constant dense<0.000000e+00> : vector<16x8xf32>
    %37 = vector.multi_reduction <add>, %36, %cst_21 [1] : vector<16x8x8xf32> to vector<16x8xf32>
    %38 = vector.shape_cast %37 : vector<16x8xf32> to vector<16x1x8xf32>
    %39 = vector.broadcast %38 : vector<16x1x8xf32> to vector<16x8x8xf32>
    %40 = arith.divf %36, %39 : vector<16x8x8xf32>
    %41 = vector.shape_cast %40 : vector<16x8x8xf32> to vector<128x8xf32>
    %c0_22 = arith.constant 0 : index
    %c0_23 = arith.constant 0 : index
    %42 = vector.load %arg12[%c0_22, %c0_23] : memref<384x8xf32, #tpu.memory_space<vmem>>, vector<384x8xf32>
    %cst_24 = arith.constant dense<0.000000e+00> : vector<128x384xf32>
    %43 = tpu.matmul %41, %42, %cst_24 {dimension_numbers = #tpu.dot_dimension_numbers<[1], [1], [0], [0], [0, 0, 1, 0], [], []>} : vector<128x8xf32>, vector<384x8xf32>, vector<128x384xf32> -> vector<128x384xf32>
    %44 = vector.shape_cast %43 : vector<128x384xf32> to vector<16x8x384xf32>
    %45 = arith.mulf %44, %20 : vector<16x8x384xf32>
    %cst_25 = arith.constant dense<0.000000e+00> : vector<16x384xf32>
    %46 = vector.multi_reduction <add>, %45, %cst_25 [1] : vector<16x8x384xf32> to vector<16x384xf32>
    %47 = arith.truncf %46 : vector<16x384xf32> to vector<16x384xbf16>
    %c0_26 = arith.constant 0 : index
    %c0_27 = arith.constant 0 : index
    %48 = vector.load %arg9[%c0_26, %c0_27] : memref<384x384xbf16, #tpu.memory_space<vmem>>, vector<384x384xbf16>
    %cst_28 = arith.constant dense<0.000000e+00> : vector<16x384xf32>
    %49 = tpu.matmul %47, %48, %cst_28 {dimension_numbers = #tpu.dot_dimension_numbers<[1], [0], [0], [1], [0, 0, 1, 1], [], []>} : vector<16x384xbf16>, vector<384x384xbf16>, vector<16x384xf32> -> vector<16x384xf32>
    %c0_29 = arith.constant 0 : index
    %c0_30 = arith.constant 0 : index
    %50 = vector.load %arg10[%c0_29, %c0_30] : memref<1x384xf32, #tpu.memory_space<vmem>>, vector<1x384xf32>
    %51 = vector.broadcast %50 : vector<1x384xf32> to vector<16x384xf32>
    %52 = arith.addf %49, %51 : vector<16x384xf32>
    %53 = arith.truncf %52 : vector<16x384xf32> to vector<16x384xbf16>
    %c0_31 = arith.constant 0 : index
    %c0_32 = arith.constant 0 : index
    %54 = vector.load %arg11[%c0_31, %c0_32] : memref<384x128xbf16, #tpu.memory_space<vmem>>, vector<384x128xbf16>
    %cst_33 = arith.constant dense<0.000000e+00> : vector<16x128xf32>
    %55 = tpu.matmul %53, %54, %cst_33 {dimension_numbers = #tpu.dot_dimension_numbers<[1], [0], [0], [1], [0, 0, 1, 1], [], []>} : vector<16x384xbf16>, vector<384x128xbf16>, vector<16x128xf32> -> vector<16x128xf32>
    %c0_34 = arith.constant 0 : index
    %c0_35 = arith.constant 0 : index
    %56 = vector.load %arg4[%c0_34, %c0_35] : memref<128x128xbf16, #tpu.memory_space<vmem>>, vector<128x128xbf16>
    %cst_36 = arith.constant dense<0.000000e+00> : vector<128x128xf32>
    %57 = tpu.matmul %2, %56, %cst_36 {dimension_numbers = #tpu.dot_dimension_numbers<[1], [0], [0], [1], [0, 0, 1, 1], [], []>} : vector<128x128xbf16>, vector<128x128xbf16>, vector<128x128xf32> -> vector<128x128xf32>
    %cst_37 = arith.constant dense<0.000000e+00> : vector<16x128xf32>
    %58 = tpu.matmul %55, %57, %cst_37 {dimension_numbers = #tpu.dot_dimension_numbers<[1], [1], [0], [0], [0, 0, 1, 0], [], []>} : vector<16x128xf32>, vector<128x128xf32>, vector<16x128xf32> -> vector<16x128xf32>
    %59 = tpu.iota {dimensions = array<i32: 0>} : vector<16x128xi32>
    %60 = tpu.iota {dimensions = array<i32: 1>} : vector<16x128xi32>
    %c8_i32 = arith.constant 8 : i32
    %61 = vector.broadcast %c8_i32 : i32 to vector<16x128xi32>
    %62 = arith.muli %59, %61 : vector<16x128xi32>
    %63 = arith.cmpi sge, %60, %62 : vector<16x128xi32>
    %c8_i32_38 = arith.constant 8 : i32
    %64 = vector.broadcast %c8_i32_38 : i32 to vector<16x128xi32>
    %65 = arith.muli %59, %64 : vector<16x128xi32>
    %c8_i32_39 = arith.constant 8 : i32
    %66 = vector.broadcast %c8_i32_39 : i32 to vector<16x128xi32>
    %67 = arith.addi %65, %66 : vector<16x128xi32>
    %68 = arith.cmpi slt, %60, %67 : vector<16x128xi32>
    %69 = arith.andi %63, %68 : vector<16x128xi1>
    %cst_40 = arith.constant 0.000000e+00 : f32
    %70 = vector.broadcast %cst_40 : f32 to vector<16x128xf32>
    %71 = arith.select %69, %58, %70 : vector<16x128xi1>, vector<16x128xf32>
    %cst_41 = arith.constant dense<0.000000e+00> : vector<128xf32>
    %72 = vector.multi_reduction <add>, %71, %cst_41 [0] : vector<16x128xf32> to vector<128xf32>
    %73 = vector.shape_cast %72 : vector<128xf32> to vector<1x128xf32>
    %cst_42 = arith.constant 0.0883883461 : f32
    %74 = vector.broadcast %cst_42 : f32 to vector<1x128xf32>
    %75 = arith.mulf %73, %74 : vector<1x128xf32>
    %76 = math.tanh %75 : vector<1x128xf32>
    %cst_43 = arith.constant 1.000000e+01 : f32
    %77 = vector.broadcast %cst_43 : f32 to vector<1x128xf32>
    %78 = arith.mulf %76, %77 : vector<1x128xf32>
    %c0_44 = arith.constant 0 : index
    %c0_45 = arith.constant 0 : index
    %79 = vector.load %arg3[%c0_44, %c0_45] : memref<1x128xf32, #tpu.memory_space<vmem>>, vector<1x128xf32>
    %80 = arith.addf %78, %79 : vector<1x128xf32>
    %c0_46 = arith.constant 0 : index
    %c0_47 = arith.constant 0 : index
    %81 = vector.load %arg13[%c0_46, %c0_47] : memref<1x128xf32, #tpu.memory_space<vmem>>, vector<1x128xf32>
    tpu.vector_store %arg13[%c0_46, %c0_47], %80 {strides = array<i32>} : memref<1x128xf32, #tpu.memory_space<vmem>>, vector<1x128xf32>,
    return
  }
  func.func @transform_0(%arg0: i32) -> (i32, i32, i32) {
    %c0_i32 = arith.constant 0 : i32
    %c0_i32_0 = arith.constant 0 : i32
    %c0_i32_1 = arith.constant 0 : i32
    %c0_i32_2 = arith.constant 0 : i32
    return %c0_i32, %c0_i32_0, %c0_i32_1 : i32, i32, i32
  }
  func.func @transform_1(%arg0: i32) -> (i32, i32, i32) {
    %c0_i32 = arith.constant 0 : i32
    %c0_i32_0 = arith.constant 0 : i32
    %c0_i32_1 = arith.constant 0 : i32
    %c0_i32_2 = arith.constant 0 : i32
    return %c0_i32, %c0_i32_0, %c0_i32_1 : i32, i32, i32
  }
  func.func @transform_2(%arg0: i32) -> (i32, i32) {
    %c0_i32 = arith.constant 0 : i32
    %c0_i32_0 = arith.constant 0 : i32
    %c0_i32_1 = arith.constant 0 : i32
    return %c0_i32, %c0_i32_0 : i32, i32
  }
  func.func @transform_3(%arg0: i32) -> (i32, i32) {
    %c0_i32 = arith.constant 0 : i32
    %c0_i32_0 = arith.constant 0 : i32
    %c0_i32_1 = arith.constant 0 : i32
    return %c0_i32, %c0_i32_0 : i32, i32
  }
  func.func @transform_4(%arg0: i32) -> (i32, i32) {
    %c0_i32 = arith.constant 0 : i32
    %c0_i32_0 = arith.constant 0 : i32
    %c0_i32_1 = arith.constant 0 : i32
    return %c0_i32, %c0_i32_0 : i32, i32
  }
  func.func @transform_5(%arg0: i32) -> (i32, i32) {
    %c0_i32 = arith.constant 0 : i32
    %c0_i32_0 = arith.constant 0 : i32
    %c0_i32_1 = arith.constant 0 : i32
    return %c0_i32, %c0_i32_0 : i32, i32
  }
  func.func @transform_6(%arg0: i32) -> (i32, i32) {
    %c0_i32 = arith.constant 0 : i32
    %c0_i32_0 = arith.constant 0 : i32
    %c0_i32_1 = arith.constant 0 : i32
    return %c0_i32, %c0_i32_0 : i32, i32
  }
  func.func @transform_7(%arg0: i32) -> (i32, i32) {
    %c0_i32 = arith.constant 0 : i32
    %c0_i32_0 = arith.constant 0 : i32
    %c0_i32_1 = arith.constant 0 : i32
    return %c0_i32, %c0_i32_0 : i32, i32
  }
  func.func @transform_8(%arg0: i32) -> (i32, i32) {
    %c0_i32 = arith.constant 0 : i32
    %c0_i32_0 = arith.constant 0 : i32
    %c0_i32_1 = arith.constant 0 : i32
    return %c0_i32, %c0_i32_0 : i32, i32
  }
  func.func @transform_9(%arg0: i32) -> (i32, i32) {
    %c0_i32 = arith.constant 0 : i32
    %c0_i32_0 = arith.constant 0 : i32
    %c0_i32_1 = arith.constant 0 : i32
    return %c0_i32, %c0_i32_0 : i32, i32
  }
  func.func @transform_10(%arg0: i32) -> (i32, i32) {
    %c0_i32 = arith.constant 0 : i32
    %c0_i32_0 = arith.constant 0 : i32
    %c0_i32_1 = arith.constant 0 : i32
    return %c0_i32, %c0_i32_0 : i32, i32
  }
  func.func @transform_11(%arg0: i32) -> (i32, i32) {
    %c0_i32 = arith.constant 0 : i32
    %c0_i32_0 = arith.constant 0 : i32
    %c0_i32_1 = arith.constant 0 : i32
    return %c0_i32, %c0_i32_0 : i32, i32
  }
  func.func @transform_12(%arg0: i32) -> (i32, i32) {
    %c0_i32 = arith.constant 0 : i32
    %c0_i32_0 = arith.constant 0 : i32
    %c0_i32_1 = arith.constant 0 : i32
    return %c0_i32, %c0_i32_0 : i32, i32
  }
}

</mosaic_0001>

<bundles_post_ra>
// kernel: graph_decoder_forward.1
= control target key start
LH: loop header
LB: loop body
LE: loop exit
PB: predicated region body
PF: predicated region fallthrough
CT: control target
= control target key end

     0   :  { %17 = vsyncpa [#allocation3], 0  ;;  %s5111_s24 = smov [#allocation2]   ;;  %s5112_s26 = smov 384   ;;  %s7713_s0 = inlined_call_operand.vmem [shape: f32[16,8,128], index: 0, kind: input, shape index: {}]   ;;  %s7714_s1 = inlined_call_operand.vmem [shape: f32[16,8,8], index: 1, kind: input, shape index: {}]   ;;  %s7715_s2 = inlined_call_operand.vmem [shape: f32[1,128], index: 2, kind: input, shape index: {}]   ;;  %s7716_s3 = inlined_call_operand.vmem [shape: bf16[128,128], index: 3, kind: input, shape index: {}]   ;;  %s7717_s4 = inlined_call_operand.vmem [shape: bf16[128,384], index: 4, kind: input, shape index: {}]   ;;  %s7718_s5 = inlined_call_operand.vmem [shape: f32[1,384], index: 5, kind: input, shape index: {}]   ;;  %s7719_s6 = inlined_call_operand.hbm [shape: bf16[128,768], index: 6, kind: input, shape index: {}]   ;;  %s7720_s7 = inlined_call_operand.vmem [shape: f32[1,768], index: 7, kind: input, shape index: {}]   ;;  %s7721_s8 = inlined_call_operand.vmem [shape: bf16[384,384], index: 8, kind: input, shape index: {}]   ;;  %s7722_s9 = inlined_call_operand.vmem [shape: f32[1,384], index: 9, kind: input, shape index: {}]   ;;  %s7723_s10 = inlined_call_operand.vmem [shape: bf16[384,128], index: 10, kind: input, shape index: {}]   ;;  %s7724_s11 = inlined_call_operand.vmem [shape: f32[384,8], index: 11, kind: input, shape index: {}]   ;;  %s7725_s12 = inlined_call_operand.vmem [shape: f32[1,128], index: 12, kind: output, shape index: {}]  }
   0x1   :  { %s34_s23 = sshll.u32 %s7719_s6, 4  ;;  %s36_s25 = sshll.u32 %s5111_s24, 4  ;;  %s35_s23 = int_to_ptr.hbm [resolvable:$true] %s34_s23  ;;  %s37_s25 = int_to_ptr.vmem [resolvable:$true] %s36_s25 }
   0x2   :  { %s5113_s27 = smov 24  }
   0x3   :  { %42 = dma.hbm_to_vmem [thread:$0]  %s35_s23, 6144, %s37_s25, [#allocation3], %s5112_s26, %s5112_s26, %s5113_s27  }
   0x4   :  { %5109 = dma.done.wait [#allocation3], 6144  }
   0x5   :  { %5110 = vsyncadd [#allocation3], 4294961152  ;;  %v4114_v0 = vld [vmem:[%s7717_s4 + $0xa8] sm:$0xf]  ;;  %v4850_v1 = vld [vmem:[%s7717_s4 + $0xb0] sm:$0xf0] }
   0x6   :  { %v4849_v2 = vld [vmem:[%s7717_s4 + $0xac] sm:$0xf]  ;;  %v4115_v3 = vor.u32 %v4850_v1, %v4114_v0  ;;  %v4116_v4 = vld [vmem:[%s7717_s4 + $0xb4] sm:$0xf0]  ;;  %v4294_v5 = vld [vmem:[#allocation2 + $0x150] sm:$0xf] }
   0x7   :  { %v4897_v6 = vld [vmem:[#allocation2 + $0x164] sm:$0xf0]  ;;  %v4119_v7 = vor.u32 %v4849_v2, %v4116_v4  ;;  %v4894_v9 = vld [vmem:[#allocation2 + $0x154] sm:$0xf]  ;;  %v4296_v10 = vld [vmem:[#allocation2 + $0x168] sm:$0xf0] }
   0x8   :  { %v5195_v8 = vor.u32 %v4897_v6, %v4294_v5  ;;  %v4102_v11 = vld [vmem:[%s7717_s4 + $0x90] sm:$0xf]  ;;  %439 = vmatpush.bf16.msra.mxu2 %v4115_v3  ;;  %v4299_v12 = vor.u32 %v4894_v9, %v4296_v10  ;;  %v4847_v13 = vld [vmem:[%s7717_s4 + $0x98] sm:$0xf0]  ;;  %v4846_v14 = vld [vmem:[%s7717_s4 + $0x94] sm:$0xf] }
   0x9   :  { %v4104_v15 = vld [vmem:[%s7717_s4 + $0x9c] sm:$0xf0]  ;;  %453 = vmatpush.bf16.msra.mxu1 %v4119_v7  ;;  %v4103_v16 = vor.u32 %v4847_v13, %v4102_v11  ;;  %v4891_v19 = vld [vmem:[#allocation2 + $0x134] sm:$0xf0]  ;;  %v4888_v20 = vld [vmem:[#allocation2 + $0x124] sm:$0xf] }
   0xa   :  { %5004 = vmatpush.bf16.msra.mxu3 %v5195_v8  ;;  %v4107_v17 = vor.u32 %v4846_v14, %v4104_v15  ;;  %v4270_v18 = vld [vmem:[#allocation2 + $0x120] sm:$0xf]  ;;  %832 = vmatpush.bf16.msra.mxu0 %v4299_v12  ;;  %v4272_v22 = vld [vmem:[#allocation2 + $0x138] sm:$0xf0]  ;;  %v4090_v23 = vld [vmem:[%s7717_s4 + $0x78] sm:$0xf] }
   0xb   :  { %v5210_v21 = vor.u32 %v4891_v19, %v4270_v18  ;;  %v4844_v24 = vld [vmem:[%s7717_s4 + $0x80] sm:$0xf0]  ;;  %v4275_v25 = vor.u32 %v4888_v20, %v4272_v22  ;;  %v4843_v26 = vld [vmem:[%s7717_s4 + $0x7c] sm:$0xf]  ;;  %v4092_v27 = vld [vmem:[%s7717_s4 + $0x84] sm:$0xf0] }
   0xc   :  { %v4246_v28 = vld [vmem:[#allocation2 + $0xf0] sm:$0xf]  ;;  %440 = vmatpush.bf16.msra.mxu2 %v4103_v16  ;;  %v4091_v29 = vor.u32 %v4844_v24, %v4090_v23  ;;  %v4885_v30 = vld [vmem:[#allocation2 + $0x104] sm:$0xf0]  ;;  %v4882_v31 = vld [vmem:[#allocation2 + $0xf4] sm:$0xf]  ;;  %v4095_v33 = vor.u32 %v4843_v26, %v4092_v27 }
   0xd   :  { %v4248_v32 = vld [vmem:[#allocation2 + $0x108] sm:$0xf0]  ;;  %454 = vmatpush.bf16.msra.mxu1 %v4107_v17  ;;  %v5225_v34 = vor.u32 %v4885_v30, %v4246_v28  ;;  %v4078_v35 = vld [vmem:[%s7717_s4 + $0x60] sm:$0xf]  ;;  %v4840_v37 = vld [vmem:[%s7717_s4 + $0x64] sm:$0xf] }
   0xe   :  { %5005 = vmatpush.bf16.msra.mxu3 %v5210_v21  ;;  %v4841_v36 = vld [vmem:[%s7717_s4 + $0x68] sm:$0xf0]  ;;  %833 = vmatpush.bf16.msra.mxu0 %v4275_v25  ;;  %v4251_v38 = vor.u32 %v4882_v31, %v4248_v32  ;;  %v4080_v39 = vld [vmem:[%s7717_s4 + $0x6c] sm:$0xf0]  ;;  %v4222_v40 = vld [vmem:[#allocation2 + $0xc0] sm:$0xf] }
   0xf   :  { %v4879_v41 = vld [vmem:[#allocation2 + $0xd4] sm:$0xf0]  ;;  %v4876_v42 = vld [vmem:[#allocation2 + $0xc4] sm:$0xf]  ;;  %v4224_v43 = vld [vmem:[#allocation2 + $0xd8] sm:$0xf0]  ;;  %v4079_v44 = vor.u32 %v4841_v36, %v4078_v35  ;;  %v4083_v46 = vor.u32 %v4840_v37, %v4080_v39 }
  0x10   :  { %441 = vmatpush.bf16.msra.mxu2 %v4091_v29  ;;  %v4066_v45 = vld [vmem:[%s7717_s4 + $0x48] sm:$0xf]  ;;  %v5243_v47 = vor.u32 %v4879_v41, %v4222_v40  ;;  %v4838_v48 = vld [vmem:[%s7717_s4 + $0x50] sm:$0xf0]  ;;  %v4837_v49 = vld [vmem:[%s7717_s4 + $0x4c] sm:$0xf]  ;;  %v4227_v51 = vor.u32 %v4876_v42, %v4224_v43 }
  0x11   :  { %455 = vmatpush.bf16.msra.mxu1 %v4095_v33  ;;  %v4068_v50 = vld [vmem:[%s7717_s4 + $0x54] sm:$0xf0]  ;;  %v4198_v52 = vld [vmem:[#allocation2 + $0x90] sm:$0xf]  ;;  %v4873_v53 = vld [vmem:[#allocation2 + $0xa4] sm:$0xf0]  ;;  %v4067_v58 = vor.u32 %v4838_v48, %v4066_v45 }
  0x12   :  { %5006 = vmatpush.bf16.msra.mxu3 %v5225_v34  ;;  %834 = vmatpush.bf16.msra.mxu0 %v4251_v38  ;;  %v4870_v54 = vld [vmem:[#allocation2 + $0x94] sm:$0xf]  ;;  %v4200_v55 = vld [vmem:[#allocation2 + $0xa8] sm:$0xf0]  ;;  %v4054_v56 = vld [vmem:[%s7717_s4 + $0x30] sm:$0xf]  ;;  %v4071_v62 = vor.u32 %v4837_v49, %v4068_v50  ;;  %v5267_v63 = vor.u32 %v4873_v53, %v4198_v52 }
  0x13   :  { %v4835_v57 = vld [vmem:[%s7717_s4 + $0x38] sm:$0xf0]  ;;  %v4834_v59 = vld [vmem:[%s7717_s4 + $0x34] sm:$0xf]  ;;  %v4056_v60 = vld [vmem:[%s7717_s4 + $0x3c] sm:$0xf0]  ;;  %v4203_v3 = vor.u32 %v4870_v54, %v4200_v55 }
  0x14   :  { %442 = vmatpush.bf16.msra.mxu2 %v4079_v44  ;;  %v4174_v61 = vld [vmem:[#allocation2 + $0x60] sm:$0xf]  ;;  %v4867_v0 = vld [vmem:[#allocation2 + $0x74] sm:$0xf0]  ;;  %v4864_v1 = vld [vmem:[#allocation2 + $0x64] sm:$0xf]  ;;  %v4055_v14 = vor.u32 %v4835_v57, %v4054_v56  ;;  %v4059_v18 = vor.u32 %v4834_v59, %v4056_v60 }
  0x15   :  { %456 = vmatpush.bf16.msra.mxu1 %v4083_v46  ;;  %v4176_v2 = vld [vmem:[#allocation2 + $0x78] sm:$0xf0]  ;;  %v4042_v4 = vld [vmem:[%s7717_s4 + $0x18] sm:$0xf]  ;;  %v4832_v5 = vld [vmem:[%s7717_s4 + $0x20] sm:$0xf0]  ;;  %v5310_v19 = vor.u32 %v4867_v0, %v4174_v61 }
  0x16   :  { %5007 = vmatpush.bf16.msra.mxu3 %v5243_v47  ;;  %835 = vmatpush.bf16.msra.mxu0 %v4227_v51  ;;  %v5278_v6 = vld [vmem:[%s7717_s4 + $0x1c] sm:$0xf]  ;;  %v5283_v7 = vld [vmem:[%s7717_s4 + $0x24] sm:$0xf0]  ;;  %v4150_v9 = vld [vmem:[#allocation2 + $0x30] sm:$0xf]  ;;  %v4179_v24 = vor.u32 %v4864_v1, %v4176_v2  ;;  %v4043_v29 = vor.u32 %v4832_v5, %v4042_v4 }
  0x17   :  { %v4861_v10 = vld [vmem:[#allocation2 + $0x44] sm:$0xf0]  ;;  %v5285_v11 = vld [vmem:[#allocation2 + $0x34] sm:$0xf]  ;;  %v5287_v12 = vld [vmem:[#allocation2 + $0x48] sm:$0xf0]  ;;  %v4047_v30 = vor.u32 %v5278_v6, %v5283_v7 }
  0x18   :  { %v5292_v13 = vld [vmem:[%s7717_s4] sm:$0xf]  ;;  %443 = vmatpush.bf16.msra.mxu2 %v4067_v58  ;;  %v5297_v15 = vld [vmem:[%s7717_s4 + $0x8] sm:$0xf0]  ;;  %v5302_v16 = vld [vmem:[%s7717_s4 + $0x4] sm:$0xf]  ;;  %v5328_v31 = vor.u32 %v4861_v10, %v4150_v9  ;;  %v4155_v32 = vor.u32 %v5285_v11, %v5287_v12 }
  0x19   :  { %v5307_v17 = vld [vmem:[%s7717_s4 + $0xc] sm:$0xf0]  ;;  %457 = vmatpush.bf16.msra.mxu1 %v4071_v62  ;;  %v4126_v20 = vld [vmem:[#allocation2] sm:$0xf]  ;;  %v4855_v22 = vld [vmem:[#allocation2 + $0x14] sm:$0xf0]  ;;  %v4031_v37 = vor.u32 %v5297_v15, %v5292_v13 }
  0x1a   :  { %5008 = vmatpush.bf16.msra.mxu3 %v5267_v63  ;;  %v5312_v23 = vld [vmem:[#allocation2 + $0x4] sm:$0xf]  ;;  %836 = vmatpush.bf16.msra.mxu0 %v4203_v3  ;;  %v5314_v25 = vld [vmem:[#allocation2 + $0x18] sm:$0xf0]  ;;  %v5319_v26 = vld [vmem:[%s7717_s4 + $0xb0] sm:$0xf]  ;;  %v4035_v38 = vor.u32 %v5302_v16, %v5307_v17  ;;  %v5345_v39 = vor.u32 %v4855_v22, %v4126_v20 }
  0x1b   :  { %v5324_v27 = vld [vmem:[%s7717_s4 + $0xb8] sm:$0xf0]  ;;  %v5114_v28 = vmov 8.0   ;;  %v65_v33 = vld [vmem:[%s7713_s0 + $0x40] sm:$0xff]  ;;  %v66_v35 = vld [vmem:[%s7713_s0 + $0x48] sm:$0xff]  ;;  %v4131_v44 = vor.u32 %v5312_v23, %v5314_v25  ;;  %vm288_vm1 = vcmask 1041409  }
  0x1c   :  { %5016 = vrcp.f32 %v5114_v28  ;;  %v57_v36 = vld [vmem:[%s7713_s0] sm:$0xff]  ;;  %444 = vmatpush.bf16.msra.mxu2 %v4055_v14  ;;  %v58_v40 = vld [vmem:[%s7713_s0 + $0x8] sm:$0xff]  ;;  %v5353_v42 = vld [vmem:[%s7713_s0 + $0x10] sm:$0xff]  ;;  %v4123_v52 = vor.u32 %v5324_v27, %v5319_v26  ;;  %v5382_v53 = vpack.c.bf16 %v66_v35, %v65_v33  ;;  %v129_v56 = vrot.slane %v65_v33, 4 }
  0x1d   :  { %v81_v41 = vrot.slane %v57_v36, 4  ;;  %v5358_v43 = vld [vmem:[%s7713_s0 + $0x18] sm:$0xff]  ;;  %458 = vmatpush.bf16.msra.mxu1 %v4059_v18  ;;  %v87_v45 = vrot.slane %v58_v40, 4  ;;  %v5366_v46 = vld [vmem:[%s7713_s0 + $0x20] sm:$0xff]  ;;  %v5371_v48 = vld [vmem:[%s7713_s0 + $0x28] sm:$0xff]  ;;  %v93_v50 = vrot.slane %v5353_v42, 4  ;;  %v5404_v23 = vpack.c.bf16 %v58_v40, %v57_v36 }
  0x1e   :  { %5009 = vmatpush.bf16.msra.mxu3 %v5310_v19  ;;  %v5376_v49 = vld [vmem:[%s7713_s0 + $0x30] sm:$0xff]  ;;  %v99_v51 = vrot.slane %v5358_v43, 4  ;;  %837 = vmatpush.bf16.msra.mxu0 %v4179_v24  ;;  %7774 = vst [vmem:[#allocation5_spill] sm:$0xff] %v5382_v53  ;;  %v105_v55 = vrot.slane %v5366_v46, 4  ;;  %v5392_v61 = vld [vmem:[%s7713_s0 + $0x38] sm:$0xff]  ;;  %v111_v1 = vrot.slane %v5371_v48, 4  ;;  %v130_v16 = vadd.f32 %v129_v56, %v65_v33 }
  0x1f   :  { %v82_v54 = vadd.f32 %v81_v41, %v57_v36  ;;  %v88_v57 = vadd.f32 %v87_v45, %v58_v40  ;;  %v94_v58 = vadd.f32 %v93_v50, %v5353_v42  ;;  %v117_v2 = vrot.slane %v5376_v49, 4  ;;  %7775 = vst [vmem:[#allocation6_spill] sm:$0xff] %v5404_v23  ;;  %v5410_v26 = vld [vmem:[%s7713_s0 + $0x50] sm:$0xff]  ;;  %v5415_v27 = vld [vmem:[%s7713_s0 + $0x58] sm:$0xff] }
  0x20   :  { %v100_v59 = vadd.f32 %v99_v51, %v5358_v43  ;;  %445 = vmatpush.bf16.msra.mxu2 %v4043_v29  ;;  %v106_v0 = vadd.f32 %v105_v55, %v5366_v46  ;;  %v135_v3 = vrot.slane %v66_v35, 4  ;;  %v112_v10 = vadd.f32 %v111_v1, %v5371_v48  ;;  %v5437_v41 = vld [vmem:[%s7713_s0 + $0x70] sm:$0xff] }
  0x21   :  { %v83_v62 = vrot.slane %v82_v54, 2  ;;  %459 = vmatpush.bf16.msra.mxu1 %v4047_v30  ;;  %v89_v4 = vrot.slane %v88_v57, 2  ;;  %v95_v5 = vrot.slane %v94_v58, 2  ;;  %v118_v11 = vadd.f32 %v117_v2, %v5376_v49  ;;  %v5421_v30 = vld [vmem:[%s7713_s0 + $0x60] sm:$0xff] }
  0x22   :  { %v5387_v60 = vpop.eup %5016  ;;  %5010 = vmatpush.bf16.msra.mxu3 %v5328_v31  ;;  %v101_v6 = vrot.slane %v100_v59, 2  ;;  %838 = vmatpush.bf16.msra.mxu0 %v4155_v32  ;;  %v107_v9 = vrot.slane %v106_v0, 2  ;;  %v123_v15 = vrot.slane %v5392_v61, 4  ;;  %v113_v20 = vrot.slane %v112_v10, 2 }
  0x23   :  { %v84_v7 = vadd.f32 %v83_v62, %v82_v54  ;;  %v90_v12 = vadd.f32 %v89_v4, %v88_v57  ;;  %v96_v13 = vadd.f32 %v95_v5, %v94_v58  ;;  %v136_v22 = vadd.f32 %v135_v3, %v66_v35 }
  0x24   :  { %v102_v14 = vadd.f32 %v101_v6, %v100_v59  ;;  %446 = vmatpush.bf16.msra.mxu2 %v4031_v37  ;;  %v5401_v18 = vadd.f32 %v107_v9, %v106_v0  ;;  %v119_v24 = vrot.slane %v118_v11, 2  ;;  %v124_v25 = vadd.f32 %v123_v15, %v5392_v61  ;;  %v5449_v0 = vld [vmem:[%s7713_s0 + $0x78] sm:$0xff] }
  0x25   :  { %v85_v17 = vrot.slane %v84_v7, 1  ;;  %460 = vmatpush.bf16.msra.mxu1 %v4035_v38  ;;  %v91_v28 = vrot.slane %v90_v12, 1  ;;  %v97_v29 = vrot.slane %v96_v13, 1  ;;  %v178_v35 = vmul.f32 8.0, %v5387_v60 }
  0x26   :  { %5011 = vmatpush.bf16.msra.mxu3 %v5345_v39  ;;  %839 = vmatpush.bf16.msra.mxu0 %v4131_v44  ;;  %v103_v32 = vrot.slane %v102_v14, 1  ;;  %v125_v33 = vrot.slane %v124_v25, 2  ;;  %v109_v37 = vrot.slane %v5401_v18, 1  ;;  %v114_v38 = vadd.f32 %v113_v20, %v112_v10 }
  0x27   :  { %v5425_v36 = vadd.f32 %v85_v17, %v84_v7  ;;  %v131_v40 = vrot.slane %v130_v16, 2  ;;  %v120_v44 = vadd.f32 %v119_v24, %v118_v11  ;;  %v137_v45 = vrot.slane %v136_v22, 2 }
  0x28   :  { %467 = vmatpush.bf16.msrb.mxu2 %v4123_v52  ;;  %v141_v50 = vrot.slane %v5410_v26, 4  ;;  %v147_v51 = vrot.slane %v5415_v27, 4  ;;  %v92_v52 = vadd.f32 %v91_v28, %v90_v12  ;;  %v98_v54 = vadd.f32 %v97_v29, %v96_v13 }
  0x29   :  { %783 = vmatpush.bf16.msrb.mxu1 %v5195_v8  ;;  %811 = vmatmul.bf16.vlgmr.msra.gmra.mxu3 %v5382_v53  ;;  %v5432_v8 = vld [vmem:[%s7713_s0 + $0x68] sm:$0xff]  ;;  %v126_v55 = vadd.f32 %v125_v33, %v124_v25  ;;  %v153_v56 = vrot.slane %v5421_v30, 4  ;;  %v104_v57 = vadd.f32 %v103_v32, %v102_v14  ;;  %v132_v58 = vadd.f32 %v131_v40, %v130_v16 }
  0x2a   :  { %840 = vmatmul.bf16.vlgmr.msra.gmra.mxu0 %v5404_v23  ;;  %v142_v59 = vadd.f32 %v141_v50, %v5410_v26  ;;  %v148_v62 = vadd.f32 %v147_v51, %v5415_v27  ;;  %vm182_vm0 = vweird.f32 %v5387_v60  ;;  %v115_v1 = vrot.slane %v114_v38, 1 }
  0x2b   :  { %v154_v2 = vadd.f32 %v153_v56, %v5421_v30  ;;  %v159_v3 = vrot.slane %v5432_v8, 4  ;;  %v165_v4 = vrot.slane %v5437_v41, 4  ;;  %v121_v5 = vrot.slane %v120_v44, 1 }
  0x2c   :  { %v138_v6 = vadd.f32 %v137_v45, %v136_v22  ;;  %v143_v7 = vrot.slane %v142_v59, 2  ;;  %v149_v9 = vrot.slane %v148_v62, 2  ;;  %v127_v10 = vrot.slane %v126_v55, 1 }
  0x2d   :  { %784 = vmatpush.bf16.msrb.mxu1 %v5210_v21  ;;  %v155_v11 = vrot.slane %v154_v2, 2  ;;  %v160_v21 = vadd.f32 %v159_v3, %v5432_v8  ;;  %v166_v12 = vadd.f32 %v165_v4, %v5437_v41  ;;  %v133_v13 = vrot.slane %v132_v58, 1 }
  0x2e   :  { %v144_v14 = vadd.f32 %v143_v7, %v142_v59  ;;  %v150_v15 = vadd.f32 %v149_v9, %v148_v62  ;;  %v171_v16 = vrot.slane %v5449_v0, 4  ;;  %v179_v25 = vsub.f32 1.0, %v178_v35 }
  0x2f   :  { %v156_v17 = vadd.f32 %v155_v11, %v154_v2  ;;  %v161_v20 = vrot.slane %v160_v21, 2  ;;  %v167_v24 = vrot.slane %v166_v12, 2  ;;  %v139_v22 = vrot.slane %v138_v6, 1 }
  0x30   :  { %v145_v28 = vrot.slane %v144_v14, 1  ;;  %v151_v29 = vrot.slane %v150_v15, 1  ;;  %v172_v32 = vadd.f32 %v171_v16, %v5449_v0  ;;  %v180_v50 = vmul.f32 %v5387_v60, %v179_v25 }
  0x31   :  { %785 = vmatpush.bf16.msrb.mxu1 %v5225_v34  ;;  %v157_v33 = vrot.slane %v156_v17, 1  ;;  %v162_v40 = vadd.f32 %v161_v20, %v160_v21  ;;  %v168_v45 = vadd.f32 %v167_v24, %v166_v12  ;;  %v110_v51 = vadd.f32 %v109_v37, %v5401_v18 }
  0x32   :  { %v116_v56 = vadd.f32 %v115_v1, %v114_v38  ;;  %v122_v59 = vadd.f32 %v121_v5, %v120_v44  ;;  %v173_v62 = vrot.slane %v172_v32, 2  ;;  %v128_v34 = vadd.f32 %v127_v10, %v126_v55 }
  0x33   :  { %v163_v2 = vrot.slane %v162_v40, 1  ;;  %v169_v35 = vrot.slane %v168_v45, 1  ;;  %v181_v3 = vadd.f32 %v5387_v60, %v180_v50  ;;  %v134_v4 = vadd.f32 %v133_v13, %v132_v58 }
  0x34   :  { %v140_v7 = vadd.f32 %v139_v22, %v138_v6  ;;  %v146_v9 = vadd.f32 %v145_v28, %v144_v14  ;;  %v174_v11 = vadd.f32 %v173_v62, %v172_v32  ;;  %v152_v21 = vadd.f32 %v151_v29, %v150_v15 }
  0x35   :  { %786 = vmatpush.bf16.msrb.mxu1 %v5243_v47  ;;  %v158_v12 = vadd.f32 %v157_v33, %v156_v17  ;;  %v164_v16 = vadd.f32 %v163_v2, %v162_v40  ;;  %v183_v18 = vsel %vm182_vm0, %v5387_v60, %v181_v3  ;;  %v170_v37 = vadd.f32 %v169_v35, %v168_v45 }
  0x36   :  { %v175_v38 = vrot.slane %v174_v11, 1  ;;  %v184_v47 = vmul.f32 %v183_v18, %v5425_v36  ;;  %v185_v44 = vmul.f32 %v183_v18, %v92_v52  ;;  %v186_v55 = vmul.f32 %v183_v18, %v98_v54 }
  0x37   :  { %v187_v1 = vmul.f32 %v183_v18, %v104_v57  ;;  %v188_v58 = vmul.f32 %v183_v18, %v110_v51  ;;  %v189_v5 = vmul.f32 %v183_v18, %v116_v56  ;;  %v190_v10 = vmul.f32 %v183_v18, %v122_v59 }
  0x38   :  { %v176_v6 = vadd.f32 %v175_v38, %v174_v11  ;;  %v192_v13 = vmul.f32 %v183_v18, %v134_v4  ;;  %v193_v14 = vmul.f32 %v183_v18, %v140_v7  ;;  %vm290_vm2 = vcmask 1042434   ;;  %v4110_v11 = vld [vmem:[%s7717_s4 + $0x98] sm:$0xf]  ;;  %v4845_v38 = vld [vmem:[%s7717_s4 + $0x88] sm:$0xf0] }
  0x39   :  { %787 = vmatpush.bf16.msrb.mxu1 %v5267_v63  ;;  %v191_v15 = vmul.f32 %v183_v18, %v128_v34  ;;  %v194_v17 = vmul.f32 %v183_v18, %v146_v9  ;;  %v195_v60 = vmul.f32 %v183_v18, %v152_v21  ;;  %v196_v20 = vmul.f32 %v183_v18, %v158_v12  ;;  %v4848_v21 = vld [vmem:[%s7717_s4 + $0xa0] sm:$0xf0] }
  0x3a   :  { %vm292_vm3 = vcmask 1043459   ;;  %v197_v24 = vmul.f32 %v183_v18, %v164_v16  ;;  %v198_v36 = vmul.f32 %v183_v18, %v170_v37  ;;  %v200_v52 = vpack.c.bf16 %v184_v47, %v184_v47  ;;  %v4098_v37 = vld [vmem:[%s7717_s4 + $0x80] sm:$0xf] }
  0x3b   :  { %v201_v25 = vpack.c.bf16 %v185_v44, %v185_v44  ;;  %vm294_vm4 = vcmask 1044484   ;;  %v199_v63 = vmul.f32 %v183_v18, %v176_v6  ;;  %v202_v54 = vpack.c.bf16 %v186_v55, %v186_v55 }
  0x3c   :  { %v203_v57 = vpack.c.bf16 %v187_v1, %v187_v1  ;;  %v204_v22 = vpack.c.bf16 %v188_v58, %v188_v58  ;;  %vm296_vm5 = vcmask 1045509   ;;  %v205_v28 = vpack.c.bf16 %v189_v5, %v189_v5 }
  0x3d   :  { %788 = vmatpush.bf16.msrb.mxu1 %v5310_v19  ;;  %v206_v29 = vpack.c.bf16 %v190_v10, %v190_v10  ;;  %v208_v32 = vpack.c.bf16 %v192_v13, %v192_v13  ;;  %v209_v33 = vpack.c.bf16 %v193_v14, %v193_v14  ;;  %v207_v40 = vpack.c.bf16 %v191_v15, %v191_v15 }
  0x3e   :  { %v210_v45 = vpack.c.bf16 %v194_v17, %v194_v17  ;;  %v211_v50 = vpack.c.bf16 %v195_v60, %v195_v60  ;;  %v212_v51 = vpack.c.bf16 %v196_v20, %v196_v20  ;;  %v213_v56 = vpack.c.bf16 %v197_v24, %v197_v24 }
  0x3f   :  { %v214_v59 = vpack.c.bf16 %v198_v36, %v198_v36  ;;  %v272_v62 = vunpack.c.l.b16 %v200_v52  ;;  %v273_v34 = vunpack.c.l.b16 %v201_v25  ;;  %v215_v19 = vpack.c.bf16 %v199_v63, %v199_v63  ;;  %v4086_v52 = vld [vmem:[%s7717_s4 + $0x68] sm:$0xf]  ;;  %v4842_v25 = vld [vmem:[%s7717_s4 + $0x70] sm:$0xf0] }
  0x40   :  { %v274_v2 = vunpack.c.l.b16 %v202_v54  ;;  %v275_v35 = vunpack.c.l.b16 %v203_v57  ;;  %vm298_vm6 = vcmask 1046534   ;;  %v276_v3 = vunpack.c.l.b16 %v204_v22  ;;  %v4074_v57 = vld [vmem:[%s7717_s4 + $0x50] sm:$0xf] }
  0x41   :  { %789 = vmatpush.bf16.msrb.mxu1 %v5328_v31  ;;  %v277_v4 = vunpack.c.l.b16 %v205_v28  ;;  %v280_v7 = vunpack.c.l.b16 %v208_v32  ;;  %v281_v9 = vunpack.c.l.b16 %v209_v33  ;;  %v278_v12 = vunpack.c.l.b16 %v206_v29  ;;  %v4839_v28 = vld [vmem:[%s7717_s4 + $0x58] sm:$0xf0]  ;;  %v4302_v29 = vld [vmem:[#allocation2 + $0x158] sm:$0xf]  ;;  %v4898_v32 = vld [vmem:[#allocation2 + $0x16c] sm:$0xf0] }
  0x42   :  { %v279_v16 = vunpack.c.l.b16 %v207_v40  ;;  %v282_v18 = vunpack.c.l.b16 %v210_v45  ;;  %v283_v31 = vunpack.c.l.b16 %v211_v50  ;;  %v284_v47 = vunpack.c.l.b16 %v212_v51  ;;  %v4062_v45 = vld [vmem:[%s7717_s4 + $0x38] sm:$0xf]  ;;  %v4836_v50 = vld [vmem:[%s7717_s4 + $0x40] sm:$0xf0]  ;;  %v4310_v51 = vld [vmem:[#allocation2 + $0x160] sm:$0xf] }
  0x43   :  { %v285_v44 = vunpack.c.l.b16 %v213_v56  ;;  %v286_v55 = vunpack.c.l.b16 %v214_v59  ;;  %v289_v1 = vsel %vm288_vm1, %v273_v34, %v272_v62  ;;  %v287_v58 = vunpack.c.l.b16 %v215_v19  ;;  %v4899_v56 = vld [vmem:[#allocation2 + $0x174] sm:$0xf0]  ;;  %v4050_v34 = vld [vmem:[%s7717_s4 + $0x20] sm:$0xf]  ;;  %v4833_v19 = vld [vmem:[%s7717_s4 + $0x28] sm:$0xf0] }
  0x44   :  { %v291_v5 = vsel %vm290_vm2, %v274_v2, %v289_v1  ;;  %v302_v6 = vsel %vm288_vm1, %v281_v9, %v280_v7  ;;  %v4111_v10 = vor.u32 %v4848_v21, %v4110_v11  ;;  %vm300_vm7 = vcmask 1047559   ;;  %v4278_v2 = vld [vmem:[#allocation2 + $0x128] sm:$0xf]  ;;  %v4830_v21 = vld [vmem:[%s7717_s4 + $0x10] sm:$0xf0] }
  0x45   :  { %790 = vmatpush.bf16.msrb.mxu1 %v5345_v39  ;;  %v293_v13 = vsel %vm292_vm3, %v275_v35, %v291_v5  ;;  %v303_v14 = vsel %vm290_vm2, %v282_v18, %v302_v6  ;;  %v4099_v15 = vor.u32 %v4845_v38, %v4098_v37  ;;  %v5492_v39 = vpack.c.bf16 %v5415_v27, %v5410_v26  ;;  %v4892_v35 = vld [vmem:[#allocation2 + $0x13c] sm:$0xf0]  ;;  %v4038_v11 = vld [vmem:[%s7717_s4 + $0x8] sm:$0xf]  ;;  %v4886_v37 = vld [vmem:[#allocation2 + $0x10c] sm:$0xf0] }
  0x46   :  { %v295_v17 = vsel %vm294_vm4, %v276_v3, %v293_v13  ;;  %v304_v60 = vsel %vm292_vm3, %v283_v31, %v303_v14  ;;  %468 = vmatpush.bf16.msrb.mxu2 %v4111_v10  ;;  %v5496_v20 = vpack.c.bf16 %v5358_v43, %v5353_v42  ;;  %v4087_v54 = vor.u32 %v4842_v25, %v4086_v52  ;;  %v4254_v31 = vld [vmem:[#allocation2 + $0xf8] sm:$0xf]  ;;  %v4889_v38 = vld [vmem:[#allocation2 + $0x12c] sm:$0xf]  ;;  %v4880_v10 = vld [vmem:[#allocation2 + $0xdc] sm:$0xf0] }
  0x47   :  { %7776 = vst [vmem:[#allocation7_spill] sm:$0xff] %v5492_v39  ;;  %v297_v24 = vsel %vm296_vm5, %v277_v4, %v295_v17  ;;  %v305_v36 = vsel %vm294_vm4, %v284_v47, %v304_v60  ;;  %816 = vmatmul.bf16.gmra.mxu3 %v5492_v39  ;;  %v4303_v33 = vor.u32 %v4898_v32, %v4302_v29  ;;  %v4280_v47 = vld [vmem:[#allocation2 + $0x140] sm:$0xf0]  ;;  %v4887_v1 = vld [vmem:[#allocation2 + $0x114] sm:$0xf0]  ;;  %vm1115_vm8 = vcmask 1046528  }
  0x48   :  { %7777 = vst [vmem:[#allocation8_spill] sm:$0xff] %v5496_v20  ;;  %v299_v63 = vsel %vm298_vm6, %v278_v12, %v297_v24  ;;  %v306_v26 = vsel %vm296_vm5, %v285_v44, %v305_v36  ;;  %845 = vmatmul.bf16.gmra.mxu0 %v5496_v20  ;;  %v4075_v40 = vor.u32 %v4839_v28, %v4074_v57  ;;  %v4286_v12 = vld [vmem:[#allocation2 + $0x130] sm:$0xf]  ;;  %v4881_v14 = vld [vmem:[#allocation2 + $0xe4] sm:$0xf0]  ;;  %vm1087_vm9 = vcmask 1040384  }
  0x49   :  { %v301_v42 = vsel %vm300_vm7, %v279_v16, %v299_v63  ;;  %v307_v43 = vsel %vm298_vm6, %v286_v55, %v306_v26  ;;  %v4311_v59 = vor.u32 %v4899_v56, %v4310_v51  ;;  %v4063_v62 = vor.u32 %v4836_v50, %v4062_v45  ;;  %v4893_v16 = vld [vmem:[#allocation2 + $0x144] sm:$0xf0]  ;;  %v4262_v55 = vld [vmem:[#allocation2 + $0x100] sm:$0xf]  ;;  %v4238_v13 = vld [vmem:[#allocation2 + $0xd0] sm:$0xf] }
  0x4a   :  { %v308_v27 = vsel %vm300_vm7, %v287_v58, %v307_v43  ;;  %469 = vmatpush.bf16.msrb.mxu2 %v4099_v15  ;;  %v5533_v3 = vpack.c.bf16 %v5432_v8, %v5421_v30  ;;  %v5537_v4 = vpack.c.bf16 %v5371_v48, %v5366_v46  ;;  %v4279_v7 = vor.u32 %v4892_v35, %v4278_v2  ;;  %v4895_v30 = vld [vmem:[#allocation2 + $0x15c] sm:$0xf]  ;;  %v4304_v8 = vld [vmem:[#allocation2 + $0x170] sm:$0xf0]  ;;  %v4230_v58 = vld [vmem:[#allocation2 + $0xc8] sm:$0xf] }
  0x4b   :  { %v309_v22 = vpack.c.b16 %v308_v27, %v301_v42  ;;  %979 = vmatpush.bf16.msrb.mxu3 %v4311_v59  ;;  %v4051_v9 = vor.u32 %v4833_v19, %v4050_v34  ;;  %v4287_v46 = vor.u32 %v4893_v16, %v4286_v12  ;;  %v4039_v48 = vor.u32 %v4830_v21, %v4038_v11  ;;  %v4883_v15 = vld [vmem:[#allocation2 + $0xfc] sm:$0xf]  ;;  %v4256_v17 = vld [vmem:[#allocation2 + $0x110] sm:$0xf0]  ;;  %v4206_v24 = vld [vmem:[#allocation2 + $0x98] sm:$0xf] }
  0x4c   :  { %7778 = vst [vmem:[#allocation9_spill] sm:$0xff] %v5533_v3  ;;  %v4307_v18 = vor.u32 %v4895_v30, %v4304_v8  ;;  %v4255_v44 = vor.u32 %v4886_v37, %v4254_v31  ;;  %v4283_v5 = vor.u32 %v4889_v38, %v4280_v47  ;;  %v4263_v6 = vor.u32 %v4887_v1, %v4262_v55  ;;  %v4874_v52 = vld [vmem:[#allocation2 + $0xac] sm:$0xf0]  ;;  %v4214_v25 = vld [vmem:[#allocation2 + $0xa0] sm:$0xf]  ;;  %v5566_v37 = vld [vmem:[%s7724_s11 + $0xf8] sm:$0xff] }
  0x4d   :  { %447 = vmatmul.bf16.vlgmr.msra.gmra.mxu2 %v309_v22  ;;  %461 = vmatmul.bf16.vlgmr.msra.gmra.mxu1 %v309_v22  ;;  %7779 = vst [vmem:[#allocation10_spill] sm:$0xff] %v5537_v4  ;;  %v4231_v60 = vor.u32 %v4880_v10, %v4230_v58  ;;  %v4239_v36 = vor.u32 %v4881_v14, %v4238_v13  ;;  %v4875_v63 = vld [vmem:[#allocation2 + $0xb4] sm:$0xf0]  ;;  %v4232_v57 = vld [vmem:[#allocation2 + $0xe0] sm:$0xf0]  ;;  %v5593_v55 = vld [vmem:[%s7724_s11 + $0x170] sm:$0xff] }
  0x4e   :  { %470 = vmatpush.bf16.msrb.mxu2 %v4087_v54  ;;  %881 = vmatpush.bf16.msra.mxu1 %v4303_v33  ;;  %v4207_v26 = vor.u32 %v4874_v52, %v4206_v24  ;;  %v4259_v42 = vor.u32 %v4883_v15, %v4256_v17  ;;  %v5550_v43 = vpack.c.bf16 %v5392_v61, %v5376_v49  ;;  %v4877_v54 = vld [vmem:[#allocation2 + $0xcc] sm:$0xf]  ;;  %v4871_v29 = vld [vmem:[#allocation2 + $0x9c] sm:$0xf]  ;;  %v4208_v32 = vld [vmem:[#allocation2 + $0xb0] sm:$0xf0] }
  0x4f   :  { %980 = vmatpush.bf16.msrb.mxu3 %v4287_v46  ;;  %v5554_v27 = vpack.c.bf16 %v5449_v0, %v5437_v41  ;;  %v4235_v28 = vor.u32 %v4877_v54, %v4232_v57  ;;  %v4211_v49 = vor.u32 %v4871_v29, %v4208_v32  ;;  %v4865_v61 = vld [vmem:[#allocation2 + $0x6c] sm:$0xf]  ;;  %v4184_v33 = vld [vmem:[#allocation2 + $0x80] sm:$0xf0]  ;;  %v4190_v41 = vld [vmem:[#allocation2 + $0x70] sm:$0xf] }
  0x50   :  { %7780 = vst [vmem:[#allocation11_spill] sm:$0xff] %v5550_v43  ;;  %v4869_v0 = vld [vmem:[#allocation2 + $0x84] sm:$0xf0]  ;;  %v4187_v45 = vor.u32 %v4865_v61, %v4184_v33  ;;  %v4863_v51 = vld [vmem:[#allocation2 + $0x54] sm:$0xf0]  ;;  %v5598_v1 = vld [vmem:[%s7724_s11 + $0x70] sm:$0xff] }
  0x51   :  { %7781 = vst [vmem:[#allocation12_spill] sm:$0xff] %v5554_v27  ;;  %v4191_v50 = vor.u32 %v4869_v0, %v4190_v41  ;;  %v4182_v56 = vld [vmem:[#allocation2 + $0x68] sm:$0xf]  ;;  %v4868_v59 = vld [vmem:[#allocation2 + $0x7c] sm:$0xf0]  ;;  %v5576_v38 = vld [vmem:[%s7724_s11 + $0x178] sm:$0xff] }
  0x52   :  { %471 = vmatpush.bf16.msrb.mxu2 %v4075_v40  ;;  %882 = vmatpush.bf16.msra.mxu1 %v4279_v7  ;;  %v4166_v40 = vld [vmem:[#allocation2 + $0x40] sm:$0xf]  ;;  %v4160_v34 = vld [vmem:[#allocation2 + $0x50] sm:$0xf0]  ;;  %v4183_v19 = vor.u32 %v4868_v59, %v4182_v56  ;;  %v4158_v2 = vld [vmem:[#allocation2 + $0x38] sm:$0xf] }
  0x53   :  { %981 = vmatpush.bf16.msrb.mxu3 %v4263_v6  ;;  %v4167_v35 = vor.u32 %v4863_v51, %v4166_v40  ;;  %v4862_v7 = vld [vmem:[#allocation2 + $0x4c] sm:$0xf0]  ;;  %v4857_v11 = vld [vmem:[#allocation2 + $0x24] sm:$0xf0]  ;;  %v4856_v30 = vld [vmem:[#allocation2 + $0x1c] sm:$0xf0] }
  0x54   :  { %v4159_v21 = vor.u32 %v4862_v7, %v4158_v2  ;;  %v4134_v16 = vld [vmem:[#allocation2 + $0x8] sm:$0xf]  ;;  %v4853_v8 = vld [vmem:[#allocation2 + $0xc] sm:$0xf]  ;;  %v4136_v46 = vld [vmem:[#allocation2 + $0x20] sm:$0xf0] }
  0x55   :  { %v4139_v31 = vor.u32 %v4853_v8, %v4136_v46  ;;  %v5581_v47 = vld [vmem:[%s7724_s11 + $0x78] sm:$0xff]  ;;  %v5603_v58 = vld [vmem:[%s7724_s11 + $0xe8] sm:$0xff]  ;;  %v5628_v10 = vld [vmem:[%s7724_s11 + $0xe0] sm:$0xff]  ;;  %vm1108_vm10 = vcmask 1046533   ;;  %vm1112_vm11 = vcmask 1045504   ;;  %vm1117_vm12 = vcmask 1046529  }
  0x56   :  { %472 = vmatpush.bf16.msrb.mxu2 %v4063_v62  ;;  %883 = vmatpush.bf16.msra.mxu1 %v4255_v44  ;;  %v4859_v62 = vld [vmem:[#allocation2 + $0x3c] sm:$0xf]  ;;  %v5586_v44 = vld [vmem:[%s7724_s11 + $0xf0] sm:$0xff]  ;;  %v5621_v6 = vld [vmem:[%s7724_s11 + $0x68] sm:$0xff]  ;;  %vm1089_vm13 = vcmask 1041408   ;;  %vm1092_vm14 = vcmask 1042433  }
  0x57   :  { %821 = vmatmul.bf16.gmra.mxu3 %v5533_v3  ;;  %v4163_v12 = vor.u32 %v4859_v62, %v4160_v34  ;;  %v5637_v13 = vld [vmem:[%s7724_s11 + $0x160] sm:$0xff]  ;;  %v5649_v15 = vld [vmem:[%s7724_s11 + $0xd8] sm:$0xff]  ;;  %v5674_v52 = vld [vmem:[%s7724_s11 + $0x150] sm:$0xff]  ;;  %vm1096_vm15 = vcmask 1043458   ;;  %vm1100_vm0 = vcmask 1044483  }
  0x58   :  { %850 = vmatmul.bf16.gmra.mxu0 %v5537_v4  ;;  %982 = vmatpush.bf16.msrb.mxu3 %v4239_v36  ;;  %v5644_v14 = vld [vmem:[%s7724_s11 + $0x60] sm:$0xff]  ;;  %v5656_v17 = vld [vmem:[%s7724_s11 + $0x158] sm:$0xff]  ;;  %v5669_v36 = vld [vmem:[%s7724_s11 + $0xd0] sm:$0xff]  ;;  %7783 = vst [vmem:[#allocation14_spill] sm:$0xff] %v5674_v52 }
  0x59   :  { %v5664_v24 = vld [vmem:[%s7724_s11 + $0x58] sm:$0xff]  ;;  %7782 = vst [vmem:[#allocation13_spill] sm:$0xff] %v5669_v36  ;;  %v5711_v57 = vld [vmem:[%s7724_s11 + $0xc0] sm:$0xff]  ;;  %v5763_v2 = vld [vmem:[%s7724_s11 + $0xb0] sm:$0xff] }
  0x5a   :  { %473 = vmatpush.bf16.msrb.mxu2 %v4051_v9  ;;  %884 = vmatpush.bf16.msra.mxu1 %v4231_v60  ;;  %v4142_v9 = vld [vmem:[#allocation2 + $0x10] sm:$0xf]  ;;  %7788 = vst [vmem:[#allocation19_spill] sm:$0xff] %v5711_v57  ;;  %v5721_v29 = vld [vmem:[%s7718_s5] sm:$0x7]  ;;  %v5742_v33 = vld [vmem:[%s7724_s11 + $0xb8] sm:$0xff] }
  0x5b   :  { %v5729_v32 = vld [vmem:[%s7724_s11 + $0x140] sm:$0xff]  ;;  %v7727_v61 = vperm.slane %v5721_v29, 1  ;;  %7792 = vst [vmem:[#allocation23_spill] sm:$0xff] %v5742_v33  ;;  %v5755_v51 = vld [vmem:[%s7724_s11 + $0x138] sm:$0xff]  ;;  %v5773_v7 = vld [vmem:[%s7724_s11 + $0xa8] sm:$0xff] }
  0x5c   :  { %7790 = vst [vmem:[#allocation21_spill] sm:$0xff] %v5729_v32  ;;  %v4896_v56 = vld [vmem:[#allocation2 + $0x164] sm:$0xf]  ;;  %v4312_v59 = vld [vmem:[#allocation2 + $0x178] sm:$0xf0] }
  0x5d   :  { %791 = vmatmul.bf16.vlgmr.msrb.gmra.mxu1 %v5404_v23  ;;  %7794 = vst [vmem:[#allocation25_spill] sm:$0xff] %v5755_v51 }
  0x5e   :  { %474 = vmatpush.bf16.msrb.mxu2 %v4039_v48  ;;  %885 = vmatpush.bf16.msra.mxu1 %v4207_v26  ;;  %v4143_v48 = vor.u32 %v4857_v11, %v4142_v9  ;;  %v5697_v26 = vld [vmem:[%s7724_s11 + $0x148] sm:$0xff]  ;;  %7795 = vst [vmem:[#allocation26_spill] sm:$0xff] %v5763_v2  ;;  %v5780_v11 = vld [vmem:[%s7724_s11 + $0x130] sm:$0xff] }
  0x5f   :  { %7786 = vst [vmem:[#allocation17_spill] sm:$0xff] %v5697_v26 }
  0x60   :  { %7797 = vst [vmem:[#allocation28_spill] sm:$0xff] %v5773_v7 }
  0x61   :  { %475 = vmatmul.bf16.vlgmr.msrb.gmra.mxu2 %v309_v22  ;;  %v4215_v22 = vor.u32 %v4875_v63, %v4214_v25  ;;  %v5681_v25 = vld [vmem:[%s7724_s11 + $0x50] sm:$0xff]  ;;  %v5686_v63 = vld [vmem:[%s7724_s11 + $0xc8] sm:$0xff]  ;;  %7798 = vst [vmem:[#allocation29_spill] sm:$0xff] %v5780_v11 }
  0x62   :  { %930 = vmatpush.bf16.msra.mxu2 %v4307_v18  ;;  %886 = vmatpush.bf16.msra.mxu1 %v4183_v19  ;;  %v4135_v18 = vor.u32 %v4856_v30, %v4134_v16  ;;  %7784 = vst [vmem:[#allocation15_spill] sm:$0xff] %v5681_v25  ;;  %v4315_v19 = vor.u32 %v4896_v56, %v4312_v59  ;;  %v5793_v16 = vld [vmem:[%s7724_s11 + $0x30] sm:$0xff] }
  0x63   :  { %983 = vmatpush.bf16.msrb.mxu3 %v4215_v22  ;;  %7785 = vst [vmem:[#allocation16_spill] sm:$0xff] %v5686_v63 }
  0x64   :  { %1028 = vmatpush.bf16.msrb.mxu0 %v4315_v19  ;;  %7800 = vst [vmem:[#allocation31_spill] sm:$0xff] %v5793_v16 }
  0x66   :  { %931 = vmatpush.bf16.msra.mxu2 %v4283_v5  ;;  %887 = vmatpush.bf16.msra.mxu1 %v4159_v21  ;;  %v5616_v5 = vld [vmem:[%s7724_s11 + $0x168] sm:$0xff] }
  0x67   :  { %826 = vmatmul.bf16.gmra.mxu3 %v5554_v27 }
  0x68   :  { %855 = vmatmul.bf16.gmra.mxu0 %v5550_v43  ;;  %984 = vmatpush.bf16.msrb.mxu3 %v4191_v50  ;;  %v7726_v50 = vperm.slane %v5721_v29, 0 }
  0x6a   :  { %932 = vmatpush.bf16.msra.mxu2 %v4259_v42  ;;  %888 = vmatpush.bf16.msra.mxu1 %v4135_v18  ;;  %v5702_v42 = vld [vmem:[%s7724_s11 + $0x48] sm:$0xff]  ;;  %v5806_v18 = vld [vmem:[%s7724_s11 + $0x98] sm:$0xff] }
  0x6b   :  { %7787 = vst [vmem:[#allocation18_spill] sm:$0xff] %v5702_v42 }
  0x6c   :  { %985 = vmatpush.bf16.msrb.mxu3 %v4167_v35  ;;  %v5768_v35 = vld [vmem:[%s7724_s11 + $0x38] sm:$0xff]  ;;  %7801 = vst [vmem:[#allocation32_spill] sm:$0xff] %v5806_v18 }
  0x6d   :  { %796 = vmatmul.bf16.gmra.mxu1 %v5496_v20  ;;  %7796 = vst [vmem:[#allocation27_spill] sm:$0xff] %v5768_v35 }
  0x6e   :  { %933 = vmatpush.bf16.msra.mxu2 %v4235_v28  ;;  %1335 = vmatpush.msrb.mxu1 %v5581_v47 }
  0x70   :  { %986 = vmatpush.bf16.msrb.mxu3 %v4143_v48  ;;  %1336 = vmatpush.msrb.mxu1 %v5598_v1 }
  0x72   :  { %934 = vmatpush.bf16.msra.mxu2 %v4211_v49  ;;  %1337 = vmatpush.msrb.mxu1 %v5621_v6  ;;  %v5734_v49 = vld [vmem:[%s7724_s11 + $0x40] sm:$0xff] }
  0x73   :  { %7791 = vst [vmem:[#allocation22_spill] sm:$0xff] %v5734_v49 }
  0x74   :  { %1465 = vmatpush.msra.mxu3 %v5576_v38  ;;  %1338 = vmatpush.msrb.mxu1 %v5644_v14 }
  0x76   :  { %935 = vmatpush.bf16.msra.mxu2 %v4187_v45  ;;  %1466 = vmatpush.msra.mxu3 %v5593_v55 }
  0x77   :  { %987 = vmatmul.bf16.vlgmr.msrb.gmra.mxu3 %v5404_v23  ;;  %1339 = vmatpush.msrb.mxu1 %v5664_v24 }
  0x78   :  { %860 = vmatmul.bf16.gmra.mxu0 %v5382_v53  ;;  %1467 = vmatpush.msra.mxu3 %v5616_v5 }
  0x79   :  { %1340 = vmatpush.msrb.mxu1 %v5681_v25 }
  0x7a   :  { %936 = vmatpush.bf16.msra.mxu2 %v4163_v12  ;;  %1468 = vmatpush.msra.mxu3 %v5637_v13  ;;  %v5787_v12 = vld [vmem:[%s7724_s11 + $0xa0] sm:$0xff] }
  0x7b   :  { %1341 = vmatpush.msrb.mxu1 %v5702_v42  ;;  %7799 = vst [vmem:[#allocation30_spill] sm:$0xff] %v5787_v12 }
  0x7c   :  { %1469 = vmatpush.msra.mxu3 %v5656_v17 }
  0x7d   :  { %801 = vmatmul.bf16.gmra.mxu1 %v5537_v4 }
  0x7e   :  { %937 = vmatpush.bf16.msra.mxu2 %v4139_v31  ;;  %1470 = vmatpush.msra.mxu3 %v5674_v52 }
  0x7f   :  { %1342 = vmatpush.msrb.mxu1 %v5734_v49 }
  0x80   :  { %1471 = vmatpush.msra.mxu3 %v5697_v26 }
  0x81   :  { %938 = vmatmul.bf16.vlgmr.msra.gmra.mxu2 %v5404_v23  ;;  %1343 = vmatpush.msrb.mxu1 %v5768_v35 }
  0x82   :  { %1400 = vmatpush.msrb.mxu2 %v5566_v37  ;;  %1472 = vmatpush.msra.mxu3 %v5729_v32 }
  0x83   :  { %1344 = vmatpush.msrb.mxu1 %v5793_v16  ;;  %v252_v16 = vperm.slane %v5721_v29, 2 }
  0x84   :  { %1401 = vmatpush.msrb.mxu2 %v5586_v44  ;;  %1473 = vmatpush.msra.mxu3 %v5755_v51 }
  0x86   :  { %1402 = vmatpush.msrb.mxu2 %v5603_v58  ;;  %1474 = vmatpush.msra.mxu3 %v5780_v11  ;;  %v5864_v11 = vld [vmem:[%s7724_s11 + $0x120] sm:$0xff] }
  0x87   :  { %992 = vmatmul.bf16.gmra.mxu3 %v5496_v20  ;;  %7808 = vst [vmem:[#allocation39_spill] sm:$0xff] %v5864_v11 }
  0x88   :  { %865 = vmatmul.bf16.gmra.mxu0 %v5492_v39  ;;  %1403 = vmatpush.msrb.mxu2 %v5628_v10 }
  0x8a   :  { %1404 = vmatpush.msrb.mxu2 %v5649_v15 }
  0x8c   :  { %1405 = vmatpush.msrb.mxu2 %v5669_v36 }
  0x8d   :  { %806 = vmatmul.bf16.gmra.mxu1 %v5550_v43 }
  0x8e   :  { %1406 = vmatpush.msrb.mxu2 %v5686_v63 }
  0x90   :  { %1407 = vmatpush.msrb.mxu2 %v5711_v57 }
  0x91   :  { %943 = vmatmul.bf16.gmra.mxu2 %v5496_v20 }
  0x92   :  { %1408 = vmatpush.msrb.mxu2 %v5742_v33  ;;  %v4264_v33 = vld [vmem:[#allocation2 + $0x118] sm:$0xf0] }
  0x94   :  { %1409 = vmatpush.msrb.mxu2 %v5763_v2 }
  0x96   :  { %1410 = vmatpush.msrb.mxu2 %v5773_v7 }
  0x97   :  { %997 = vmatmul.bf16.gmra.mxu3 %v5537_v4 }
  0x98   :  { %870 = vmatmul.bf16.gmra.mxu0 %v5533_v3  ;;  %1411 = vmatpush.msrb.mxu2 %v5787_v12 }
  0x9a   :  { %1412 = vmatpush.msrb.mxu2 %v5806_v18  ;;  %v4288_v18 = vld [vmem:[#allocation2 + $0x148] sm:$0xf0] }
  0x9d   :  { %889 = vmatmul.bf16.vlgmr.msra.gmra.mxu1 %v5404_v23 }
  0xa1   :  { %948 = vmatmul.bf16.gmra.mxu2 %v5537_v4 }
  0xa7   :  { %1002 = vmatmul.bf16.gmra.mxu3 %v5550_v43  ;;  %v5757_v62 = vpop.f32.mrf.mxu0 }
  0xa8   :  { %875 = vmatmul.bf16.gmra.mxu0 %v5554_v27 }
  0xac   :  { %v5659_v60 = vpop.f32.mrf.mxu3 }
  0xad   :  { %894 = vmatmul.bf16.gmra.mxu1 %v5496_v20 }
  0xb1   :  { %953 = vmatmul.bf16.gmra.mxu2 %v5550_v43 }
  0xb4   :  { %v5706_v54 = vpop.f32.mrf.mxu3 }
  0xb7   :  { %1007 = vmatmul.bf16.gmra.mxu3 %v5382_v53 }
  0xbd   :  { %899 = vmatmul.bf16.gmra.mxu1 %v5537_v4 }
  0xc1   :  { %958 = vmatmul.bf16.gmra.mxu2 %v5382_v53 }
  0xc7   :  { %1012 = vmatmul.bf16.gmra.mxu3 %v5492_v39 }
  0xca   :  { %v5714_v22 = vpop.f32.mrf.mxu1  ;;  %v5716_v28 = vpop.f32.mrf.mxu3 }
  0xcb   :  { %7789 = vst [vmem:[#allocation20_spill] sm:$0xff] %v5716_v28 }
  0xcd   :  { %904 = vmatmul.bf16.gmra.mxu1 %v5550_v43 }
  0xd0   :  { %v5744_v41 = vpop.f32.mrf.mxu2 }
  0xd1   :  { %963 = vmatmul.bf16.gmra.mxu2 %v5492_v39 }
  0xd2   :  { %v464_v0 = vpop.f32.mrf.mxu1  ;;  %v5749_v45 = vpop.f32.mrf.mxu3 }
  0xd3   :  { %v465_v40 = vadd.f32 %v464_v0, %v7727_v61  ;;  %7793 = vst [vmem:[#allocation24_spill] sm:$0xff] %v5749_v45  ;;  %v5849_v61 = vld [vmem:[%s7724_s11 + $0x80] sm:$0xff] }
  0xd4   :  { %7806 = vst [vmem:[#allocation37_spill] sm:$0xff] %v5849_v61 }
  0xd5   :  { %v1085_v34 = vrot.slane %v465_v40, 7 }
  0xd7   :  { %1017 = vmatmul.bf16.gmra.mxu3 %v5533_v3 }
  0xd8   :  { %v450_v9 = vpop.f32.mrf.mxu2 }
  0xd9   :  { %v451_v21 = vadd.f32 %v450_v9, %v7726_v50  ;;  %v5829_v9 = vld [vmem:[%s7724_s11 + $0x90] sm:$0xff]  ;;  %v5834_v50 = vld [vmem:[%s7724_s11 + $0x128] sm:$0xff] }
  0xda   :  { %v5795_v30 = vpop.f32.mrf.mxu1  ;;  %v5824_v19 = vpop.f32.mrf.mxu3  ;;  %7803 = vst [vmem:[#allocation34_spill] sm:$0xff] %v5829_v9  ;;  %1475 = vmatpush.msra.mxu3 %v5834_v50  ;;  %1413 = vmatpush.msrb.mxu2 %v5829_v9 }
  0xdb   :  { %v1134_v8 = vsel %vm296_vm5, %v451_v21, %v1085_v34  ;;  %v1137_v46 = vsel %vm298_vm6, %v451_v21, %v1085_v34  ;;  %v1140_v48 = vsel %vm1115_vm8, %v1085_v34, %v451_v21  ;;  %v1120_v31 = vsel %vm1087_vm9, %v451_v21, %v1085_v34  ;;  %7802 = vst [vmem:[#allocation33_spill] sm:$0xff] %v5824_v19 }
  0xdc   :  { %v5811_v0 = vsel %vm288_vm1, %v451_v21, %v1085_v34  ;;  %v5815_v40 = vsel %vm290_vm2, %v451_v21, %v1085_v34  ;;  %v5818_v56 = vsel %vm292_vm3, %v451_v21, %v1085_v34  ;;  %v5821_v59 = vsel %vm294_vm4, %v451_v21, %v1085_v34  ;;  %7804 = vst [vmem:[#allocation35_spill] sm:$0xff] %v5834_v50  ;;  %v5841_v34 = vld [vmem:[%s7724_s11 + $0x88] sm:$0xff]  ;;  %v5843_v21 = vpop.f32.mrf.mxu0 }
  0xdd   :  { %909 = vmatmul.bf16.gmra.mxu1 %v5382_v53  ;;  %7805 = vst [vmem:[#allocation36_spill] sm:$0xff] %v5841_v34  ;;  %v4890_v53 = vld [vmem:[#allocation2 + $0x134] sm:$0xf]  ;;  %v5856_v50 = vld [vmem:[%s7724_s11 + $0x28] sm:$0xff]  ;;  %1414 = vmatpush.msrb.mxu2 %v5841_v34 }
  0xde   :  { %7807 = vst [vmem:[#allocation38_spill] sm:$0xff] %v5856_v50  ;;  %v4291_v7 = vor.u32 %v4890_v53, %v4288_v18  ;;  %1345 = vmatpush.msrb.mxu1 %v5856_v50  ;;  %1476 = vmatpush.msra.mxu3 %v5864_v11  ;;  %v5875_v53 = vld [vmem:[%s7724_s11 + $0x20] sm:$0xff]  ;;  %v5889_v50 = vld [vmem:[%s7724_s11 + $0x118] sm:$0xff] }
  0xdf   :  { %1415 = vmatpush.msrb.mxu2 %v5849_v61  ;;  %7810 = vst [vmem:[#allocation41_spill] sm:$0xff] %v5875_v53 }
  0xe0   :  { %1029 = vmatpush.bf16.msrb.mxu0 %v4291_v7  ;;  %1346 = vmatpush.msrb.mxu1 %v5875_v53  ;;  %v7811_v7 = vperm.slane %v5721_v29, 1  ;;  %7812 = vst [vmem:[#allocation42_spill] sm:$0xff] %v5889_v50 }
  0xe1   :  { %968 = vmatmul.bf16.gmra.mxu2 %v5533_v3  ;;  %1477 = vmatpush.msra.mxu3 %v5889_v50  ;;  %v4884_v50 = vld [vmem:[#allocation2 + $0x104] sm:$0xf] }
  0xe2   :  { %v5851_v12 = vpop.f32.mrf.mxu1  ;;  %v5867_v2 = vpop.f32.mrf.mxu3  ;;  %v463_v61 = vadd.f32 %v5714_v22, %v7811_v7  ;;  %v7813_v22 = vperm.slane %v5721_v29, 0  ;;  %v4267_v32 = vor.u32 %v4884_v50, %v4264_v33 }
  0xe3   :  { %7809 = vst [vmem:[#allocation40_spill] sm:$0xff] %v5867_v2 }
  0xe4   :  { %v476_v9 = vpop.f32.mrf.mxu2  ;;  %v5877_v18 = vpop.f32.mrf.mxu0  ;;  %v5892_v53 = vrot.slane %v463_v61, 7  ;;  %v5897_v7 = vadd.f32 %v5744_v41, %v7813_v22  ;;  %v5910_v61 = vld [vmem:[%s7720_s7] sm:$0x3f]  ;;  %1030 = vmatpush.bf16.msrb.mxu0 %v4267_v32  ;;  %v5982_v32 = vld [vmem:[%s7724_s11 + $0x8] sm:$0xff] }
  0xe5   :  { %v477_v11 = vadd.f32 %v476_v9, %v252_v16  ;;  %7820 = vst [vmem:[#allocation49_spill] sm:$0xff] %v5982_v32  ;;  %v6053_v63 = vperm.slane %v5910_v61, 2 }
  0xe6   :  { %v1088_v22 = vsel %vm1087_vm9, %v5897_v7, %v5892_v53  ;;  %vm1104_vm9 = vcmask 1045508   ;;  %v1107_v42 = vsel %vm296_vm5, %v5897_v7, %v5892_v53 }
  0xe7   :  { %1022 = vmatmul.bf16.gmra.mxu3 %v5554_v27 }
  0xea   :  { %v5870_v19 = vpop.f32.mrf.mxu1  ;;  %v5914_v41 = vpop.f32.mrf.mxu3 }
  0xeb   :  { %7814 = vst [vmem:[#allocation43_spill] sm:$0xff] %v5914_v41 }
  0xec   :  { %v478_v34 = vpop.f32.mrf.mxu2 }
  0xed   :  { %v479_v2 = vadd.f32 %v478_v34, %v252_v16  ;;  %914 = vmatmul.bf16.gmra.mxu1 %v5492_v39  ;;  %v5899_v16 = vrot.slane %v477_v11, 6  ;;  %v5922_v11 = vld [vmem:[%s7724_s11 + $0x18] sm:$0xff]  ;;  %v848_v39 = vpop.f32.mrf.mxu0 }
  0xee   :  { %7816 = vst [vmem:[#allocation45_spill] sm:$0xff] %v5922_v11  ;;  %1347 = vmatpush.msrb.mxu1 %v5922_v11 }
  0xef   :  { %v1086_v51 = vrot.slane %v479_v2, 6 }
  0xf1   :  { %973 = vmatmul.bf16.gmra.mxu2 %v5554_v27  ;;  %v5902_v9 = vsel %vm1108_vm10, %v1134_v8, %v1086_v51  ;;  %v5905_v34 = vsel %vm1112_vm11, %v1086_v51, %v1137_v46  ;;  %v5917_v2 = vsel %vm1117_vm12, %v1086_v51, %v1140_v48  ;;  %v5925_v8 = vperm.slane %v5910_v61, 1 }
  0xf2   :  { %v5912_v29 = vpop.f32.mrf.mxu1  ;;  %7815 = vst [vmem:[#allocation44_spill] sm:$0xff] %v5917_v2  ;;  %v5927_v46 = vsel %vm1089_vm13, %v1120_v31, %v1086_v51  ;;  %v5934_v48 = vsel %vm1089_vm13, %v1088_v22, %v5899_v16  ;;  %v5938_v41 = vsel %vm1092_vm14, %v5811_v0, %v1086_v51  ;;  %v5943_v31 = vld [vmem:[%s7724_s11 + $0x110] sm:$0xff]  ;;  %v5949_v35 = vsel %vm1096_vm15, %v5815_v40, %v1086_v51 }
  0xf3   :  { %7817 = vst [vmem:[#allocation46_spill] sm:$0xff] %v5943_v31  ;;  %v842_v11 = vadd.f32 %v5757_v62, %v5925_v8  ;;  %1478 = vmatpush.msra.mxu3 %v5943_v31  ;;  %v1091_v0 = vsel %vm288_vm1, %v5897_v7, %v5892_v53  ;;  %v1144_v22 = vperm.slane %v5934_v48, 1  ;;  %v5960_v62 = vsel %vm1100_vm0, %v5818_v56, %v1086_v51  ;;  %v5967_v40 = vld [vmem:[%s7724_s11 + $0x10] sm:$0xff]  ;;  %v5976_v56 = vpop.f32.mrf.mxu3 }
  0xf4   :  { %v1093_v57 = vsel %vm1092_vm14, %v1091_v0, %v5899_v16  ;;  %7818 = vst [vmem:[#allocation47_spill] sm:$0xff] %v5967_v40  ;;  %1348 = vmatpush.msrb.mxu1 %v5967_v40  ;;  %v5972_v33 = vsel %vm1104_vm9, %v5821_v59, %v1086_v51  ;;  %v5988_v51 = vld [vmem:[%s7724_s11 + $0x108] sm:$0xff]  ;;  %v4878_v31 = vld [vmem:[#allocation2 + $0xd4] sm:$0xf] }
  0xf5   :  { %v5974_v50 = vrot.slane %v1093_v57, 1  ;;  %v1240_v0 = vmul.f32 %v1144_v22, %v842_v11  ;;  %7819 = vst [vmem:[#allocation48_spill] sm:$0xff] %v5976_v56  ;;  %v5993_v57 = vld [vmem:[%s7724_s11] sm:$0xff]  ;;  %v851_v59 = vpop.f32.mrf.mxu0  ;;  %1479 = vmatpush.msra.mxu3 %v5988_v51  ;;  %v844_v11 = vadd.f32 %v5843_v21, %v5925_v8  ;;  %v1095_v22 = vsel %vm290_vm2, %v5897_v7, %v5892_v53 }
  0xf6   :  { %1349 = vmatpush.msrb.mxu1 %v5982_v32  ;;  %7821 = vst [vmem:[#allocation50_spill] sm:$0xff] %v5988_v51  ;;  %v4240_v51 = vld [vmem:[#allocation2 + $0xe8] sm:$0xf0]  ;;  %v6012_v21 = vld [vmem:[%s7724_s11 + $0x100] sm:$0xff] }
  0xf7   :  { %7822 = vst [vmem:[#allocation51_spill] sm:$0xff] %v5993_v57  ;;  %v4243_v40 = vor.u32 %v4878_v31, %v4240_v51  ;;  %1480 = vmatpush.msra.mxu3 %v6012_v21 }
  0xf8   :  { %1350 = vmatpush.msrb.mxu1 %v5993_v57  ;;  %7824 = vst [vmem:[#allocation53_spill] sm:$0xff] %v6012_v21  ;;  %v6050_v21 = vperm.slane %v5910_v61, 0 }
  0xf9   :  { %1031 = vmatpush.bf16.msrb.mxu0 %v4243_v40 }
  0xfa   :  { %v5962_v43 = vpop.f32.mrf.mxu1 }
  0xfb   :  { %v6017_v45 = vpop.f32.mrf.mxu3 }
  0xfc   :  { %7825 = vst [vmem:[#allocation54_spill] sm:$0xff] %v6017_v45 }
  0xfd   :  { %919 = vmatmul.bf16.gmra.mxu1 %v5533_v3  ;;  %v1097_v3 = vsel %vm1096_vm15, %v1095_v22, %v5899_v16  ;;  %v847_v22 = vadd.f32 %v5877_v18, %v5925_v8  ;;  %v853_v26 = vpop.f32.mrf.mxu0 }
  0xfe   :  { %v6015_v49 = vrot.slane %v1097_v3, 2 }
 0x100   :  { %v1150_v2 = vperm.slane %v6015_v49, 1 }
 0x101   :  { %1416 = vmatmul.f32.vlgmr.msrb.gmra.mxu2 %v1240_v0  ;;  %v1147_v0 = vperm.slane %v5974_v50, 1 }
 0x102   :  { %v6007_v32 = vpop.f32.mrf.mxu1  ;;  %v1246_v40 = vmul.f32 %v1150_v2, %v847_v22  ;;  %v4872_v2 = vld [vmem:[#allocation2 + $0xa4] sm:$0xf]  ;;  %v4216_v22 = vld [vmem:[#allocation2 + $0xb8] sm:$0xf0] }
 0x103   :  { %v1243_v57 = vmul.f32 %v1147_v0, %v844_v11  ;;  %v6034_v18 = vpop.f32.mrf.mxu3  ;;  %v1103_v0 = vsel %vm294_vm4, %v5897_v7, %v5892_v53 }
 0x104   :  { %v6005_v56 = vpop.f32.mrf.mxu2  ;;  %7827 = vst [vmem:[#allocation56_spill] sm:$0xff] %v6034_v18 }
 0x105   :  { %7823 = vst [vmem:[#allocation52_spill] sm:$0xff] %v6005_v56  ;;  %v1099_v56 = vsel %vm292_vm3, %v5897_v7, %v5892_v53 }
 0x106   :  { %v1101_v31 = vsel %vm1100_vm0, %v1099_v56, %v5899_v16 }
 0x107   :  { %v6031_v11 = vrot.slane %v1101_v31, 3 }
 0x109   :  { %1419 = vmatmul.f32.gmra.mxu2 %v1243_v57  ;;  %v849_v57 = vadd.f32 %v848_v39, %v5925_v8  ;;  %v1153_v56 = vperm.slane %v6031_v11, 1 }
 0x10a   :  { %v6029_v51 = vpop.f32.mrf.mxu1 }
 0x10b   :  { %v1249_v39 = vmul.f32 %v1153_v56, %v849_v57  ;;  %v793_v57 = vadd.f32 %v5795_v30, %v6050_v21  ;;  %v1146_v30 = vperm.slane %v5974_v50, 0 }
 0x10c   :  { %v6027_v3 = vpop.f32.mrf.mxu2 }
 0x10d   :  { %7826 = vst [vmem:[#allocation55_spill] sm:$0xff] %v6027_v3  ;;  %924 = vmatmul.bf16.gmra.mxu1 %v5554_v27  ;;  %v1105_v3 = vsel %vm1104_vm9, %v1103_v0, %v5899_v16  ;;  %v4219_v27 = vor.u32 %v4872_v2, %v4216_v22  ;;  %v1143_v0 = vperm.slane %v5934_v48, 0  ;;  %v6061_v2 = vpop.f32.mrf.mxu3 }
 0x10e   :  { %v6047_v18 = vrot.slane %v1105_v3, 4  ;;  %7829 = vst [vmem:[#allocation58_spill] sm:$0xff] %v6061_v2 }
 0x10f   :  { %1032 = vmatpush.bf16.msrb.mxu0 %v4219_v27  ;;  %v1109_v27 = vsel %vm1108_vm10, %v1107_v42, %v5899_v16  ;;  %v854_v42 = vadd.f32 %v853_v26, %v5925_v8 }
 0x110   :  { %v1156_v3 = vperm.slane %v6047_v18, 1  ;;  %v6071_v52 = vrot.slane %v1109_v27, 5 }
 0x111   :  { %1422 = vmatmul.f32.gmra.mxu2 %v1246_v40  ;;  %v856_v40 = vpop.f32.mrf.mxu0 }
 0x112   :  { %v6045_v31 = vpop.f32.mrf.mxu1 }
 0x114   :  { %v6043_v45 = vpop.f32.mrf.mxu2 }
 0x115   :  { %7828 = vst [vmem:[#allocation57_spill] sm:$0xff] %v6043_v45  ;;  %v852_v45 = vadd.f32 %v851_v59, %v5925_v8  ;;  %v1145_v59 = vperm.slane %v5934_v48, 2  ;;  %v1111_v48 = vsel %vm298_vm6, %v5897_v7, %v5892_v53 }
 0x117   :  { %v1252_v36 = vmul.f32 %v1156_v3, %v852_v45  ;;  %v1113_v45 = vsel %vm1112_vm11, %v5899_v16, %v1111_v48  ;;  %v6085_v3 = vpop.f32.mrf.mxu3  ;;  %v798_v48 = vadd.f32 %v5870_v19, %v6050_v21 }
 0x118   :  { %7832 = vst [vmem:[#allocation61_spill] sm:$0xff] %v6085_v3  ;;  %v6089_v2 = vrot.slane %v1113_v45, 6  ;;  %v857_v3 = vadd.f32 %v856_v40, %v5925_v8 }
 0x119   :  { %1425 = vmatmul.f32.gmra.mxu2 %v1249_v39  ;;  %v1239_v39 = vmul.f32 %v1143_v0, %v793_v57  ;;  %v858_v25 = vpop.f32.mrf.mxu0  ;;  %v4192_v57 = vld [vmem:[#allocation2 + $0x88] sm:$0xf0] }
 0x11a   :  { %v890_v56 = vpop.f32.mrf.mxu1 }
 0x11b   :  { %v891_v22 = vadd.f32 %v890_v56, %v6053_v63  ;;  %v795_v56 = vadd.f32 %v5851_v12, %v6050_v21 }
 0x11c   :  { %v6067_v61 = vpop.f32.mrf.mxu2 }
 0x11d   :  { %7830 = vst [vmem:[#allocation59_spill] sm:$0xff] %v6067_v61  ;;  %v1241_v28 = vmul.f32 %v1145_v59, %v891_v22  ;;  %1351 = vmatmul.f32.vlgmr.msrb.gmra.mxu1 %v1239_v39  ;;  %v1159_v61 = vperm.slane %v6071_v52, 1  ;;  %v1242_v26 = vmul.f32 %v1146_v30, %v795_v56  ;;  %v1148_v22 = vperm.slane %v5974_v50, 2 }
 0x11e   :  { %v1149_v30 = vperm.slane %v6015_v49, 0  ;;  %v1162_v50 = vperm.slane %v6089_v2, 1 }
 0x11f   :  { %1481 = vmatmul.f32.vlgmr.msra.gmra.mxu3 %v1241_v28  ;;  %v4866_v28 = vld [vmem:[#allocation2 + $0x74] sm:$0xf]  ;;  %v1255_v59 = vmul.f32 %v1159_v61, %v854_v42  ;;  %v1116_v61 = vsel %vm1115_vm8, %v5892_v53, %v5897_v7  ;;  %v800_v53 = vadd.f32 %v5912_v29, %v6050_v21  ;;  %v859_v7 = vadd.f32 %v858_v25, %v5925_v8 }
 0x120   :  { %v4195_v12 = vor.u32 %v4866_v28, %v4192_v57  ;;  %v1245_v45 = vmul.f32 %v1149_v30, %v798_v48  ;;  %v1151_v28 = vperm.slane %v6015_v49, 2  ;;  %v1258_v40 = vmul.f32 %v1162_v50, %v857_v3  ;;  %v6105_v57 = vpop.f32.mrf.mxu3 }
 0x121   :  { %1428 = vmatmul.f32.gmra.mxu2 %v1252_v36  ;;  %v1154_v50 = vperm.slane %v6031_v11, 2  ;;  %vm1578_vm8 = vcmask 64512  }
 0x122   :  { %v892_v36 = vpop.f32.mrf.mxu1  ;;  %1033 = vmatpush.bf16.msrb.mxu0 %v4195_v12  ;;  %4348 = vmatpush.xpose.msk.msra.mxu1 %vm1578_vm8, %v5566_v37 }
 0x123   :  { %v893_v27 = vadd.f32 %v892_v36, %v6053_v63  ;;  %v1118_v36 = vsel %vm1117_vm12, %v5899_v16, %v1116_v61  ;;  %v1152_v16 = vperm.slane %v6031_v11, 0  ;;  %v1168_v11 = vperm.slane %v5927_v46, 1  ;;  %4380 = vmatpush.xpose.msk.msra.mxu2 %vm1578_vm8, %v5576_v38 }
 0x124   :  { %v6081_v0 = vpop.f32.mrf.mxu2  ;;  %v813_v38 = vadd.f32 %v5659_v60, %v6050_v21  ;;  %v6204_v60 = vrot.slane %v5902_v9, 5 }
 0x125   :  { %7831 = vst [vmem:[#allocation60_spill] sm:$0xff] %v6081_v0  ;;  %v1244_v39 = vmul.f32 %v1148_v22, %v893_v27  ;;  %1354 = vmatmul.f32.gmra.mxu1 %v1242_v26  ;;  %v861_v0 = vpop.f32.mrf.mxu0  ;;  %v6107_v27 = vrot.slane %v1118_v36, 7  ;;  %v1248_v48 = vmul.f32 %v1152_v16, %v800_v53  ;;  %v4144_v53 = vld [vmem:[#allocation2 + $0x28] sm:$0xf0] }
 0x126   :  { %v862_v36 = vadd.f32 %v861_v0, %v5925_v8  ;;  %v6130_v0 = vrot.slane %v5938_v41, 1  ;;  %4349 = vmatpush.xpose.msk.msra.mxu1 %vm1578_vm8, %v5586_v44  ;;  %v1183_v9 = vperm.slane %v6204_v60, 1 }
 0x127   :  { %1484 = vmatmul.f32.gmra.mxu3 %v1244_v39  ;;  %v1165_v49 = vperm.slane %v6107_v27, 1  ;;  %v4168_v39 = vld [vmem:[#allocation2 + $0x58] sm:$0xf0]  ;;  %4381 = vmatpush.xpose.msk.msra.mxu2 %vm1578_vm8, %v5593_v55 }
 0x128   :  { %v6118_v25 = vpop.f32.mrf.mxu3 }
 0x129   :  { %1431 = vmatmul.f32.gmra.mxu2 %v1255_v59  ;;  %v4860_v59 = vld [vmem:[#allocation2 + $0x44] sm:$0xf]  ;;  %v1261_v29 = vmul.f32 %v1165_v49, %v859_v7 }
 0x12a   :  { %v895_v42 = vpop.f32.mrf.mxu1  ;;  %v4171_v61 = vor.u32 %v4860_v59, %v4168_v39  ;;  %4350 = vmatpush.xpose.msk.msra.mxu1 %vm1578_vm8, %v5603_v58  ;;  %v815_v58 = vadd.f32 %v5706_v54, %v6050_v21 }
 0x12b   :  { %v896_v19 = vadd.f32 %v895_v42, %v6053_v63  ;;  %4382 = vmatpush.xpose.msk.msra.mxu2 %vm1578_vm8, %v5616_v5 }
 0x12c   :  { %v6095_v56 = vpop.f32.mrf.mxu2  ;;  %1034 = vmatpush.bf16.msrb.mxu0 %v4171_v61 }
 0x12d   :  { %v1247_v26 = vmul.f32 %v1151_v28, %v896_v19  ;;  %1357 = vmatmul.f32.gmra.mxu1 %v1245_v45  ;;  %v863_v22 = vpop.f32.mrf.mxu0  ;;  %v803_v45 = vadd.f32 %v5962_v43, %v6050_v21  ;;  %v1155_v19 = vperm.slane %v6047_v18, 0  ;;  %v1264_v43 = vmul.f32 %v1168_v11, %v862_v36 }
 0x12e   :  { %v1160_v36 = vperm.slane %v6071_v52, 2  ;;  %4351 = vmatpush.xpose.msk.msra.mxu1 %vm1578_vm8, %v5628_v10 }
 0x12f   :  { %1487 = vmatmul.f32.gmra.mxu3 %v1247_v26  ;;  %v4854_v26 = vld [vmem:[#allocation2 + $0x14] sm:$0xf]  ;;  %v1251_v7 = vmul.f32 %v1155_v19, %v803_v45  ;;  %4383 = vmatpush.xpose.msk.msra.mxu2 %vm1578_vm8, %v5637_v13  ;;  %v6231_v13 = vrot.slane %v5905_v34, 6  ;;  %v7836_v34 = vld [vmem:[#allocation14_spill] sm:$0xff] }
 0x130   :  { %v4147_v59 = vor.u32 %v4854_v26, %v4144_v53  ;;  %v1161_v53 = vperm.slane %v6089_v2, 0 }
 0x131   :  { %1434 = vmatmul.f32.gmra.mxu2 %v1258_v40 }
 0x132   :  { %v897_v3 = vpop.f32.mrf.mxu1  ;;  %1035 = vmatpush.bf16.msrb.mxu0 %v4147_v59  ;;  %4352 = vmatpush.xpose.msk.msra.mxu1 %vm1578_vm8, %v5649_v15 }
 0x133   :  { %v898_v30 = vadd.f32 %v897_v3, %v6053_v63  ;;  %v1157_v3 = vperm.slane %v6047_v18, 2  ;;  %v1158_v18 = vperm.slane %v6071_v52, 0  ;;  %4384 = vmatpush.xpose.msk.msra.mxu2 %vm1578_vm8, %v5656_v17 }
 0x134   :  { %v6113_v12 = vpop.f32.mrf.mxu2 }
 0x135   :  { %v1250_v42 = vmul.f32 %v1154_v50, %v898_v30  ;;  %1360 = vmatmul.f32.gmra.mxu1 %v1248_v48  ;;  %v866_v16 = vpop.f32.mrf.mxu0  ;;  %v805_v48 = vadd.f32 %v6007_v32, %v6050_v21  ;;  %v864_v30 = vadd.f32 %v863_v22, %v5925_v8  ;;  %v6135_v50 = vpop.f32.mrf.mxu3  ;;  %1036 = vmatmul.bf16.vlgmr.msrb.gmra.mxu0 %v5404_v23  ;;  %v6145_v22 = vrot.slane %v5949_v35, 2 }
 0x136   :  { %v867_v26 = vadd.f32 %v866_v16, %v5925_v8  ;;  %v810_v16 = vadd.f32 %v6045_v31, %v6050_v21  ;;  %4316 = vmatpush.xpose.msk.msra.mxu0 %vm1578_vm8, %v5581_v47 }
 0x137   :  { %1490 = vmatmul.f32.gmra.mxu3 %v1250_v42  ;;  %v1254_v41 = vmul.f32 %v1158_v18, %v805_v48  ;;  %v1174_v52 = vperm.slane %v6145_v22, 1  ;;  %4385 = vmatpush.xpose.msk.msra.mxu2 %vm1578_vm8, %v7836_v34  ;;  %v7854_v34 = vld [vmem:[#allocation29_spill] sm:$0xff] }
 0x139   :  { %1437 = vmatmul.f32.gmra.mxu2 %v1261_v29  ;;  %v1171_v29 = vperm.slane %v6130_v0, 1 }
 0x13a   :  { %v900_v40 = vpop.f32.mrf.mxu1  ;;  %4317 = vmatpush.xpose.msk.msra.mxu0 %vm1578_vm8, %v5598_v1  ;;  %v1169_v1 = vperm.slane %v5927_v46, 2 }
 0x13b   :  { %v901_v49 = vadd.f32 %v900_v40, %v6053_v63  ;;  %v1267_v32 = vmul.f32 %v1171_v29, %v864_v30  ;;  %v808_v40 = vadd.f32 %v6029_v51, %v6050_v21  ;;  %v6159_v51 = vrot.slane %v5960_v62, 3 }
 0x13c   :  { %v6124_v28 = vpop.f32.mrf.mxu2  ;;  %v1164_v29 = vperm.slane %v6107_v27, 0 }
 0x13d   :  { %v1253_v39 = vmul.f32 %v1157_v3, %v901_v49  ;;  %1363 = vmatmul.f32.gmra.mxu1 %v1251_v7  ;;  %v868_v19 = vpop.f32.mrf.mxu0  ;;  %v6154_v3 = vpop.f32.mrf.mxu3  ;;  %v1257_v59 = vmul.f32 %v1161_v53, %v808_v40 }
 0x13e   :  { %v869_v18 = vadd.f32 %v868_v19, %v5925_v8  ;;  %v1260_v62 = vmul.f32 %v1164_v29, %v810_v16  ;;  %4318 = vmatpush.xpose.msk.msra.mxu0 %vm1578_vm8, %v5621_v6  ;;  %v1173_v16 = vperm.slane %v6145_v22, 0  ;;  %v1186_v29 = vperm.slane %v6231_v13, 1 }
 0x13f   :  { %1493 = vmatmul.f32.gmra.mxu3 %v1253_v39  ;;  %v1270_v39 = vmul.f32 %v1174_v52, %v867_v26 }
 0x141   :  { %1440 = vmatmul.f32.gmra.mxu2 %v1264_v43  ;;  %v1163_v43 = vperm.slane %v6089_v2, 2  ;;  %v1177_v2 = vperm.slane %v6159_v51, 1 }
 0x142   :  { %v902_v42 = vpop.f32.mrf.mxu1  ;;  %4319 = vmatpush.xpose.msk.msra.mxu0 %vm1578_vm8, %v5644_v14 }
 0x143   :  { %v903_v45 = vadd.f32 %v902_v42, %v6053_v63  ;;  %v1273_v31 = vmul.f32 %v1177_v2, %v869_v18  ;;  %v7835_v18 = vld [vmem:[#allocation13_spill] sm:$0xff] }
 0x144   :  { %v6139_v61 = vpop.f32.mrf.mxu2  ;;  %4353 = vmatpush.xpose.msk.msra.mxu1 %vm1578_vm8, %v7835_v18 }
 0x145   :  { %v1256_v11 = vmul.f32 %v1160_v36, %v903_v45  ;;  %1366 = vmatmul.f32.gmra.mxu1 %v1254_v41  ;;  %v871_v30 = vpop.f32.mrf.mxu0  ;;  %1041 = vmatmul.bf16.gmra.mxu0 %v5496_v20  ;;  %v1166_v36 = vperm.slane %v6107_v27, 2  ;;  %v1167_v27 = vperm.slane %v5927_v46, 0  ;;  %v1170_v46 = vperm.slane %v6130_v0, 0 }
 0x146   :  { %v872_v37 = vadd.f32 %v871_v30, %v5925_v8  ;;  %4320 = vmatpush.xpose.msk.msra.mxu0 %vm1578_vm8, %v5664_v24  ;;  %v7834_v24 = vld [vmem:[#allocation15_spill] sm:$0xff] }
 0x147   :  { %1496 = vmatmul.f32.gmra.mxu3 %v1256_v11  ;;  %v6180_v11 = vrot.slane %v5972_v33, 4  ;;  %v1263_v52 = vmul.f32 %v1167_v27, %v813_v38  ;;  %v7839_v38 = vld [vmem:[#allocation17_spill] sm:$0xff] }
 0x148   :  { %4386 = vmatpush.xpose.msk.msra.mxu2 %vm1578_vm8, %v7839_v38 }
 0x149   :  { %1443 = vmatmul.f32.gmra.mxu2 %v1267_v32  ;;  %v6175_v32 = vpop.f32.mrf.mxu3  ;;  %v1180_v40 = vperm.slane %v6180_v11, 1 }
 0x14a   :  { %v905_v49 = vpop.f32.mrf.mxu1  ;;  %4321 = vmatpush.xpose.msk.msra.mxu0 %vm1578_vm8, %v7834_v24  ;;  %v7851_v24 = vld [vmem:[#allocation31_spill] sm:$0xff] }
 0x14b   :  { %v906_v35 = vadd.f32 %v905_v49, %v6053_v63  ;;  %v1276_v44 = vmul.f32 %v1180_v40, %v872_v37 }
 0x14c   :  { %v6151_v7 = vpop.f32.mrf.mxu2 }
 0x14d   :  { %v1259_v48 = vmul.f32 %v1163_v43, %v906_v35  ;;  %1369 = vmatmul.f32.gmra.mxu1 %v1257_v59  ;;  %v873_v47 = vpop.f32.mrf.mxu0  ;;  %v1172_v43 = vperm.slane %v6130_v0, 2 }
 0x14e   :  { %v874_v6 = vadd.f32 %v873_v47, %v5925_v8  ;;  %v7840_v47 = vld [vmem:[#allocation44_spill] sm:$0xff] }
 0x14f   :  { %1499 = vmatmul.f32.gmra.mxu3 %v1259_v48  ;;  %v7833_v48 = vld [vmem:[#allocation20_spill] sm:$0xff]  ;;  %v6257_v40 = vrot.slane %v7840_v47, 7  ;;  %v1182_v47 = vperm.slane %v6204_v60, 0 }
 0x150   :  { %v1279_v10 = vmul.f32 %v1183_v9, %v874_v6  ;;  %v818_v0 = vadd.f32 %v7833_v48, %v6050_v21  ;;  %v7846_v6 = vld [vmem:[#allocation21_spill] sm:$0xff] }
 0x151   :  { %1446 = vmatmul.f32.gmra.mxu2 %v1270_v39  ;;  %v6206_v49 = vpop.f32.mrf.mxu3  ;;  %v1266_v39 = vmul.f32 %v1170_v46, %v815_v58  ;;  %v1189_v58 = vperm.slane %v6257_v40, 1  ;;  %v7849_v48 = vld [vmem:[#allocation25_spill] sm:$0xff] }
 0x152   :  { %v907_v41 = vpop.f32.mrf.mxu1  ;;  %4387 = vmatpush.xpose.msk.msra.mxu2 %vm1578_vm8, %v7846_v6 }
 0x153   :  { %v908_v45 = vadd.f32 %v907_v41, %v6053_v63 }
 0x154   :  { %v6166_v42 = vpop.f32.mrf.mxu2 }
 0x155   :  { %v1262_v19 = vmul.f32 %v1166_v36, %v908_v45  ;;  %1372 = vmatmul.f32.gmra.mxu1 %v1260_v62  ;;  %1046 = vmatmul.bf16.gmra.mxu0 %v5537_v4  ;;  %v876_v35 = vpop.f32.mrf.mxu0  ;;  %v1175_v62 = vperm.slane %v6145_v22, 2  ;;  %v1269_v45 = vmul.f32 %v1173_v16, %v818_v0  ;;  %v7837_v36 = vld [vmem:[#allocation18_spill] sm:$0xff]  ;;  %v7841_v22 = vld [vmem:[#allocation24_spill] sm:$0xff]  ;;  %v7850_v0 = vld [vmem:[#allocation33_spill] sm:$0xff] }
 0x156   :  { %v877_v15 = vadd.f32 %v876_v35, %v5925_v8  ;;  %4322 = vmatpush.xpose.msk.msra.mxu0 %vm1578_vm8, %v7837_v36  ;;  %4388 = vmatpush.xpose.msk.msra.mxu2 %vm1578_vm8, %v7849_v48  ;;  %v823_v16 = vadd.f32 %v7850_v0, %v6050_v21  ;;  %v1185_v48 = vperm.slane %v6231_v13, 0  ;;  %v7869_v0 = vld [vmem:[#allocation46_spill] sm:$0xff] }
 0x157   :  { %1502 = vmatmul.f32.gmra.mxu3 %v1262_v19  ;;  %v7838_v19 = vld [vmem:[#allocation16_spill] sm:$0xff] }
 0x158   :  { %4354 = vmatpush.xpose.msk.msra.mxu1 %vm1578_vm8, %v7838_v19 }
 0x159   :  { %1449 = vmatmul.f32.gmra.mxu2 %v1273_v31  ;;  %v6239_v30 = vpop.f32.mrf.mxu3  ;;  %v1282_v31 = vmul.f32 %v1186_v29, %v877_v15  ;;  %v7852_v15 = vld [vmem:[#allocation26_spill] sm:$0xff] }
 0x15a   :  { %v910_v26 = vpop.f32.mrf.mxu1  ;;  %4389 = vmatpush.xpose.msk.msra.mxu2 %vm1578_vm8, %v7854_v34  ;;  %v7870_v34 = vld [vmem:[#allocation49_spill] sm:$0xff] }
 0x15b   :  { %v911_v53 = vadd.f32 %v910_v26, %v6053_v63  ;;  %v820_v26 = vadd.f32 %v7841_v22, %v6050_v21  ;;  %v7860_v22 = vld [vmem:[#allocation5_spill] sm:$0xff] }
 0x15c   :  { %v6192_v33 = vpop.f32.mrf.mxu2 }
 0x15d   :  { %v1265_v55 = vmul.f32 %v1169_v1, %v911_v53  ;;  %1375 = vmatmul.f32.gmra.mxu1 %v1263_v52  ;;  %v878_v27 = vpop.f32.mrf.mxu0  ;;  %v1176_v53 = vperm.slane %v6159_v51, 0  ;;  %v7842_v1 = vld [vmem:[#allocation22_spill] sm:$0xff] }
 0x15e   :  { %4323 = vmatpush.xpose.msk.msra.mxu0 %vm1578_vm8, %v7842_v1  ;;  %v879_v52 = vadd.f32 %v878_v27, %v5925_v8  ;;  %v7857_v27 = vld [vmem:[#allocation35_spill] sm:$0xff] }
 0x15f   :  { %1505 = vmatmul.f32.gmra.mxu3 %v1265_v55  ;;  %v7844_v55 = vld [vmem:[#allocation19_spill] sm:$0xff]  ;;  %v1272_v8 = vmul.f32 %v1176_v53, %v820_v26  ;;  %4390 = vmatpush.xpose.msk.msra.mxu2 %vm1578_vm8, %v7857_v27  ;;  %v7861_v26 = vld [vmem:[#allocation30_spill] sm:$0xff] }
 0x160   :  { %4355 = vmatpush.xpose.msk.msra.mxu1 %vm1578_vm8, %v7844_v55  ;;  %v7862_v53 = vld [vmem:[#allocation39_spill] sm:$0xff] }
 0x161   :  { %1452 = vmatmul.f32.gmra.mxu2 %v1276_v44  ;;  %v7843_v44 = vld [vmem:[#allocation11_spill] sm:$0xff] }
 0x162   :  { %v912_v59 = vpop.f32.mrf.mxu1  ;;  %v7876_v27 = vld [vmem:[#allocation7_spill] sm:$0xff] }
 0x163   :  { %v913_v14 = vadd.f32 %v912_v59, %v6053_v63  ;;  %v6273_v59 = vpop.f32.mrf.mxu3  ;;  %4391 = vmatpush.xpose.msk.msra.mxu2 %vm1578_vm8, %v7862_v53  ;;  %v1190_v53 = vperm.slane %v6257_v40, 2 }
 0x164   :  { %v6217_v5 = vpop.f32.mrf.mxu2 }
 0x165   :  { %v1268_v54 = vmul.f32 %v1172_v43, %v913_v14  ;;  %1378 = vmatmul.f32.gmra.mxu1 %v1266_v39  ;;  %1051 = vmatmul.bf16.gmra.mxu0 %v7843_v44  ;;  %v1178_v14 = vperm.slane %v6159_v51, 2  ;;  %v7847_v43 = vld [vmem:[#allocation27_spill] sm:$0xff]  ;;  %v1285_v39 = vmul.f32 %v1189_v58, %v879_v52  ;;  %v1179_v51 = vperm.slane %v6180_v11, 0 }
 0x166   :  { %4324 = vmatpush.xpose.msk.msra.mxu0 %vm1578_vm8, %v7847_v43  ;;  %v1184_v58 = vperm.slane %v6204_v60, 2  ;;  %v7868_v60 = vld [vmem:[#allocation34_spill] sm:$0xff] }
 0x167   :  { %1508 = vmatmul.f32.gmra.mxu3 %v1268_v54 }
 0x169   :  { %1455 = vmatmul.f32.gmra.mxu2 %v1279_v10  ;;  %v7848_v10 = vld [vmem:[#allocation23_spill] sm:$0xff] }
 0x16a   :  { %v915_v2 = vpop.f32.mrf.mxu1  ;;  %4356 = vmatpush.xpose.msk.msra.mxu1 %vm1578_vm8, %v7848_v10  ;;  %4325 = vmatpush.xpose.msk.msra.mxu0 %vm1578_vm8, %v7851_v24 }
 0x16b   :  { %v916_v41 = vadd.f32 %v915_v2, %v6053_v63  ;;  %v6298_v36 = vpop.f32.mrf.mxu3 }
 0x16c   :  { %v6243_v17 = vpop.f32.mrf.mxu2 }
 0x16d   :  { %v1271_v37 = vmul.f32 %v1175_v62, %v916_v41  ;;  %1381 = vmatmul.f32.gmra.mxu1 %v1269_v45  ;;  %v1181_v41 = vperm.slane %v6180_v11, 2  ;;  %v1275_v62 = vmul.f32 %v1179_v51, %v823_v16  ;;  %v7855_v45 = vld [vmem:[#allocation38_spill] sm:$0xff]  ;;  %v7859_v11 = vld [vmem:[#allocation41_spill] sm:$0xff] }
 0x16e   :  { %4357 = vmatpush.xpose.msk.msra.mxu1 %vm1578_vm8, %v7852_v15  ;;  %4326 = vmatpush.xpose.msk.msra.mxu0 %vm1578_vm8, %v7855_v45  ;;  %v1187_v15 = vperm.slane %v6231_v13, 2  ;;  %v7873_v45 = vld [vmem:[#allocation48_spill] sm:$0xff] }
 0x16f   :  { %1511 = vmatmul.f32.gmra.mxu3 %v1271_v37  ;;  %v7858_v37 = vld [vmem:[#allocation40_spill] sm:$0xff] }
 0x170   :  { %v825_v38 = vadd.f32 %v7858_v37, %v6050_v21  ;;  %v7877_v37 = vld [vmem:[#allocation37_spill] sm:$0xff] }
 0x171   :  { %1458 = vmatmul.f32.gmra.mxu2 %v1282_v31  ;;  %v7856_v31 = vld [vmem:[#allocation28_spill] sm:$0xff] }
 0x172   :  { %v917_v9 = vpop.f32.mrf.mxu1  ;;  %4358 = vmatpush.xpose.msk.msra.mxu1 %vm1578_vm8, %v7856_v31  ;;  %4327 = vmatpush.xpose.msk.msra.mxu0 %vm1578_vm8, %v7859_v11  ;;  %v1278_v52 = vmul.f32 %v1182_v47, %v825_v38  ;;  %v830_v31 = vadd.f32 %v7873_v45, %v6050_v21  ;;  %v1188_v38 = vperm.slane %v6257_v40, 0  ;;  %v7878_v47 = vld [vmem:[#allocation53_spill] sm:$0xff] }
 0x173   :  { %v918_v35 = vadd.f32 %v917_v9, %v6053_v63  ;;  %v7863_v9 = vld [vmem:[#allocation45_spill] sm:$0xff]  ;;  %v6322_v43 = vpop.f32.mrf.mxu3 }
 0x174   :  { %v6268_v46 = vpop.f32.mrf.mxu2 }
 0x175   :  { %7845 = vst [vmem:[#allocation20_spill] sm:$0xff] %v6268_v46  ;;  %v1274_v54 = vmul.f32 %v1178_v14, %v918_v35  ;;  %1384 = vmatmul.f32.gmra.mxu1 %v1272_v8  ;;  %1056 = vmatmul.bf16.gmra.mxu0 %v7860_v22  ;;  %v7864_v35 = vld [vmem:[#allocation32_spill] sm:$0xff]  ;;  %v7865_v8 = vld [vmem:[#allocation42_spill] sm:$0xff] }
 0x176   :  { %4359 = vmatpush.xpose.msk.msra.mxu1 %vm1578_vm8, %v7861_v26  ;;  %4328 = vmatpush.xpose.msk.msra.mxu0 %vm1578_vm8, %v7863_v9  ;;  %v1284_v26 = vmul.f32 %v1188_v38, %v830_v31  ;;  %v7880_v9 = vld [vmem:[#allocation9_spill] sm:$0xff]  ;;  %v7881_v31 = vld [vmem:[#allocation12_spill] sm:$0xff] }
 0x177   :  { %1514 = vmatmul.f32.gmra.mxu3 %v1274_v54  ;;  %4392 = vmatpush.xpose.msk.msra.mxu2 %vm1578_vm8, %v7865_v8  ;;  %v7867_v54 = vld [vmem:[#allocation47_spill] sm:$0xff] }
 0x179   :  { %1461 = vmatmul.f32.gmra.mxu2 %v1285_v39  ;;  %v7866_v39 = vld [vmem:[#allocation43_spill] sm:$0xff] }
 0x17a   :  { %v920_v29 = vpop.f32.mrf.mxu1  ;;  %4360 = vmatpush.xpose.msk.msra.mxu1 %vm1578_vm8, %v7864_v35  ;;  %v828_v10 = vadd.f32 %v7866_v39, %v6050_v21  ;;  %4329 = vmatpush.xpose.msk.msra.mxu0 %vm1578_vm8, %v7867_v54 }
 0x17b   :  { %v921_v2 = vadd.f32 %v920_v29, %v6053_v63  ;;  %4393 = vmatpush.xpose.msk.msra.mxu2 %vm1578_vm8, %v7869_v0  ;;  %v7871_v29 = vld [vmem:[#allocation36_spill] sm:$0xff]  ;;  %v6345_v13 = vpop.f32.mrf.mxu3 }
 0x17c   :  { %v6290_v18 = vpop.f32.mrf.mxu2  ;;  %v1281_v51 = vmul.f32 %v1185_v48, %v828_v10  ;;  %7875 = vst [vmem:[#allocation13_spill] sm:$0xff] %v6345_v13 }
 0x17d   :  { %7853 = vst [vmem:[#allocation15_spill] sm:$0xff] %v6290_v18  ;;  %v1277_v19 = vmul.f32 %v1181_v41, %v921_v2  ;;  %1387 = vmatmul.f32.gmra.mxu1 %v1275_v62  ;;  %v7872_v62 = vld [vmem:[#allocation50_spill] sm:$0xff] }
 0x17e   :  { %4361 = vmatpush.xpose.msk.msra.mxu1 %vm1578_vm8, %v7868_v60  ;;  %4330 = vmatpush.xpose.msk.msra.mxu0 %vm1578_vm8, %v7870_v34 }
 0x17f   :  { %1517 = vmatmul.f32.gmra.mxu3 %v1277_v19  ;;  %4394 = vmatpush.xpose.msk.msra.mxu2 %vm1578_vm8, %v7872_v62  ;;  %v7874_v19 = vld [vmem:[#allocation51_spill] sm:$0xff] }
 0x182   :  { %v922_v1 = vpop.f32.mrf.mxu1  ;;  %4362 = vmatpush.xpose.msk.msra.mxu1 %vm1578_vm8, %v7871_v29  ;;  %4331 = vmatpush.xpose.msk.msra.mxu0 %vm1578_vm8, %v7874_v19 }
 0x183   :  { %v923_v6 = vadd.f32 %v922_v1, %v6053_v63  ;;  %4395 = vmatpush.xpose.msk.msra.mxu2 %vm1578_vm8, %v7878_v47 }
 0x184   :  { %v1417_v55 = vpop.f32.mrf.mxu2 }
 0x185   :  { %v1280_v14 = vmul.f32 %v1184_v58, %v923_v6  ;;  %1390 = vmatmul.f32.gmra.mxu1 %v1278_v52  ;;  %1061 = vmatmul.bf16.gmra.mxu0 %v7876_v27  ;;  %v6355_v6 = vpop.f32.mrf.mxu3 }
 0x186   :  { %4363 = vmatpush.xpose.msk.msra.mxu1 %vm1578_vm8, %v7877_v37  ;;  %7879 = vst [vmem:[#allocation14_spill] sm:$0xff] %v6355_v6 }
 0x187   :  { %1520 = vmatmul.f32.gmra.mxu3 %v1280_v14 }
 0x18a   :  { %v925_v16 = vpop.f32.mrf.mxu1 }
 0x18b   :  { %v926_v24 = vadd.f32 %v925_v16, %v6053_v63 }
 0x18c   :  { %v1420_v2 = vpop.f32.mrf.mxu2 }
 0x18d   :  { %v1283_v41 = vmul.f32 %v1187_v15, %v926_v24  ;;  %1393 = vmatmul.f32.gmra.mxu1 %v1281_v51 }
 0x18f   :  { %1523 = vmatmul.f32.gmra.mxu3 %v1283_v41 }
 0x192   :  { %v927_v11 = vpop.f32.mrf.mxu1 }
 0x193   :  { %v928_v21 = vadd.f32 %v927_v11, %v6053_v63  ;;  %v1546_v63 = vld [vmem:[%s7714_s1] sm:$0xff] }
 0x194   :  { %v1423_v52 = vpop.f32.mrf.mxu2 }
 0x195   :  { %v1286_v1 = vmul.f32 %v1190_v53, %v928_v21  ;;  %1396 = vmatmul.f32.gmra.mxu1 %v1284_v26  ;;  %1066 = vmatmul.bf16.gmra.mxu0 %v7880_v9 }
 0x197   :  { %1526 = vmatmul.f32.gmra.mxu3 %v1286_v1  ;;  %v1548_v1 = vld [vmem:[%s7714_s1 + $0x10] sm:$0xff] }
 0x19a   :  { %v1352_v58 = vpop.f32.mrf.mxu1 }
 0x19b   :  { %v1418_v14 = vadd.f32 %v1417_v55, %v1352_v58  ;;  %v1547_v55 = vld [vmem:[%s7714_s1 + $0x8] sm:$0xff] }
 0x19c   :  { %v1426_v35 = vpop.f32.mrf.mxu2 }
 0x1a2   :  { %v1355_v8 = vpop.f32.mrf.mxu1  ;;  %v1482_v39 = vpop.f32.mrf.mxu3 }
 0x1a3   :  { %v1483_v10 = vadd.f32 %v1482_v39, %v1418_v14  ;;  %v1421_v60 = vadd.f32 %v1420_v2, %v1355_v8 }
 0x1a4   :  { %v1429_v24 = vpop.f32.mrf.mxu2 }
 0x1a5   :  { %v1530_v54 = vmul.f32 0.14433756, %v1483_v10  ;;  %1071 = vmatmul.bf16.gmra.mxu0 %v7881_v31 }
 0x1a7   :  { %v1562_v40 = vadd.f32 %v1546_v63, %v1530_v54 }
 0x1a9   :  { %v1579_v48 = vsel %vm1578_vm8, %v1562_v40, -inf }
 0x1aa   :  { %v1580_v0 = vrot.slane %v1579_v48, 4  ;;  %v1358_v16 = vpop.f32.mrf.mxu1  ;;  %v1485_v51 = vpop.f32.mrf.mxu3 }
 0x1ab   :  { %v1486_v15 = vadd.f32 %v1485_v51, %v1421_v60  ;;  %v1424_v19 = vadd.f32 %v1423_v52, %v1358_v16 }
 0x1ac   :  { %v1581_v34 = vmax.f32 %v1579_v48, %v1580_v0  ;;  %v1432_v58 = vpop.f32.mrf.mxu2 }
 0x1ad   :  { %v1531_v29 = vmul.f32 0.14433756, %v1486_v15 }
 0x1ae   :  { %v1582_v41 = vrot.slane %v1581_v34, 2 }
 0x1af   :  { %v1563_v62 = vadd.f32 %v1547_v55, %v1531_v29  ;;  %v1549_v29 = vld [vmem:[%s7714_s1 + $0x18] sm:$0xff] }
 0x1b0   :  { %v1583_v45 = vmax.f32 %v1581_v34, %v1582_v41 }
 0x1b1   :  { %v1586_v2 = vsel %vm1578_vm8, %v1563_v62, -inf }
 0x1b2   :  { %v1584_v37 = vrot.slane %v1583_v45, 1  ;;  %v1587_v38 = vrot.slane %v1586_v2, 4  ;;  %v1361_v47 = vpop.f32.mrf.mxu1  ;;  %v1488_v11 = vpop.f32.mrf.mxu3 }
 0x1b3   :  { %v1489_v26 = vadd.f32 %v1488_v11, %v1424_v19  ;;  %v1427_v54 = vadd.f32 %v1426_v35, %v1361_v47 }
 0x1b4   :  { %v1585_v21 = vmax.f32 %v1583_v45, %v1584_v37  ;;  %v1588_v53 = vmax.f32 %v1586_v2, %v1587_v38  ;;  %v1435_v19 = vpop.f32.mrf.mxu2 }
 0x1b5   :  { %v1532_v14 = vmul.f32 0.14433756, %v1489_v26 }
 0x1b6   :  { %v1691_v8 = vsub.f32 %v1562_v40, %v1585_v21  ;;  %v1589_v39 = vrot.slane %v1588_v53, 2 }
 0x1b7   :  { %v1564_v10 = vadd.f32 %v1548_v1, %v1532_v14 }
 0x1b8   :  { %v1707_v63 = vmul.f32 1.442695, %v1691_v8  ;;  %v1590_v52 = vmax.f32 %v1588_v53, %v1589_v39 }
 0x1b9   :  { %v1593_v60 = vsel %vm1578_vm8, %v1564_v10, -inf }
 0x1ba   :  { %5018 = vpow2.f32 %v1707_v63  ;;  %v1591_v48 = vrot.slane %v1590_v52, 1  ;;  %v1594_v0 = vrot.slane %v1593_v60, 4  ;;  %v1364_v16 = vpop.f32.mrf.mxu1  ;;  %v1491_v51 = vpop.f32.mrf.mxu3 }
 0x1bb   :  { %v1492_v15 = vadd.f32 %v1491_v51, %v1427_v54  ;;  %v1430_v11 = vadd.f32 %v1429_v24, %v1364_v16  ;;  %v1550_v54 = vld [vmem:[%s7714_s1 + $0x20] sm:$0xff] }
 0x1bc   :  { %v1592_v34 = vmax.f32 %v1590_v52, %v1591_v48  ;;  %v1595_v55 = vmax.f32 %v1593_v60, %v1594_v0 }
 0x1bd   :  { %v1533_v40 = vmul.f32 0.14433756, %v1492_v15 }
 0x1be   :  { %v1692_v41 = vsub.f32 %v1563_v62, %v1592_v34  ;;  %v1596_v45 = vrot.slane %v1595_v55, 2 }
 0x1bf   :  { %v1565_v2 = vadd.f32 %v1549_v29, %v1533_v40  ;;  %v1438_v40 = vpop.f32.mrf.mxu2 }
 0x1c0   :  { %v6374_v35 = vpop.eup %5018  ;;  %v1709_v37 = vmul.f32 1.442695, %v1692_v41  ;;  %v1597_v38 = vmax.f32 %v1595_v55, %v1596_v45 }
 0x1c1   :  { %v1739_v47 = vsel %vm1578_vm8, %v6374_v35, 0.0  ;;  %v1600_v26 = vsel %vm1578_vm8, %v1565_v2, -inf }
 0x1c2   :  { %v1740_v21 = vrot.slane %v1739_v47, 4  ;;  %5020 = vpow2.f32 %v1709_v37  ;;  %v1598_v53 = vrot.slane %v1597_v38, 1  ;;  %v1601_v1 = vrot.slane %v1600_v26, 4  ;;  %v1367_v14 = vpop.f32.mrf.mxu1  ;;  %v1494_v8 = vpop.f32.mrf.mxu3 }
 0x1c3   :  { %v1495_v62 = vadd.f32 %v1494_v8, %v1430_v11  ;;  %v1433_v41 = vadd.f32 %v1432_v58, %v1367_v14 }
 0x1c4   :  { %v1741_v39 = vadd.f32 %v1740_v21, %v1739_v47  ;;  %v1599_v63 = vmax.f32 %v1597_v38, %v1598_v53  ;;  %v1602_v52 = vmax.f32 %v1600_v26, %v1601_v1 }
 0x1c5   :  { %v1534_v60 = vmul.f32 0.14433756, %v1495_v62  ;;  %v1551_v62 = vld [vmem:[%s7714_s1 + $0x28] sm:$0xff] }
 0x1c6   :  { %v1742_v48 = vrot.slane %v1741_v39, 2  ;;  %v1693_v0 = vsub.f32 %v1564_v10, %v1599_v63  ;;  %v1603_v24 = vrot.slane %v1602_v52, 2 }
 0x1c7   :  { %v6382_v16 = vadd.f32 %v1550_v54, %v1534_v60  ;;  %v6398_v60 = vpop.f32.mrf.mxu0 }
 0x1c8   :  { %v6384_v51 = vpop.eup %5020  ;;  %v1743_v15 = vadd.f32 %v1742_v48, %v1741_v39  ;;  %v1711_v34 = vmul.f32 1.442695, %v1693_v0  ;;  %v1604_v55 = vmax.f32 %v1602_v52, %v1603_v24 }
 0x1c9   :  { %v1746_v29 = vsel %vm1578_vm8, %v6384_v51, 0.0  ;;  %v1607_v45 = vsel %vm1578_vm8, %v6382_v16, -inf }
 0x1ca   :  { %v1744_v37 = vrot.slane %v1743_v15, 1  ;;  %v1747_v38 = vrot.slane %v1746_v29, 4  ;;  %5022 = vpow2.f32 %v1711_v34  ;;  %v1605_v10 = vrot.slane %v1604_v55, 1  ;;  %v1370_v47 = vpop.f32.mrf.mxu1  ;;  %v1497_v11 = vpop.f32.mrf.mxu3 }
 0x1cb   :  { %v1608_v26 = vrot.slane %v1607_v45, 4  ;;  %v1498_v21 = vadd.f32 %v1497_v11, %v1433_v41 }
 0x1cc   :  { %v6390_v53 = vadd.f32 %v1744_v37, %v1743_v15  ;;  %v1748_v1 = vadd.f32 %v1747_v38, %v1746_v29  ;;  %v1606_v8 = vmax.f32 %v1604_v55, %v1605_v10  ;;  %v1436_v29 = vadd.f32 %v1435_v19, %v1370_v47  ;;  %v6406_v38 = vpop.f32.mrf.mxu2  ;;  %v1552_v19 = vld [vmem:[%s7714_s1 + $0x30] sm:$0xff] }
 0x1cd   :  { %v1609_v58 = vmax.f32 %v1607_v45, %v1608_v26  ;;  %v1535_v14 = vmul.f32 0.14433756, %v1498_v21 }
 0x1ce   :  { %5024 = vrcp.f32 %v6390_v53  ;;  %v1749_v39 = vrot.slane %v1748_v1, 2  ;;  %v1694_v63 = vsub.f32 %v1565_v2, %v1606_v8  ;;  %vm1856_vm10 = vweird.f32 %v6390_v53 }
 0x1cf   :  { %v1610_v52 = vrot.slane %v1609_v58, 2  ;;  %v6396_v54 = vadd.f32 %v1551_v62, %v1535_v14 }
 0x1d0   :  { %v6400_v48 = vpop.eup %5022  ;;  %v1750_v0 = vadd.f32 %v1749_v39, %v1748_v1  ;;  %v1713_v15 = vmul.f32 1.442695, %v1694_v63 }
 0x1d1   :  { %v1753_v24 = vsel %vm1578_vm8, %v6400_v48, 0.0  ;;  %v1611_v34 = vmax.f32 %v1609_v58, %v1610_v52  ;;  %v1614_v41 = vsel %vm1578_vm8, %v6396_v54, -inf  ;;  %v1860_v52 = vand.u32 2147483647, %v6390_v53 }
 0x1d2   :  { %v1754_v55 = vrot.slane %v1753_v24, 4  ;;  %v1373_v45 = vpop.f32.mrf.mxu1  ;;  %v1500_v2 = vpop.f32.mrf.mxu3  ;;  %v1751_v37 = vrot.slane %v1750_v0, 1  ;;  %5026 = vpow2.f32 %v1713_v15  ;;  %v1615_v11 = vrot.slane %v1614_v41, 4 }
 0x1d3   :  { %v1612_v10 = vrot.slane %v1611_v34, 1  ;;  %v1501_v1 = vadd.f32 %v1500_v2, %v1436_v29  ;;  %v6418_v15 = vpop.f32.mrf.mxu0  ;;  %vm1861_vm13 = vcmp.eq.f32.partialorder %v1860_v52, 8.507059e+37 }
 0x1d4   :  { %v5025_v26 = vpop.eup %5024  ;;  %v1755_v21 = vadd.f32 %v1754_v55, %v1753_v24  ;;  %v6409_v62 = vadd.f32 %v1751_v37, %v1750_v0  ;;  %v1616_v14 = vmax.f32 %v1614_v41, %v1615_v11  ;;  %v1862_v0 = vand.u32 2147483648, %v6390_v53  ;;  %v6435_v9 = vpop.f32.mrf.mxu2 }
 0x1d5   :  { %v1852_v8 = vmul.f32 %v5025_v26, %v6390_v53  ;;  %v1613_v58 = vmax.f32 %v1611_v34, %v1612_v10  ;;  %v1536_v39 = vmul.f32 0.14433756, %v1501_v1  ;;  %vm1857_vm11 = vweird.f32 %v5025_v26 }
 0x1d6   :  { %v1756_v47 = vrot.slane %v1755_v21, 2  ;;  %5028 = vrcp.f32 %v6409_v62  ;;  %v1617_v55 = vrot.slane %v1616_v14, 2  ;;  %v1439_v10 = vadd.f32 %v1438_v40, %v1373_v45  ;;  %vm1858_vm12 = vmor %vm1856_vm10, %vm1857_vm11 }
 0x1d7   :  { %v1853_v63 = vsub.f32 1.0, %v1852_v8  ;;  %v1695_v24 = vsub.f32 %v6382_v16, %v1613_v58  ;;  %v6421_v29 = vadd.f32 %v1552_v19, %v1536_v39  ;;  %v1863_v39 = vor.u32 1.1754944e-38, %v1862_v0 }
 0x1d8   :  { %v1757_v34 = vadd.f32 %v1756_v47, %v1755_v21  ;;  %v6423_v2 = vpop.eup %5026  ;;  %v1618_v8 = vmax.f32 %v1616_v14, %v1617_v55  ;;  %vm1871_vm14 = vweird.f32 %v6409_v62 }
 0x1d9   :  { %v1854_v37 = vmul.f32 %v5025_v26, %v1853_v63  ;;  %v1715_v41 = vmul.f32 1.442695, %v1695_v24  ;;  %v1760_v1 = vsel %vm1578_vm8, %v6423_v2, 0.0  ;;  %v1621_v16 = vsel %vm1578_vm8, %v6421_v29, -inf }
 0x1da   :  { %v1758_v11 = vrot.slane %v1757_v34, 1  ;;  %v1376_v58 = vpop.f32.mrf.mxu1  ;;  %v1503_v31 = vpop.f32.mrf.mxu3  ;;  %v1761_v47 = vrot.slane %v1760_v1, 4  ;;  %v1622_v19 = vrot.slane %v1621_v16, 4  ;;  %v1619_v40 = vrot.slane %v1618_v8, 1 }
 0x1db   :  { %v1855_v21 = vadd.f32 %v5025_v26, %v1854_v37  ;;  %5030 = vpow2.f32 %v1715_v41  ;;  %v1504_v45 = vadd.f32 %v1503_v31, %v1439_v10  ;;  %v1553_v37 = vld [vmem:[%s7714_s1 + $0x38] sm:$0xff] }
 0x1dc   :  { %v6431_v63 = vadd.f32 %v1758_v11, %v1757_v34  ;;  %v6433_v24 = vpop.eup %5028  ;;  %v1762_v55 = vadd.f32 %v1761_v47, %v1760_v1  ;;  %v1623_v27 = vmax.f32 %v1621_v16, %v1622_v19  ;;  %v1620_v53 = vmax.f32 %v1618_v8, %v1619_v40  ;;  %v6442_v11 = vpop.f32.mrf.mxu0 }
 0x1dd   :  { %v1859_v14 = vsel %vm1858_vm12, %v5025_v26, %v1855_v21  ;;  %v1537_v0 = vmul.f32 0.14433756, %v1504_v45  ;;  %v1867_v26 = vmul.f32 %v6433_v24, %v6409_v62  ;;  %v1875_v16 = vand.u32 2147483647, %v6409_v62 }
 0x1de   :  { %v1864_v41 = vsel %vm1861_vm13, %v1863_v39, %v1859_v14  ;;  %5032 = vrcp.f32 %v6431_v63  ;;  %v1763_v31 = vrot.slane %v1762_v55, 2  ;;  %v1624_v10 = vrot.slane %v1623_v27, 2 }
 0x1df   :  { %v1865_v34 = vmul.f32 %v6374_v35, %v1864_v41  ;;  %v1696_v52 = vsub.f32 %v6396_v54, %v1620_v53  ;;  %v6447_v1 = vadd.f32 %v1553_v37, %v1537_v0  ;;  %v1442_v35 = vadd.f32 %v6406_v38, %v1376_v58 }
 0x1e0   :  { %v1764_v8 = vadd.f32 %v1763_v31, %v1762_v55  ;;  %v1625_v47 = vmax.f32 %v1623_v27, %v1624_v10  ;;  %v1868_v19 = vsub.f32 1.0, %v1867_v26  ;;  %v1877_v27 = vand.u32 2147483648, %v6409_v62 }
 0x1e1   :  { %v6451_v21 = vpop.eup %5030  ;;  %4332 = vmatmul.msk.f32.vlgmr.msra.gmra.mxu0 %vm1578_vm8, %v1865_v34  ;;  %4364 = vmatmul.msk.f32.vlgmr.msra.gmra.mxu1 %vm1578_vm8, %v1865_v34  ;;  %v1717_v39 = vmul.f32 1.442695, %v1696_v52  ;;  %v1628_v40 = vsel %vm1578_vm8, %v6447_v1, -inf  ;;  %vm1872_vm15 = vweird.f32 %v6433_v24  ;;  %v1554_v52 = vld [vmem:[%s7714_s1 + $0x40] sm:$0xff]  ;;  %vm1876_vm9 = vcmp.eq.f32.partialorder %v1875_v16, 8.507059e+37 }
 0x1e2   :  { %v1767_v54 = vsel %vm1578_vm8, %v6451_v21, 0.0  ;;  %4396 = vmatmul.msk.f32.vlgmr.msra.gmra.mxu2 %vm1578_vm8, %v1865_v34  ;;  %v1379_v45 = vpop.f32.mrf.mxu1  ;;  %v1506_v14 = vpop.f32.mrf.mxu3  ;;  %v1765_v55 = vrot.slane %v1764_v8, 1  ;;  %v1626_v58 = vrot.slane %v1625_v47, 1  ;;  %v1629_v37 = vrot.slane %v1628_v40, 4  ;;  %vm1873_vm0 = vmor %vm1871_vm14, %vm1872_vm15 }
 0x1e3   :  { %v1768_v38 = vrot.slane %v1767_v54, 4  ;;  %5034 = vpow2.f32 %v1717_v39  ;;  %v1507_v53 = vadd.f32 %v1506_v14, %v1442_v35  ;;  %v1869_v0 = vmul.f32 %v6433_v24, %v1868_v19  ;;  %v1447_v39 = vpop.f32.mrf.mxu2 }
 0x1e4   :  { %v6462_v41 = vpop.eup %5032  ;;  %v6466_v31 = vadd.f32 %v1765_v55, %v1764_v8  ;;  %v1627_v34 = vmax.f32 %v1625_v47, %v1626_v58  ;;  %v1630_v26 = vmax.f32 %v1628_v40, %v1629_v37  ;;  %v1878_v4 = vor.u32 1.1754944e-38, %v1877_v27  ;;  %v6480_v47 = vpop.f32.mrf.mxu0 }
 0x1e5   :  { %v1769_v10 = vadd.f32 %v1768_v38, %v1767_v54  ;;  %v1538_v22 = vmul.f32 0.14433756, %v1507_v53  ;;  %v1870_v44 = vadd.f32 %v6433_v24, %v1869_v0  ;;  %v1882_v35 = vmul.f32 %v6462_v41, %v6431_v63 }
 0x1e6   :  { %5036 = vrcp.f32 %v6466_v31  ;;  %v1697_v8 = vsub.f32 %v6421_v29, %v1627_v34  ;;  %v1631_v54 = vrot.slane %v1630_v26, 2  ;;  %vm1886_vm10 = vweird.f32 %v6431_v63 }
 0x1e7   :  { %v1770_v19 = vrot.slane %v1769_v10, 2  ;;  %v6482_v40 = vadd.f32 %v1554_v52, %v1538_v22  ;;  %v1874_v14 = vsel %vm1873_vm0, %v6433_v24, %v1870_v44  ;;  %v1445_v37 = vadd.f32 %v6435_v9, %v1379_v45 }
 0x1e8   :  { %v1719_v55 = vmul.f32 1.442695, %v1697_v8  ;;  %v1632_v38 = vmax.f32 %v1630_v26, %v1631_v54  ;;  %v1879_v58 = vsel %vm1876_vm9, %v1878_v4, %v1874_v14  ;;  %v1883_v34 = vsub.f32 1.0, %v1882_v35  ;;  %v1555_v35 = vld [vmem:[%s7714_s1 + $0x48] sm:$0xff] }
 0x1e9   :  { %v1771_v27 = vadd.f32 %v1770_v19, %v1769_v10  ;;  %v6486_v29 = vpop.eup %5034  ;;  %v1635_v62 = vsel %vm1578_vm8, %v6482_v40, -inf  ;;  %v1880_v53 = vmul.f32 %v6384_v51, %v1879_v58  ;;  %v1890_v45 = vand.u32 2147483647, %v6431_v63 }
 0x1ea   :  { %v1382_v22 = vpop.f32.mrf.mxu1  ;;  %v1509_v0 = vpop.f32.mrf.mxu3  ;;  %v1774_v24 = vsel %vm1578_vm8, %v6486_v29, 0.0  ;;  %5038 = vpow2.f32 %v1719_v55  ;;  %v1633_v16 = vrot.slane %v1632_v38, 1  ;;  %v1636_v4 = vrot.slane %v1635_v62, 4 }
 0x1eb   :  { %v1772_v44 = vrot.slane %v1771_v27, 1  ;;  %v1775_v10 = vrot.slane %v1774_v24, 4  ;;  %4333 = vmatmul.msk.f32.gmra.mxu0 %vm1578_vm8, %v1880_v53  ;;  %4365 = vmatmul.msk.f32.gmra.mxu1 %vm1578_vm8, %v1880_v53  ;;  %v1510_v9 = vadd.f32 %v1509_v0, %v1445_v37  ;;  %v1448_v52 = vadd.f32 %v1447_v39, %v1382_v22 }
 0x1ec   :  { %v6497_v26 = vpop.eup %5036  ;;  %v1634_v51 = vmax.f32 %v1632_v38, %v1633_v16  ;;  %4397 = vmatmul.msk.f32.gmra.mxu2 %vm1578_vm8, %v1880_v53  ;;  %v1884_v19 = vmul.f32 %v6462_v41, %v1883_v34  ;;  %vm1887_vm11 = vweird.f32 %v6462_v41  ;;  %v1637_v54 = vmax.f32 %v1635_v62, %v1636_v4  ;;  %v6510_v39 = vpop.f32.mrf.mxu0 }
 0x1ed   :  { %v1776_v8 = vadd.f32 %v1775_v10, %v1774_v24  ;;  %v1539_v14 = vmul.f32 0.14433756, %v1510_v9  ;;  %v1892_v55 = vand.u32 2147483648, %v6431_v63  ;;  %v6506_v58 = vadd.f32 %v1772_v44, %v1771_v27  ;;  %vm6518_vm12 = vmor %vm1886_vm10, %vm1887_vm11  ;;  %v1450_v44 = vpop.f32.mrf.mxu2  ;;  %v1556_v27 = vld [vmem:[%s7714_s1 + $0x50] sm:$0xff] }
 0x1ee   :  { %v1698_v38 = vsub.f32 %v6447_v1, %v1634_v51  ;;  %v1885_v37 = vadd.f32 %v6462_v41, %v1884_v19  ;;  %v1897_v53 = vmul.f32 %v6497_v26, %v6466_v31  ;;  %v1638_v0 = vrot.slane %v1637_v54, 2 }
 0x1ef   :  { %v1777_v22 = vrot.slane %v1776_v8, 2  ;;  %v6514_v34 = vadd.f32 %v1555_v35, %v1539_v14  ;;  %vm6522_vm13 = vcmp.eq.f32.partialorder %v1890_v45, 8.507059e+37  ;;  %v1893_v10 = vor.u32 1.1754944e-38, %v1892_v55 }
 0x1f0   :  { %v6526_v1 = vpop.eup %5038  ;;  %v1721_v24 = vmul.f32 1.442695, %v1698_v38  ;;  %v1889_v16 = vsel %vm6518_vm12, %v6462_v41, %v1885_v37  ;;  %v1898_v4 = vsub.f32 1.0, %v1897_v53  ;;  %v1639_v51 = vmax.f32 %v1637_v54, %v1638_v0 }
 0x1f1   :  { %v1778_v9 = vadd.f32 %v1777_v22, %v1776_v8  ;;  %v1781_v63 = vsel %vm1578_vm8, %v6526_v1, 0.0  ;;  %v1642_v45 = vsel %vm1578_vm8, %v6514_v34, -inf  ;;  %v1894_v38 = vsel %vm6522_vm13, %v1893_v10, %v1889_v16 }
 0x1f2   :  { %v1385_v35 = vpop.f32.mrf.mxu1  ;;  %v1512_v19 = vpop.f32.mrf.mxu3  ;;  %v1782_v14 = vrot.slane %v1781_v63, 4  ;;  %5040 = vpow2.f32 %v1721_v24  ;;  %v1643_v20 = vrot.slane %v1642_v45, 4  ;;  %v1640_v55 = vrot.slane %v1639_v51, 1 }
 0x1f3   :  { %5042 = vrcp.f32 %v6506_v58  ;;  %v1779_v41 = vrot.slane %v1778_v9, 1  ;;  %v1895_v8 = vmul.f32 %v6400_v48, %v1894_v38  ;;  %v1513_v54 = vadd.f32 %v1512_v19, %v1448_v52 }
 0x1f4   :  { %v1783_v37 = vadd.f32 %v1782_v14, %v1781_v63  ;;  %v1644_v53 = vmax.f32 %v1642_v45, %v1643_v20  ;;  %v1899_v22 = vmul.f32 %v6497_v26, %v1898_v4  ;;  %v1641_v62 = vmax.f32 %v1639_v51, %v1640_v55  ;;  %v6550_v16 = vpop.f32.mrf.mxu0 }
 0x1f5   :  { %v6540_v0 = vadd.f32 %v1779_v41, %v1778_v9  ;;  %4334 = vmatmul.msk.f32.gmra.mxu0 %vm1578_vm8, %v1895_v8  ;;  %4366 = vmatmul.msk.f32.gmra.mxu1 %vm1578_vm8, %v1895_v8  ;;  %vm1902_vm14 = vweird.f32 %v6497_v26  ;;  %v1540_v20 = vmul.f32 0.14433756, %v1513_v54  ;;  %v1451_v4 = vadd.f32 %v1450_v44, %v1385_v35 }
 0x1f6   :  { %v1784_v24 = vrot.slane %v1783_v37, 2  ;;  %v1645_v48 = vrot.slane %v1644_v53, 2  ;;  %4398 = vmatmul.msk.f32.gmra.mxu2 %vm1578_vm8, %v1895_v8  ;;  %v1900_v52 = vadd.f32 %v6497_v26, %v1899_v22  ;;  %v1699_v10 = vsub.f32 %v6482_v40, %v1641_v62 }
 0x1f7   :  { %vm1901_vm15 = vweird.f32 %v6466_v31  ;;  %v6556_v45 = vadd.f32 %v1556_v27, %v1540_v20  ;;  %v1905_v19 = vand.u32 2147483647, %v6466_v31  ;;  %5044 = vrcp.f32 %v6540_v0 }
 0x1f8   :  { %v6554_v9 = vpop.eup %5040  ;;  %v1785_v63 = vadd.f32 %v1784_v24, %v1783_v37  ;;  %v1646_v51 = vmax.f32 %v1644_v53, %v1645_v48  ;;  %v1723_v41 = vmul.f32 1.442695, %v1699_v10  ;;  %vm6566_vm0 = vmor %vm1901_vm15, %vm1902_vm14  ;;  %v1907_v44 = vand.u32 2147483648, %v6466_v31  ;;  %v1453_v37 = vpop.f32.mrf.mxu2 }
 0x1f9   :  { %v6559_v14 = vpop.eup %5042  ;;  %v1788_v38 = vsel %vm1578_vm8, %v6554_v9, 0.0  ;;  %v1649_v54 = vsel %vm1578_vm8, %v6556_v45, -inf  ;;  %v1904_v22 = vsel %vm6566_vm0, %v6497_v26, %v1900_v52  ;;  %vm1906_vm9 = vcmp.eq.f32.partialorder %v1905_v19, 8.507059e+37  ;;  %v1557_v26 = vld [vmem:[%s7714_s1 + $0x58] sm:$0xff] }
 0x1fa   :  { %v1388_v35 = vpop.f32.mrf.mxu1  ;;  %v1515_v55 = vpop.f32.mrf.mxu3  ;;  %v1789_v8 = vrot.slane %v1788_v38, 4  ;;  %v1647_v53 = vrot.slane %v1646_v51, 1  ;;  %v1786_v62 = vrot.slane %v1785_v63, 1  ;;  %5046 = vpow2.f32 %v1723_v41 }
 0x1fb   :  { %v1650_v27 = vrot.slane %v1649_v54, 4  ;;  %v1908_v24 = vor.u32 1.1754944e-38, %v1907_v44  ;;  %v1516_v31 = vadd.f32 %v1515_v55, %v1451_v4  ;;  %v1912_v6 = vmul.f32 %v6559_v14, %v6506_v58 }
 0x1fc   :  { %v1790_v48 = vadd.f32 %v1789_v8, %v1788_v38  ;;  %v1648_v20 = vmax.f32 %v1646_v51, %v1647_v53  ;;  %v1454_v40 = vadd.f32 %v1453_v37, %v1388_v35  ;;  %v6583_v52 = vpop.f32.mrf.mxu0  ;;  %v6587_v4 = vadd.f32 %v1786_v62, %v1785_v63 }
 0x1fd   :  { %v1651_v10 = vmax.f32 %v1649_v54, %v1650_v27  ;;  %v1909_v23 = vsel %vm1906_vm9, %v1908_v24, %v1904_v22  ;;  %v6585_v51 = vpop.eup %5044  ;;  %v1541_v38 = vmul.f32 0.14433756, %v1516_v31  ;;  %v1913_v41 = vsub.f32 1.0, %v1912_v6 }
 0x1fe   :  { %v1791_v18 = vrot.slane %v1790_v48, 2  ;;  %v1700_v46 = vsub.f32 %v6514_v34, %v1648_v20  ;;  %v1910_v13 = vmul.f32 %v6423_v2, %v1909_v23  ;;  %v1920_v23 = vand.u32 2147483647, %v6506_v58 }
 0x1ff   :  { %v1652_v19 = vrot.slane %v1651_v10, 2  ;;  %v1922_v2 = vand.u32 2147483648, %v6506_v58  ;;  %v6596_v63 = vadd.f32 %v1557_v26, %v1541_v38  ;;  %v1914_v8 = vmul.f32 %v6559_v14, %v1913_v41  ;;  %v1558_v38 = vld [vmem:[%s7714_s1 + $0x60] sm:$0xff] }
 0x200   :  { %v1792_v44 = vadd.f32 %v1791_v18, %v1790_v48  ;;  %v1725_v55 = vmul.f32 1.442695, %v1700_v46  ;;  %4335 = vmatmul.msk.f32.gmra.mxu0 %vm1578_vm8, %v1910_v13  ;;  %4367 = vmatmul.msk.f32.gmra.mxu1 %vm1578_vm8, %v1910_v13  ;;  %v6593_v34 = vpop.eup %5046  ;;  %vm1917_vm10 = vweird.f32 %v6559_v14  ;;  %vm1916_vm11 = vweird.f32 %v6506_v58  ;;  %v1456_v27 = vpop.f32.mrf.mxu2 }
 0x201   :  { %v1653_v35 = vmax.f32 %v1651_v10, %v1652_v19  ;;  %4399 = vmatmul.msk.f32.gmra.mxu2 %vm1578_vm8, %v1910_v13  ;;  %v1795_v18 = vsel %vm1578_vm8, %v6593_v34, 0.0  ;;  %v1927_v37 = vmul.f32 %v6585_v51, %v6540_v0  ;;  %v1656_v13 = vsel %vm1578_vm8, %v6596_v63, -inf  ;;  %vm1918_vm12 = vmor %vm1916_vm11, %vm1917_vm10 }
 0x202   :  { %v1518_v46 = vpop.f32.mrf.mxu3  ;;  %5048 = vpow2.f32 %v1725_v55  ;;  %v1391_v6 = vpop.f32.mrf.mxu1  ;;  %v1796_v53 = vrot.slane %v1795_v18, 4  ;;  %v1915_v22 = vadd.f32 %v6559_v14, %v1914_v8  ;;  %v1793_v62 = vrot.slane %v1792_v44, 1 }
 0x203   :  { %v1654_v54 = vrot.slane %v1653_v35, 1  ;;  %v1657_v24 = vrot.slane %v1656_v13, 4  ;;  %vm1921_vm13 = vcmp.eq.f32.partialorder %v1920_v23, 8.507059e+37  ;;  %v1923_v48 = vor.u32 1.1754944e-38, %v1922_v2 }
 0x204   :  { %v1797_v20 = vadd.f32 %v1796_v53, %v1795_v18  ;;  %v1919_v58 = vsel %vm1918_vm12, %v6559_v14, %v1915_v22  ;;  %v1519_v10 = vadd.f32 %v1518_v46, %v1454_v40  ;;  %5050 = vrcp.f32 %v6587_v4  ;;  %v6613_v55 = vpop.f32.mrf.mxu0 }
 0x205   :  { %v1655_v31 = vmax.f32 %v1653_v35, %v1654_v54  ;;  %v1658_v26 = vmax.f32 %v1656_v13, %v1657_v24  ;;  %v1924_v19 = vsel %vm1921_vm13, %v1923_v48, %v1919_v58  ;;  %v1928_v41 = vsub.f32 1.0, %v1927_v37 }
 0x206   :  { %v1798_v8 = vrot.slane %v1797_v20, 2  ;;  %v1925_v2 = vmul.f32 %v6451_v21, %v1924_v19  ;;  %v1542_v35 = vmul.f32 0.14433756, %v1519_v10  ;;  %v6619_v14 = vadd.f32 %v1793_v62, %v1792_v44 }
 0x207   :  { %v1701_v23 = vsub.f32 %v6556_v45, %v1655_v31  ;;  %v1659_v40 = vrot.slane %v1658_v26, 2  ;;  %v1929_v46 = vmul.f32 %v6585_v51, %v1928_v41  ;;  %vm1931_vm14 = vweird.f32 %v6540_v0 }
 0x208   :  { %v6617_v18 = vpop.eup %5048  ;;  %v1799_v53 = vadd.f32 %v1798_v8, %v1797_v20  ;;  %4336 = vmatmul.msk.f32.gmra.mxu0 %vm1578_vm8, %v1925_v2  ;;  %4368 = vmatmul.msk.f32.gmra.mxu1 %vm1578_vm8, %v1925_v2  ;;  %v6627_v21 = vadd.f32 %v1558_v38, %v1542_v35  ;;  %vm1932_vm15 = vweird.f32 %v6585_v51  ;;  %v1935_v48 = vand.u32 2147483647, %v6540_v0 }
 0x209   :  { %v1802_v37 = vsel %vm1578_vm8, %v6617_v18, 0.0  ;;  %v1727_v54 = vmul.f32 1.442695, %v1701_v23  ;;  %v1660_v44 = vmax.f32 %v1658_v26, %v1659_v40  ;;  %4400 = vmatmul.msk.f32.gmra.mxu2 %vm1578_vm8, %v1925_v2  ;;  %v1930_v22 = vadd.f32 %v6585_v51, %v1929_v46  ;;  %vm6639_vm0 = vmor %vm1931_vm14, %vm1932_vm15  ;;  %v1459_v2 = vpop.f32.mrf.mxu2 }
 0x20a   :  { %v1521_v45 = vpop.f32.mrf.mxu3  ;;  %v1803_v13 = vrot.slane %v1802_v37, 4  ;;  %v1800_v62 = vrot.slane %v1799_v53, 1  ;;  %v1663_v24 = vsel %vm1578_vm8, %v6627_v21, -inf  ;;  %v6635_v20 = vpop.eup %5050  ;;  %v1457_v10 = vadd.f32 %v1456_v27, %v1391_v6 }
 0x20b   :  { %5052 = vpow2.f32 %v1727_v54  ;;  %v1661_v58 = vrot.slane %v1660_v44, 1  ;;  %v1664_v19 = vrot.slane %v1663_v24, 4  ;;  %v1394_v38 = vpop.f32.mrf.mxu1  ;;  %v1934_v41 = vsel %vm6639_vm0, %v6585_v51, %v1930_v22 }
 0x20c   :  { %v1804_v31 = vadd.f32 %v1803_v13, %v1802_v37  ;;  %5054 = vrcp.f32 %v6619_v14  ;;  %v1937_v8 = vand.u32 2147483648, %v6540_v0  ;;  %v1522_v27 = vadd.f32 %v1521_v45, %v1457_v10  ;;  %v6652_v54 = vpop.f32.mrf.mxu0  ;;  %v1559_v0 = vld [vmem:[%s7714_s1 + $0x68] sm:$0xff] }
 0x20d   :  { %v1662_v35 = vmax.f32 %v1660_v44, %v1661_v58  ;;  %v1665_v6 = vmax.f32 %v1663_v24, %v1664_v19  ;;  %v6648_v40 = vadd.f32 %v1800_v62, %v1799_v53  ;;  %vm1936_vm9 = vcmp.eq.f32.partialorder %v1935_v48, 8.507059e+37 }
 0x20e   :  { %v1805_v23 = vrot.slane %v1804_v31, 2  ;;  %v1938_v46 = vor.u32 1.1754944e-38, %v1937_v8  ;;  %v1942_v37 = vmul.f32 %v6635_v20, %v6587_v4  ;;  %v1543_v22 = vmul.f32 0.14433756, %v1522_v27 }
 0x20f   :  { %v1702_v26 = vsub.f32 %v6596_v63, %v1662_v35  ;;  %v1666_v51 = vrot.slane %v1665_v6, 2  ;;  %vm1946_vm10 = vweird.f32 %v6587_v4  ;;  %vm1947_vm11 = vweird.f32 %v6635_v20 }
 0x210   :  { %v1806_v13 = vadd.f32 %v1805_v23, %v1804_v31  ;;  %v1939_v53 = vsel %vm1936_vm9, %v1938_v46, %v1934_v41  ;;  %v1943_v45 = vsub.f32 1.0, %v1942_v37  ;;  %v6667_v8 = vadd.f32 %v1559_v0, %v1543_v22  ;;  %vm1948_vm12 = vmor %vm1946_vm10, %vm1947_vm11 }
 0x211   :  { %v6658_v44 = vpop.eup %5052  ;;  %v1729_v63 = vmul.f32 1.442695, %v1702_v26  ;;  %v1667_v31 = vmax.f32 %v1665_v6, %v1666_v51  ;;  %v1940_v19 = vmul.f32 %v6486_v29, %v1939_v53  ;;  %v1950_v27 = vand.u32 2147483647, %v6587_v4 }
 0x212   :  { %v1524_v62 = vpop.f32.mrf.mxu3  ;;  %v1807_v24 = vrot.slane %v1806_v13, 1  ;;  %v1809_v48 = vsel %vm1578_vm8, %v6658_v44, 0.0  ;;  %v6664_v58 = vpop.eup %5054  ;;  %v1944_v41 = vmul.f32 %v6635_v20, %v1943_v45  ;;  %v1670_v6 = vsel %vm1578_vm8, %v6667_v8, -inf }
 0x213   :  { %v1810_v10 = vrot.slane %v1809_v48, 4  ;;  %5056 = vpow2.f32 %v1729_v63  ;;  %v1668_v35 = vrot.slane %v1667_v31, 1  ;;  %4337 = vmatmul.msk.f32.gmra.mxu0 %vm1578_vm8, %v1940_v19  ;;  %4369 = vmatmul.msk.f32.gmra.mxu1 %vm1578_vm8, %v1940_v19  ;;  %v1952_v37 = vand.u32 2147483648, %v6587_v4  ;;  %v1397_v22 = vpop.f32.mrf.mxu1  ;;  %v1560_v4 = vld [vmem:[%s7714_s1 + $0x70] sm:$0xff] }
 0x214   :  { %v6670_v23 = vadd.f32 %v1807_v24, %v1806_v13  ;;  %v1945_v29 = vadd.f32 %v6635_v20, %v1944_v41  ;;  %5058 = vrcp.f32 %v6648_v40  ;;  %4401 = vmatmul.msk.f32.gmra.mxu2 %vm1578_vm8, %v1940_v19  ;;  %v1460_v26 = vadd.f32 %v1459_v2, %v1394_v38  ;;  %v1462_v24 = vpop.f32.mrf.mxu2  ;;  %v6693_v41 = vpop.f32.mrf.mxu0 }
 0x215   :  { %v1811_v46 = vadd.f32 %v1810_v10, %v1809_v48  ;;  %v1669_v13 = vmax.f32 %v1667_v31, %v1668_v35  ;;  %v1671_v51 = vrot.slane %v1670_v6, 4  ;;  %v1953_v45 = vor.u32 1.1754944e-38, %v1952_v37 }
 0x216   :  { %5060 = vrcp.f32 %v6670_v23  ;;  %v1949_v53 = vsel %vm1948_vm12, %v6635_v20, %v1945_v29  ;;  %vm1951_vm13 = vcmp.eq.f32.partialorder %v1950_v27, 8.507059e+37  ;;  %v1525_v31 = vadd.f32 %v1524_v62, %v1460_v26 }
 0x217   :  { %v1812_v0 = vrot.slane %v1811_v46, 2  ;;  %v1703_v48 = vsub.f32 %v6627_v21, %v1669_v13  ;;  %v1672_v63 = vmax.f32 %v1670_v6, %v1671_v51  ;;  %v1954_v2 = vsel %vm1951_vm13, %v1953_v45, %v1949_v53 }
 0x218   :  { %v1463_v10 = vadd.f32 %v1462_v24, %v1397_v22  ;;  %v1957_v19 = vmul.f32 %v6664_v58, %v6619_v14  ;;  %v1955_v21 = vmul.f32 %v6526_v1, %v1954_v2  ;;  %v1544_v27 = vmul.f32 0.14433756, %v1525_v31 }
 0x219   :  { %v1813_v38 = vadd.f32 %v1812_v0, %v1811_v46  ;;  %v6695_v20 = vpop.eup %5056  ;;  %v1731_v35 = vmul.f32 1.442695, %v1703_v48  ;;  %v1673_v29 = vrot.slane %v1672_v63, 2  ;;  %vm1962_vm14 = vweird.f32 %v6664_v58 }
 0x21a   :  { %v1816_v46 = vsel %vm1578_vm8, %v6695_v20, 0.0  ;;  %v1958_v6 = vsub.f32 1.0, %v1957_v19  ;;  %v1527_v37 = vpop.f32.mrf.mxu3  ;;  %v6701_v13 = vpop.eup %5058  ;;  %v6703_v22 = vadd.f32 %v1560_v4, %v1544_v27  ;;  %v1965_v45 = vand.u32 2147483647, %v6619_v14  ;;  %v1561_v19 = vld [vmem:[%s7714_s1 + $0x78] sm:$0xff] }
 0x21b   :  { %v1814_v62 = vrot.slane %v1813_v38, 1  ;;  %v1817_v26 = vrot.slane %v1816_v46, 4  ;;  %5062 = vpow2.f32 %v1731_v35  ;;  %v1674_v51 = vmax.f32 %v1672_v63, %v1673_v29  ;;  %4338 = vmatmul.msk.f32.gmra.mxu0 %vm1578_vm8, %v1955_v21  ;;  %4370 = vmatmul.msk.f32.gmra.mxu1 %vm1578_vm8, %v1955_v21 }
 0x21c   :  { %v6705_v0 = vpop.eup %5060  ;;  %v1959_v1 = vmul.f32 %v6664_v58, %v1958_v6  ;;  %v1967_v24 = vand.u32 2147483648, %v6619_v14  ;;  %4402 = vmatmul.msk.f32.gmra.mxu2 %vm1578_vm8, %v1955_v21  ;;  %v1677_v63 = vsel %vm1578_vm8, %v6703_v22, -inf  ;;  %v1528_v2 = vadd.f32 %v1527_v37, %v1463_v10 }
 0x21d   :  { %v6707_v53 = vadd.f32 %v1814_v62, %v1813_v38  ;;  %v1818_v48 = vadd.f32 %v1817_v26, %v1816_v46  ;;  %v1675_v31 = vrot.slane %v1674_v51, 1  ;;  %v1678_v38 = vrot.slane %v1677_v63, 4 }
 0x21e   :  { %v1960_v4 = vadd.f32 %v6664_v58, %v1959_v1  ;;  %vm1961_vm15 = vweird.f32 %v6619_v14  ;;  %v1968_v21 = vor.u32 1.1754944e-38, %v1967_v24  ;;  %v1545_v27 = vmul.f32 0.14433756, %v1528_v2 }
 0x21f   :  { %5064 = vrcp.f32 %v6707_v53  ;;  %v1819_v35 = vrot.slane %v1818_v48, 2  ;;  %v1676_v29 = vmax.f32 %v1674_v51, %v1675_v31  ;;  %vm1963_vm0 = vmor %vm1961_vm15, %vm1962_vm14  ;;  %v1679_v62 = vmax.f32 %v1677_v63, %v1678_v38 }
 0x220   :  { %v1964_v10 = vsel %vm1963_vm0, %v6664_v58, %v1960_v4  ;;  %vm1966_vm9 = vcmp.eq.f32.partialorder %v1965_v45, 8.507059e+37  ;;  %v1972_v46 = vmul.f32 %v6701_v13, %v6648_v40  ;;  %v6731_v1 = vadd.f32 %v1561_v19, %v1545_v27  ;;  %v6736_v58 = vpop.f32.mrf.mxu0 }
 0x221   :  { %v6728_v6 = vpop.eup %5062  ;;  %v1820_v14 = vadd.f32 %v1819_v35, %v1818_v48  ;;  %v1704_v37 = vsub.f32 %v6667_v8, %v1676_v29  ;;  %v1969_v26 = vsel %vm1966_vm9, %v1968_v21, %v1964_v10  ;;  %v1680_v24 = vrot.slane %v1679_v62, 2 }
 0x222   :  { %v1823_v51 = vsel %vm1578_vm8, %v6728_v6, 0.0  ;;  %v1970_v31 = vmul.f32 %v6554_v9, %v1969_v26  ;;  %v1973_v63 = vsub.f32 1.0, %v1972_v46  ;;  %v1684_v48 = vsel %vm1578_vm8, %v6731_v1, -inf }
 0x223   :  { %v1821_v45 = vrot.slane %v1820_v14, 1  ;;  %v1824_v2 = vrot.slane %v1823_v51, 4  ;;  %v1733_v38 = vmul.f32 1.442695, %v1704_v37  ;;  %v1681_v8 = vmax.f32 %v1679_v62, %v1680_v24 }
 0x224   :  { %4339 = vmatmul.msk.f32.gmra.mxu0 %vm1578_vm8, %v1970_v31  ;;  %4371 = vmatmul.msk.f32.gmra.mxu1 %vm1578_vm8, %v1970_v31  ;;  %v1685_v19 = vrot.slane %v1684_v48, 4  ;;  %v1974_v35 = vmul.f32 %v6701_v13, %v1973_v63  ;;  %vm1976_vm10 = vweird.f32 %v6648_v40  ;;  %vm1977_vm11 = vweird.f32 %v6701_v13 }
 0x225   :  { %v6740_v4 = vpop.eup %5064  ;;  %v6746_v9 = vadd.f32 %v1821_v45, %v1820_v14  ;;  %v1825_v29 = vadd.f32 %v1824_v2, %v1823_v51  ;;  %5066 = vpow2.f32 %v1733_v38  ;;  %4403 = vmatmul.msk.f32.gmra.mxu2 %vm1578_vm8, %v1970_v31  ;;  %v1682_v21 = vrot.slane %v1681_v8, 1  ;;  %vm6752_vm12 = vmor %vm1976_vm10, %vm1977_vm11 }
 0x226   :  { %v1686_v27 = vmax.f32 %v1684_v48, %v1685_v19  ;;  %v1975_v62 = vadd.f32 %v6701_v13, %v1974_v35  ;;  %v1980_v10 = vand.u32 2147483647, %v6648_v40  ;;  %v1982_v14 = vand.u32 2147483648, %v6648_v40 }
 0x227   :  { %v1826_v46 = vrot.slane %v1825_v29, 2  ;;  %v1987_v26 = vmul.f32 %v6705_v0, %v6670_v23  ;;  %v1683_v51 = vmax.f32 %v1681_v8, %v1682_v21  ;;  %5068 = vrcp.f32 %v6746_v9 }
 0x228   :  { %v1687_v24 = vrot.slane %v1686_v27, 2  ;;  %v1979_v31 = vsel %vm6752_vm12, %v6701_v13, %v1975_v62  ;;  %v1983_v45 = vor.u32 1.1754944e-38, %v1982_v14  ;;  %vm1981_vm13 = vcmp.eq.f32.partialorder %v1980_v10, 8.507059e+37 }
 0x229   :  { %v1827_v63 = vadd.f32 %v1826_v46, %v1825_v29  ;;  %v1988_v2 = vsub.f32 1.0, %v1987_v26  ;;  %v1705_v38 = vsub.f32 %v6703_v22, %v1683_v51  ;;  %vm1991_vm14 = vweird.f32 %v6670_v23  ;;  %v6772_v22 = vpop.f32.mrf.mxu0 }
 0x22a   :  { %v1688_v48 = vmax.f32 %v1686_v27, %v1687_v24  ;;  %v1984_v8 = vsel %vm1981_vm13, %v1983_v45, %v1979_v31  ;;  %vm1992_vm15 = vweird.f32 %v6705_v0  ;;  %v1995_v37 = vand.u32 2147483647, %v6670_v23 }
 0x22b   :  { %v6765_v40 = vpop.eup %5066  ;;  %v1828_v19 = vrot.slane %v1827_v63, 1  ;;  %v1989_v35 = vmul.f32 %v6705_v0, %v1988_v2  ;;  %v1735_v29 = vmul.f32 1.442695, %v1705_v38  ;;  %v1985_v62 = vmul.f32 %v6593_v34, %v1984_v8  ;;  %vm6782_vm0 = vmor %vm1991_vm14, %vm1992_vm15 }
 0x22c   :  { %v1830_v13 = vsel %vm1578_vm8, %v6765_v40, 0.0  ;;  %v1689_v21 = vrot.slane %v1688_v48, 1  ;;  %v1997_v34 = vand.u32 2147483648, %v6670_v23  ;;  %vm1996_vm9 = vcmp.eq.f32.partialorder %v1995_v37, 8.507059e+37 }
 0x22d   :  { %v6774_v27 = vadd.f32 %v1828_v19, %v1827_v63  ;;  %v1831_v10 = vrot.slane %v1830_v13, 4  ;;  %v1990_v46 = vadd.f32 %v6705_v0, %v1989_v35  ;;  %5070 = vpow2.f32 %v1735_v29  ;;  %4340 = vmatmul.msk.f32.gmra.mxu0 %vm1578_vm8, %v1985_v62  ;;  %4372 = vmatmul.msk.f32.gmra.mxu1 %vm1578_vm8, %v1985_v62  ;;  %v6787_v51 = vpop.eup %5068 }
 0x22e   :  { %v1690_v14 = vmax.f32 %v1688_v48, %v1689_v21  ;;  %4404 = vmatmul.msk.f32.gmra.mxu2 %vm1578_vm8, %v1985_v62  ;;  %v2002_v63 = vmul.f32 %v6740_v4, %v6707_v53  ;;  %v1998_v2 = vor.u32 1.1754944e-38, %v1997_v34  ;;  %vm2007_vm10 = vweird.f32 %v6740_v4 }
 0x22f   :  { %5072 = vrcp.f32 %v6774_v27  ;;  %v1832_v24 = vadd.f32 %v1831_v10, %v1830_v13  ;;  %v1994_v31 = vsel %vm6782_vm0, %v6705_v0, %v1990_v46  ;;  %v2012_v8 = vand.u32 2147483648, %v6707_v53 }
 0x230   :  { %v1706_v45 = vsub.f32 %v6731_v1, %v1690_v14  ;;  %v2003_v23 = vsub.f32 1.0, %v2002_v63  ;;  %v1999_v19 = vsel %vm1996_vm9, %v1998_v2, %v1994_v31  ;;  %v2017_v35 = vmul.f32 %v6787_v51, %v6746_v9 }
 0x231   :  { %v1833_v38 = vrot.slane %v1832_v24, 2  ;;  %v2000_v0 = vmul.f32 %v6617_v18, %v1999_v19  ;;  %v2010_v1 = vand.u32 2147483647, %v6707_v53  ;;  %vm2006_vm11 = vweird.f32 %v6707_v53  ;;  %v6816_v34 = vpop.f32.mrf.mxu0 }
 0x232   :  { %v1737_v48 = vmul.f32 1.442695, %v1706_v45  ;;  %v2004_v29 = vmul.f32 %v6740_v4, %v2003_v23  ;;  %v2018_v62 = vsub.f32 1.0, %v2017_v35  ;;  %vm2008_vm12 = vmor %vm2006_vm11, %vm2007_vm10  ;;  %v2013_v18 = vor.u32 1.1754944e-38, %v2012_v8  ;;  %7894 = vst [vmem:[#allocation18_spill] sm:$0xff] %v6816_v34 }
 0x233   :  { %v1834_v13 = vadd.f32 %v1833_v38, %v1832_v24  ;;  %v6804_v21 = vpop.eup %5070  ;;  %vm2011_vm13 = vcmp.eq.f32.partialorder %v2010_v1, 8.507059e+37  ;;  %vm2022_vm14 = vweird.f32 %v6787_v51  ;;  %vm2021_vm15 = vweird.f32 %v6746_v9 }
 0x234   :  { %5074 = vpow2.f32 %v1737_v48  ;;  %v1837_v37 = vsel %vm1578_vm8, %v6804_v21, 0.0  ;;  %v2005_v14 = vadd.f32 %v6740_v4, %v2004_v29  ;;  %v2019_v24 = vmul.f32 %v6787_v51, %v2018_v62  ;;  %vm2023_vm0 = vmor %vm2021_vm15, %vm2022_vm14 }
 0x235   :  { %v6806_v10 = vpop.eup %5072  ;;  %v1835_v46 = vrot.slane %v1834_v13, 1  ;;  %v1838_v26 = vrot.slane %v1837_v37, 4  ;;  %4341 = vmatmul.msk.f32.gmra.mxu0 %vm1578_vm8, %v2000_v0  ;;  %4373 = vmatmul.msk.f32.gmra.mxu1 %vm1578_vm8, %v2000_v0  ;;  %v2027_v23 = vand.u32 2147483648, %v6746_v9  ;;  %v2025_v8 = vand.u32 2147483647, %v6746_v9 }
 0x236   :  { %4405 = vmatmul.msk.f32.gmra.mxu2 %vm1578_vm8, %v2000_v0  ;;  %v2009_v63 = vsel %vm2008_vm12, %v6740_v4, %v2005_v14  ;;  %v2032_v53 = vmul.f32 %v6806_v10, %v6774_v27  ;;  %v2020_v38 = vadd.f32 %v6787_v51, %v2019_v24  ;;  %vm2037_vm10 = vweird.f32 %v6806_v10 }
 0x237   :  { %v6819_v31 = vadd.f32 %v1835_v46, %v1834_v13  ;;  %v1839_v45 = vadd.f32 %v1838_v26, %v1837_v37  ;;  %v2014_v2 = vsel %vm2011_vm13, %v2013_v18, %v2009_v63  ;;  %v2028_v46 = vor.u32 1.1754944e-38, %v2027_v23 }
 0x238   :  { %v2015_v4 = vmul.f32 %v6658_v44, %v2014_v2  ;;  %v2033_v35 = vsub.f32 1.0, %v2032_v53  ;;  %v2024_v1 = vsel %vm2023_vm0, %v6787_v51, %v2020_v38  ;;  %vm2026_vm9 = vcmp.eq.f32.partialorder %v2025_v8, 8.507059e+37 }
 0x239   :  { %5076 = vrcp.f32 %v6819_v31  ;;  %v1840_v19 = vrot.slane %v1839_v45, 2  ;;  %v2029_v9 = vsel %vm2026_vm9, %v2028_v46, %v2024_v1  ;;  %v6841_v24 = vpop.f32.mrf.mxu0  ;;  %vm2036_vm11 = vweird.f32 %v6774_v27 }
 0x23a   :  { %v6830_v48 = vpop.eup %5074  ;;  %v2034_v62 = vmul.f32 %v6806_v10, %v2033_v35  ;;  %7895 = vst [vmem:[#allocation16_spill] sm:$0xff] %v6841_v24  ;;  %v2042_v63 = vand.u32 2147483648, %v6774_v27  ;;  %v2030_v2 = vmul.f32 %v6695_v20, %v2029_v9  ;;  %v2040_v38 = vand.u32 2147483647, %v6774_v27  ;;  %vm2038_vm12 = vmor %vm2036_vm11, %vm2037_vm10 }
 0x23b   :  { %v1844_v13 = vsel %vm1578_vm8, %v6830_v48, 0.0  ;;  %v1841_v0 = vadd.f32 %v1840_v19, %v1839_v45  ;;  %vm2051_vm15 = vweird.f32 %v6819_v31  ;;  %v2055_v46 = vand.u32 2147483647, %v6819_v31 }
 0x23c   :  { %v1845_v29 = vrot.slane %v1844_v13, 4  ;;  %v2035_v51 = vadd.f32 %v6806_v10, %v2034_v62  ;;  %v2043_v8 = vor.u32 1.1754944e-38, %v2042_v63  ;;  %vm2041_vm13 = vcmp.eq.f32.partialorder %v2040_v38, 8.507059e+37 }
 0x23d   :  { %v1842_v37 = vrot.slane %v1841_v0, 1  ;;  %4342 = vmatmul.msk.f32.gmra.mxu0 %vm1578_vm8, %v2015_v4  ;;  %4374 = vmatmul.msk.f32.gmra.mxu1 %vm1578_vm8, %v2015_v4  ;;  %vm2056_vm9 = vcmp.eq.f32.partialorder %v2055_v46, 8.507059e+37  ;;  %v7899_v46 = vld [vmem:[#allocation54_spill] sm:$0xff] }
 0x23e   :  { %v1846_v14 = vadd.f32 %v1845_v29, %v1844_v13  ;;  %4406 = vmatmul.msk.f32.gmra.mxu2 %vm1578_vm8, %v2015_v4  ;;  %v2039_v4 = vsel %vm2038_vm12, %v6806_v10, %v2035_v51  ;;  %v2057_v29 = vand.u32 2147483648, %v6819_v31 }
 0x23f   :  { %v5077_v44 = vpop.eup %5076  ;;  %v1843_v26 = vadd.f32 %v1842_v37, %v1841_v0  ;;  %v2044_v0 = vsel %vm2041_vm13, %v2043_v8, %v2039_v4  ;;  %v5084_v8 = vld [vmem:[%s7720_s7] sm:$0x3f] }
 0x240   :  { %v1847_v18 = vrot.slane %v1846_v14, 2  ;;  %v2047_v53 = vmul.f32 %v5077_v44, %v6819_v31  ;;  %vm2052_vm14 = vweird.f32 %v5077_v44  ;;  %v2045_v1 = vmul.f32 %v6728_v6, %v2044_v0 }
 0x241   :  { %5078 = vrcp.f32 %v1843_v26  ;;  %v6859_v62 = vpop.f32.mrf.mxu0  ;;  %vm2053_vm0 = vmor %vm2051_vm15, %vm2052_vm14  ;;  %v2058_v9 = vor.u32 1.1754944e-38, %v2057_v29  ;;  %vm2066_vm11 = vweird.f32 %v1843_v26 }
 0x242   :  { %v1848_v45 = vadd.f32 %v1847_v18, %v1846_v14  ;;  %v2048_v23 = vsub.f32 1.0, %v2047_v53  ;;  %7896 = vst [vmem:[#allocation17_spill] sm:$0xff] %v6859_v62 }
 0x244   :  { %v1849_v19 = vrot.slane %v1848_v45, 1  ;;  %v2049_v35 = vmul.f32 %v5077_v44, %v2048_v23 }
 0x245   :  { %4343 = vmatmul.msk.f32.gmra.mxu0 %vm1578_vm8, %v2030_v2  ;;  %4375 = vmatmul.msk.f32.gmra.mxu1 %vm1578_vm8, %v2030_v2 }
 0x246   :  { %v6851_v13 = vadd.f32 %v1849_v19, %v1848_v45  ;;  %4407 = vmatmul.msk.f32.gmra.mxu2 %vm1578_vm8, %v2030_v2  ;;  %v2050_v27 = vadd.f32 %v5077_v44, %v2049_v35  ;;  %v2072_v45 = vand.u32 2147483648, %v1843_v26  ;;  %v6875_v35 = vperm.slane %v5084_v8, 3 }
 0x247   :  { %v5079_v20 = vpop.eup %5078 }
 0x248   :  { %5080 = vrcp.f32 %v6851_v13  ;;  %v2062_v10 = vmul.f32 %v5079_v20, %v1843_v26  ;;  %v2054_v14 = vsel %vm2053_vm0, %v5077_v44, %v2050_v27  ;;  %vm2067_vm10 = vweird.f32 %v5079_v20 }
 0x249   :  { %v2059_v6 = vsel %vm2056_vm9, %v2058_v9, %v2054_v14  ;;  %v2070_v44 = vand.u32 2147483647, %v1843_v26  ;;  %vm2068_vm12 = vmor %vm2066_vm11, %vm2067_vm10  ;;  %v6868_v38 = vpop.f32.mrf.mxu0  ;;  %v2073_v4 = vor.u32 1.1754944e-38, %v2072_v45  ;;  %vm2081_vm15 = vweird.f32 %v6851_v13 }
 0x24a   :  { %v2063_v37 = vsub.f32 1.0, %v2062_v10  ;;  %v2060_v2 = vmul.f32 %v6765_v40, %v2059_v6  ;;  %7897 = vst [vmem:[#allocation44_spill] sm:$0xff] %v6868_v38  ;;  %v6877_v40 = vperm.slane %v5084_v8, 4  ;;  %v2085_v29 = vand.u32 2147483647, %v6851_v13  ;;  %v7898_v10 = vld [vmem:[#allocation52_spill] sm:$0xff] }
 0x24b   :  { %vm2071_vm13 = vcmp.eq.f32.partialorder %v2070_v44, 8.507059e+37  ;;  %v6888_v45 = vperm.slane %v5084_v8, 5 }
 0x24c   :  { %v2064_v18 = vmul.f32 %v5079_v20, %v2063_v37  ;;  %v989_v37 = vadd.f32 %v7899_v46, %v6877_v40  ;;  %vm2086_vm9 = vcmp.eq.f32.partialorder %v2085_v29, 8.507059e+37  ;;  %v7901_v29 = vld [vmem:[#allocation56_spill] sm:$0xff] }
 0x24d   :  { %4344 = vmatmul.msk.f32.gmra.mxu0 %vm1578_vm8, %v2045_v1  ;;  %4376 = vmatmul.msk.f32.gmra.mxu1 %vm1578_vm8, %v2045_v1 }
 0x24e   :  { %v5081_v51 = vpop.eup %5080  ;;  %4408 = vmatmul.msk.f32.gmra.mxu2 %vm1578_vm8, %v2045_v1  ;;  %v2065_v53 = vadd.f32 %v5079_v20, %v2064_v18  ;;  %v940_v1 = vadd.f32 %v7898_v10, %v6875_v35 }
 0x24f   :  { %v2077_v63 = vmul.f32 %v5081_v51, %v6851_v13  ;;  %vm2082_vm14 = vweird.f32 %v5081_v51 }
 0x250   :  { %v2069_v23 = vsel %vm2068_vm12, %v5079_v20, %v2065_v53  ;;  %v2087_v20 = vand.u32 2147483648, %v6851_v13  ;;  %vm2083_vm0 = vmor %vm2081_vm15, %vm2082_vm14 }
 0x251   :  { %v2078_v31 = vsub.f32 1.0, %v2077_v63  ;;  %v2074_v26 = vsel %vm2071_vm13, %v2073_v4, %v2069_v23 }
 0x252   :  { %v2075_v27 = vmul.f32 %v6804_v21, %v2074_v26  ;;  %v2088_v6 = vor.u32 1.1754944e-38, %v2087_v20 }
 0x253   :  { %v2079_v19 = vmul.f32 %v5081_v51, %v2078_v31 }
 0x255   :  { %4345 = vmatmul.msk.f32.gmra.mxu0 %vm1578_vm8, %v2060_v2  ;;  %4377 = vmatmul.msk.f32.gmra.mxu1 %vm1578_vm8, %v2060_v2  ;;  %v2080_v0 = vadd.f32 %v5081_v51, %v2079_v19 }
 0x256   :  { %4409 = vmatmul.msk.f32.gmra.mxu2 %vm1578_vm8, %v2060_v2 }
 0x257   :  { %v2084_v14 = vsel %vm2083_vm0, %v5081_v51, %v2080_v0  ;;  %v1038_v51 = vadd.f32 %v6398_v60, %v6888_v45  ;;  %v7900_v0 = vld [vmem:[#allocation55_spill] sm:$0xff] }
 0x258   :  { %v2089_v21 = vsel %vm2086_vm9, %v2088_v6, %v2084_v14  ;;  %v942_v20 = vadd.f32 %v7900_v0, %v6875_v35 }
 0x259   :  { %v2090_v23 = vmul.f32 %v6830_v48, %v2089_v21 }
 0x25d   :  { %4346 = vmatmul.msk.f32.gmra.mxu0 %vm1578_vm8, %v2075_v27  ;;  %4378 = vmatmul.msk.f32.gmra.mxu1 %vm1578_vm8, %v2075_v27 }
 0x25e   :  { %v2300_v9 = vpop.f32.mrf.mxu0  ;;  %v2365_v18 = vpop.f32.mrf.mxu1  ;;  %4410 = vmatmul.msk.f32.gmra.mxu2 %vm1578_vm8, %v2075_v27  ;;  %v991_v27 = vadd.f32 %v7901_v29, %v6877_v40 }
 0x25f   :  { %v2478_v63 = vmul.f32 %v2300_v9, %v940_v1  ;;  %v2479_v53 = vmul.f32 %v2365_v18, %v989_v37 }
 0x261   :  { %v2526_v13 = vrot.slane %v2478_v63, 4  ;;  %v2532_v31 = vrot.slane %v2479_v53, 4 }
 0x263   :  { %v2527_v2 = vadd.f32 %v2526_v13, %v2478_v63  ;;  %v2533_v44 = vadd.f32 %v2532_v31, %v2479_v53 }
 0x265   :  { %v2528_v19 = vrot.slane %v2527_v2, 2  ;;  %v2430_v4 = vpop.f32.mrf.mxu2  ;;  %v2534_v8 = vrot.slane %v2533_v44, 2  ;;  %4347 = vmatmul.msk.f32.gmra.mxu0 %vm1578_vm8, %v2090_v23  ;;  %4379 = vmatmul.msk.f32.gmra.mxu1 %vm1578_vm8, %v2090_v23 }
 0x266   :  { %v2480_v26 = vmul.f32 %v2430_v4, %v1038_v51  ;;  %4411 = vmatmul.msk.f32.gmra.mxu2 %vm1578_vm8, %v2090_v23  ;;  %v1040_v51 = vadd.f32 %v6418_v15, %v6888_v45  ;;  %v4922_v15 = vld [vmem:[%s7721_s8 + $0xb0] sm:$0xf0] }
 0x267   :  { %v2529_v60 = vadd.f32 %v2528_v19, %v2527_v2  ;;  %v2535_v46 = vadd.f32 %v2534_v8, %v2533_v44  ;;  %v7902_v44 = vld [vmem:[#allocation57_spill] sm:$0xff] }
 0x268   :  { %v2538_v10 = vrot.slane %v2480_v26, 4  ;;  %v2303_v1 = vpop.f32.mrf.mxu0  ;;  %v2368_v48 = vpop.f32.mrf.mxu1  ;;  %v945_v8 = vadd.f32 %v7902_v44, %v6875_v35 }
 0x269   :  { %v2481_v14 = vmul.f32 %v2303_v1, %v942_v20  ;;  %v2482_v9 = vmul.f32 %v2368_v48, %v991_v27  ;;  %v2530_v53 = vrot.slane %v2529_v60, 1  ;;  %v2536_v21 = vrot.slane %v2535_v46, 1  ;;  %v7903_v1 = vld [vmem:[#allocation58_spill] sm:$0xff] }
 0x26a   :  { %v2539_v37 = vadd.f32 %v2538_v10, %v2480_v26  ;;  %v4498_v10 = vld [vmem:[%s7721_s8 + $0xa8] sm:$0xf]  ;;  %v994_v48 = vadd.f32 %v7903_v1, %v6877_v40 }
 0x26b   :  { %v2544_v6 = vrot.slane %v2481_v14, 4  ;;  %v2550_v63 = vrot.slane %v2482_v9, 4  ;;  %v2531_v19 = vadd.f32 %v2530_v53, %v2529_v60  ;;  %v2537_v26 = vadd.f32 %v2536_v21, %v2535_v46 }
 0x26c   :  { %v2540_v18 = vrot.slane %v2539_v37, 2 }
 0x26d   :  { %v2545_v13 = vadd.f32 %v2544_v6, %v2481_v14  ;;  %v2551_v31 = vadd.f32 %v2550_v63, %v2482_v9  ;;  %v4499_v9 = vor.u32 %v4922_v15, %v4498_v10  ;;  %v2814_v53 = vpack.c.bf16 %v2531_v19, %v2531_v19 }
 0x26e   :  { %v2541_v4 = vadd.f32 %v2540_v18, %v2539_v37  ;;  %v1043_v10 = vadd.f32 %v6442_v11, %v6888_v45 }
 0x26f   :  { %v2546_v0 = vrot.slane %v2545_v13, 2  ;;  %v2552_v23 = vrot.slane %v2551_v31, 2  ;;  %v2433_v2 = vpop.f32.mrf.mxu2  ;;  %3494 = vmatpush.bf16.msrb.mxu3 %v4499_v9  ;;  %v3014_v15 = vunpack.c.l.b16 %v2814_v53 }
 0x270   :  { %v2483_v29 = vmul.f32 %v2433_v2, %v1040_v51  ;;  %v2542_v18 = vrot.slane %v2541_v4, 1 }
 0x271   :  { %v2547_v20 = vadd.f32 %v2546_v0, %v2545_v13  ;;  %v2553_v27 = vadd.f32 %v2552_v23, %v2551_v31  ;;  %v2815_v31 = vpack.c.bf16 %v2537_v26, %v2537_v26 }
 0x272   :  { %v2556_v37 = vrot.slane %v2483_v29, 4  ;;  %v2306_v60 = vpop.f32.mrf.mxu0  ;;  %v2371_v14 = vpop.f32.mrf.mxu1  ;;  %v2543_v38 = vadd.f32 %v2542_v18, %v2541_v4 }
 0x273   :  { %v2548_v6 = vrot.slane %v2547_v20, 1  ;;  %v2554_v46 = vrot.slane %v2553_v27, 1  ;;  %v2484_v63 = vmul.f32 %v2306_v60, %v945_v8  ;;  %v2485_v13 = vmul.f32 %v2371_v14, %v994_v48 }
 0x274   :  { %v2557_v21 = vadd.f32 %v2556_v37, %v2483_v29  ;;  %v3015_v19 = vunpack.c.l.b16 %v2815_v31  ;;  %v2816_v14 = vpack.c.bf16 %v2543_v38, %v2543_v38 }
 0x275   :  { %v2549_v51 = vadd.f32 %v2548_v6, %v2547_v20  ;;  %v2555_v0 = vadd.f32 %v2554_v46, %v2553_v27  ;;  %v2562_v23 = vrot.slane %v2484_v63, 4  ;;  %v2568_v44 = vrot.slane %v2485_v13, 4  ;;  %v7904_v6 = vld [vmem:[#allocation59_spill] sm:$0xff] }
 0x276   :  { %v2558_v2 = vrot.slane %v2557_v21, 2  ;;  %v947_v11 = vadd.f32 %v7904_v6, %v6875_v35 }
 0x277   :  { %v2817_v1 = vpack.c.bf16 %v2549_v51, %v2549_v51  ;;  %v2818_v62 = vpack.c.bf16 %v2555_v0, %v2555_v0  ;;  %v2563_v24 = vadd.f32 %v2562_v23, %v2484_v63  ;;  %v2569_v8 = vadd.f32 %v2568_v44, %v2485_v13 }
 0x278   :  { %v2559_v34 = vadd.f32 %v2558_v2, %v2557_v21  ;;  %v7905_v21 = vld [vmem:[#allocation61_spill] sm:$0xff]  ;;  %v3016_v44 = vunpack.c.l.b16 %v2816_v14  ;;  %v999_v14 = vadd.f32 %v6105_v57, %v6877_v40  ;;  %v4486_v57 = vld [vmem:[%s7721_s8 + $0x90] sm:$0xf] }
 0x279   :  { %v3017_v29 = vunpack.c.l.b16 %v2817_v1  ;;  %v3018_v48 = vunpack.c.l.b16 %v2818_v62  ;;  %v2564_v37 = vrot.slane %v2563_v24, 2  ;;  %v2436_v26 = vpop.f32.mrf.mxu2  ;;  %v2570_v27 = vrot.slane %v2569_v8, 2 }
 0x27a   :  { %v2560_v20 = vrot.slane %v2559_v34, 1  ;;  %v2486_v60 = vmul.f32 %v2436_v26, %v1043_v10  ;;  %v996_v62 = vadd.f32 %v7905_v21, %v6877_v40 }
 0x27b   :  { %v3062_v4 = vsel %vm288_vm1, %v3017_v29, %v3014_v15  ;;  %v3069_v9 = vsel %vm288_vm1, %v3018_v48, %v3015_v19  ;;  %v2565_v18 = vadd.f32 %v2564_v37, %v2563_v24  ;;  %v2571_v63 = vadd.f32 %v2570_v27, %v2569_v8 }
 0x27c   :  { %v2561_v46 = vadd.f32 %v2560_v20, %v2559_v34  ;;  %v2574_v53 = vrot.slane %v2486_v60, 4  ;;  %v1045_v27 = vadd.f32 %v6480_v47, %v6888_v45 }
 0x27d   :  { %v2566_v13 = vrot.slane %v2565_v18, 1  ;;  %v2309_v31 = vpop.f32.mrf.mxu0  ;;  %v2374_v51 = vpop.f32.mrf.mxu1  ;;  %v2572_v23 = vrot.slane %v2571_v63, 1 }
 0x27e   :  { %v2819_v0 = vpack.c.bf16 %v2561_v46, %v2561_v46  ;;  %v2575_v38 = vadd.f32 %v2574_v53, %v2486_v60  ;;  %v2487_v2 = vmul.f32 %v2309_v31, %v947_v11  ;;  %v2488_v10 = vmul.f32 %v2374_v51, %v996_v62  ;;  %v7906_v53 = vld [vmem:[#allocation60_spill] sm:$0xff] }
 0x27f   :  { %v2567_v1 = vadd.f32 %v2566_v13, %v2565_v18  ;;  %v2573_v15 = vadd.f32 %v2572_v23, %v2571_v63  ;;  %v950_v21 = vadd.f32 %v7906_v53, %v6875_v35 }
 0x280   :  { %v3019_v24 = vunpack.c.l.b16 %v2819_v0  ;;  %v2576_v19 = vrot.slane %v2575_v38, 2  ;;  %v2580_v29 = vrot.slane %v2487_v2, 4  ;;  %v2586_v8 = vrot.slane %v2488_v10, 4 }
 0x281   :  { %v2820_v34 = vpack.c.bf16 %v2567_v1, %v2567_v1  ;;  %v2821_v37 = vpack.c.bf16 %v2573_v15, %v2573_v15 }
 0x282   :  { %v3076_v48 = vsel %vm288_vm1, %v3019_v24, %v3016_v44  ;;  %v2577_v26 = vadd.f32 %v2576_v19, %v2575_v38  ;;  %v2581_v20 = vadd.f32 %v2580_v29, %v2487_v2  ;;  %v2587_v60 = vadd.f32 %v2586_v8, %v2488_v10  ;;  %v4919_v2 = vld [vmem:[%s7721_s8 + $0x98] sm:$0xf0] }
 0x283   :  { %v3020_v6 = vunpack.c.l.b16 %v2820_v34  ;;  %v3021_v18 = vunpack.c.l.b16 %v2821_v37  ;;  %v4487_v19 = vor.u32 %v4919_v2, %v4486_v57  ;;  %v952_v2 = vadd.f32 %v6095_v56, %v6875_v35 }
 0x284   :  { %v2578_v11 = vrot.slane %v2577_v26, 1  ;;  %v2582_v46 = vrot.slane %v2581_v20, 2  ;;  %v2439_v63 = vpop.f32.mrf.mxu2  ;;  %v2588_v13 = vrot.slane %v2587_v60, 2 }
 0x285   :  { %v3063_v62 = vsel %vm290_vm2, %v3020_v6, %v3062_v4  ;;  %v2489_v31 = vmul.f32 %v2439_v63, %v1045_v27  ;;  %v3070_v51 = vsel %vm290_vm2, %v3021_v18, %v3069_v9  ;;  %v2312_v23 = vpop.f32.mrf.mxu0  ;;  %v2377_v38 = vpop.f32.mrf.mxu1  ;;  %3495 = vmatpush.bf16.msrb.mxu3 %v4487_v19 }
 0x286   :  { %v2579_v0 = vadd.f32 %v2578_v11, %v2577_v26  ;;  %v2583_v47 = vadd.f32 %v2582_v46, %v2581_v20  ;;  %v2589_v44 = vadd.f32 %v2588_v13, %v2587_v60  ;;  %v2490_v10 = vmul.f32 %v2312_v23, %v950_v21 }
 0x287   :  { %v2592_v1 = vrot.slane %v2489_v31, 4  ;;  %v2491_v4 = vmul.f32 %v2377_v38, %v999_v14  ;;  %v1048_v60 = vadd.f32 %v6510_v39, %v6888_v45 }
 0x288   :  { %v2822_v24 = vpack.c.bf16 %v2579_v0, %v2579_v0  ;;  %v2584_v15 = vrot.slane %v2583_v47, 1  ;;  %v2590_v9 = vrot.slane %v2589_v44, 1  ;;  %v2598_v34 = vrot.slane %v2490_v10, 4 }
 0x289   :  { %v2593_v29 = vadd.f32 %v2592_v1, %v2489_v31  ;;  %v2604_v8 = vrot.slane %v2491_v4, 4 }
 0x28a   :  { %v3022_v37 = vunpack.c.l.b16 %v2822_v24  ;;  %v2585_v26 = vadd.f32 %v2584_v15, %v2583_v47  ;;  %v2591_v20 = vadd.f32 %v2590_v9, %v2589_v44  ;;  %v2599_v6 = vadd.f32 %v2598_v34, %v2490_v10 }
 0x28b   :  { %v2594_v27 = vrot.slane %v2593_v29, 2  ;;  %v2605_v18 = vadd.f32 %v2604_v8, %v2491_v4  ;;  %v1001_v24 = vadd.f32 %v6118_v25, %v6877_v40 }
 0x28c   :  { %v3077_v11 = vsel %vm290_vm2, %v3022_v37, %v3076_v48  ;;  %v2823_v14 = vpack.c.bf16 %v2585_v26, %v2585_v26  ;;  %v2824_v46 = vpack.c.bf16 %v2591_v20, %v2591_v20  ;;  %v2600_v53 = vrot.slane %v2599_v6, 2  ;;  %v2442_v13 = vpop.f32.mrf.mxu2 }
 0x28d   :  { %v2595_v63 = vadd.f32 %v2594_v27, %v2593_v29  ;;  %v2606_v21 = vrot.slane %v2605_v18, 2  ;;  %v2492_v0 = vmul.f32 %v2442_v13, %v1048_v60 }
 0x28e   :  { %v3023_v31 = vunpack.c.l.b16 %v2823_v14  ;;  %v3024_v23 = vunpack.c.l.b16 %v2824_v46  ;;  %v2601_v38 = vadd.f32 %v2600_v53, %v2599_v6  ;;  %v4474_v14 = vld [vmem:[%s7721_s8 + $0x78] sm:$0xf]  ;;  %v4916_v46 = vld [vmem:[%s7721_s8 + $0x80] sm:$0xf0] }
 0x28f   :  { %v2596_v47 = vrot.slane %v2595_v63, 1  ;;  %v2607_v57 = vadd.f32 %v2606_v21, %v2605_v18  ;;  %v2610_v39 = vrot.slane %v2492_v0, 4  ;;  %v1004_v18 = vadd.f32 %v6135_v50, %v6877_v40 }
 0x290   :  { %v3064_v44 = vsel %vm292_vm3, %v3023_v31, %v3063_v62  ;;  %v3071_v48 = vsel %vm292_vm3, %v3024_v23, %v3070_v51  ;;  %v2602_v10 = vrot.slane %v2601_v38, 1  ;;  %v2315_v19 = vpop.f32.mrf.mxu0  ;;  %v2380_v9 = vpop.f32.mrf.mxu1  ;;  %v955_v51 = vadd.f32 %v6113_v12, %v6875_v35 }
 0x291   :  { %v2597_v1 = vadd.f32 %v2596_v47, %v2595_v63  ;;  %v2608_v4 = vrot.slane %v2607_v57, 1  ;;  %v2611_v15 = vadd.f32 %v2610_v39, %v2492_v0  ;;  %v2493_v37 = vmul.f32 %v2315_v19, %v952_v2 }
 0x292   :  { %v2603_v34 = vadd.f32 %v2602_v10, %v2601_v38  ;;  %v2494_v56 = vmul.f32 %v2380_v9, %v1001_v24  ;;  %v1050_v12 = vadd.f32 %v6550_v16, %v6888_v45  ;;  %v4475_v0 = vor.u32 %v4916_v46, %v4474_v14 }
 0x293   :  { %v2825_v29 = vpack.c.bf16 %v2597_v1, %v2597_v1  ;;  %v2609_v8 = vadd.f32 %v2608_v4, %v2607_v57  ;;  %v2612_v26 = vrot.slane %v2611_v15, 2  ;;  %v2616_v6 = vrot.slane %v2493_v37, 4 }
 0x294   :  { %v2826_v62 = vpack.c.bf16 %v2603_v34, %v2603_v34  ;;  %v2622_v60 = vrot.slane %v2494_v56, 4  ;;  %v1006_v23 = vadd.f32 %v6154_v3, %v6877_v40  ;;  %3496 = vmatpush.bf16.msrb.mxu3 %v4475_v0  ;;  %v6968_v24 = vadd.f32 %v6175_v32, %v6877_v40 }
 0x295   :  { %v3025_v20 = vunpack.c.l.b16 %v2825_v29  ;;  %v2827_v27 = vpack.c.bf16 %v2609_v8, %v2609_v8  ;;  %v2613_v25 = vadd.f32 %v2612_v26, %v2611_v15  ;;  %v2617_v13 = vadd.f32 %v2616_v6, %v2493_v37 }
 0x296   :  { %v3026_v53 = vunpack.c.l.b16 %v2826_v62  ;;  %v2623_v50 = vadd.f32 %v2622_v60, %v2494_v56  ;;  %v6976_v29 = vadd.f32 %v6206_v49, %v6877_v40  ;;  %v6980_v32 = vadd.f32 %v6151_v7, %v6875_v35 }
 0x297   :  { %v3078_v63 = vsel %vm292_vm3, %v3025_v20, %v3077_v11  ;;  %v3027_v21 = vunpack.c.l.b16 %v2827_v27  ;;  %v2614_v31 = vrot.slane %v2613_v25, 1  ;;  %v2618_v57 = vrot.slane %v2617_v13, 2  ;;  %v2445_v2 = vpop.f32.mrf.mxu2 }
 0x298   :  { %v3065_v47 = vsel %vm294_vm4, %v3026_v53, %v3064_v44  ;;  %v957_v11 = vadd.f32 %v6124_v28, %v6875_v35  ;;  %v2624_v1 = vrot.slane %v2623_v50, 2  ;;  %v2495_v10 = vmul.f32 %v2445_v2, %v1050_v12  ;;  %v2318_v4 = vpop.f32.mrf.mxu0  ;;  %v2383_v16 = vpop.f32.mrf.mxu1 }
 0x299   :  { %v3072_v38 = vsel %vm294_vm4, %v3027_v21, %v3071_v48  ;;  %v2615_v39 = vadd.f32 %v2614_v31, %v2613_v25  ;;  %v2619_v3 = vadd.f32 %v2618_v57, %v2617_v13  ;;  %v2496_v15 = vmul.f32 %v2318_v4, %v955_v51 }
 0x29a   :  { %v2497_v44 = vmul.f32 %v2383_v16, %v1004_v18  ;;  %v6972_v48 = vadd.f32 %v6139_v61, %v6875_v35  ;;  %v2625_v9 = vadd.f32 %v2624_v1, %v2623_v50  ;;  %v2628_v28 = vrot.slane %v2495_v10, 4 }
 0x29b   :  { %v2828_v19 = vpack.c.bf16 %v2615_v39, %v2615_v39  ;;  %v2620_v34 = vrot.slane %v2619_v3, 1  ;;  %v2634_v8 = vrot.slane %v2496_v15, 4  ;;  %v6984_v61 = vadd.f32 %v6239_v30, %v6877_v40 }
 0x29c   :  { %v2640_v37 = vrot.slane %v2497_v44, 4  ;;  %v2626_v56 = vrot.slane %v2625_v9, 1  ;;  %v2629_v20 = vadd.f32 %v2628_v28, %v2495_v10  ;;  %v1053_v49 = vadd.f32 %v6583_v52, %v6888_v45 }
 0x29d   :  { %v3028_v26 = vunpack.c.l.b16 %v2828_v19  ;;  %v2621_v62 = vadd.f32 %v2620_v34, %v2619_v3  ;;  %v2635_v27 = vadd.f32 %v2634_v8, %v2496_v15  ;;  %v6991_v7 = vadd.f32 %v6166_v42, %v6875_v35 }
 0x29e   :  { %v2641_v6 = vadd.f32 %v2640_v37, %v2497_v44  ;;  %v2627_v18 = vadd.f32 %v2626_v56, %v2625_v9  ;;  %v2630_v25 = vrot.slane %v2629_v20, 2  ;;  %v6995_v30 = vadd.f32 %v6273_v59, %v6877_v40 }
 0x29f   :  { %v3079_v51 = vsel %vm294_vm4, %v3028_v26, %v3078_v63  ;;  %v2829_v60 = vpack.c.bf16 %v2621_v62, %v2621_v62  ;;  %v2636_v14 = vrot.slane %v2635_v27, 2  ;;  %v2448_v53 = vpop.f32.mrf.mxu2  ;;  %v7001_v9 = vadd.f32 %v6192_v33, %v6875_v35  ;;  %v4913_v26 = vld [vmem:[%s7721_s8 + $0x68] sm:$0xf0] }
 0x2a0   :  { %v2642_v46 = vrot.slane %v2641_v6, 2  ;;  %v2830_v21 = vpack.c.bf16 %v2627_v18, %v2627_v18  ;;  %v2631_v13 = vadd.f32 %v2630_v25, %v2629_v20  ;;  %v2498_v12 = vmul.f32 %v2448_v53, %v1053_v49 }
 0x2a1   :  { %v2321_v52 = vpop.f32.mrf.mxu0  ;;  %v2386_v31 = vpop.f32.mrf.mxu1  ;;  %v3029_v63 = vunpack.c.l.b16 %v2829_v60  ;;  %v2637_v50 = vadd.f32 %v2636_v14, %v2635_v27  ;;  %v7013_v25 = vadd.f32 %v6298_v36, %v6877_v40 }
 0x2a2   :  { %v2643_v0 = vadd.f32 %v2642_v46, %v2641_v6  ;;  %v2499_v57 = vmul.f32 %v2321_v52, %v957_v11  ;;  %v3030_v2 = vunpack.c.l.b16 %v2830_v21  ;;  %v2632_v42 = vrot.slane %v2631_v13, 1 }
 0x2a3   :  { %v2646_v39 = vrot.slane %v2498_v12, 4  ;;  %v2500_v1 = vmul.f32 %v2386_v31, %v1006_v23  ;;  %v3066_v10 = vsel %vm296_vm5, %v3029_v63, %v3065_v47  ;;  %v2638_v4 = vrot.slane %v2637_v50, 1 }
 0x2a4   :  { %v2644_v16 = vrot.slane %v2643_v0, 1  ;;  %v2652_v3 = vrot.slane %v2499_v57, 4  ;;  %v3073_v59 = vsel %vm296_vm5, %v3030_v2, %v3072_v38  ;;  %v2633_v15 = vadd.f32 %v2632_v42, %v2631_v13  ;;  %v4462_v38 = vld [vmem:[%s7721_s8 + $0x60] sm:$0xf] }
 0x2a5   :  { %v2647_v44 = vadd.f32 %v2646_v39, %v2498_v12  ;;  %v2658_v19 = vrot.slane %v2500_v1, 4  ;;  %v2639_v28 = vadd.f32 %v2638_v4, %v2637_v50  ;;  %v1055_v23 = vadd.f32 %v6613_v55, %v6888_v45 }
 0x2a6   :  { %v2645_v11 = vadd.f32 %v2644_v16, %v2643_v0  ;;  %v2653_v34 = vadd.f32 %v2652_v3, %v2499_v57  ;;  %v2831_v8 = vpack.c.bf16 %v2633_v15, %v2633_v15  ;;  %v4463_v27 = vor.u32 %v4913_v26, %v4462_v38 }
 0x2a7   :  { %v2648_v47 = vrot.slane %v2647_v44, 2  ;;  %v2659_v37 = vadd.f32 %v2658_v19, %v2500_v1  ;;  %v2832_v56 = vpack.c.bf16 %v2639_v28, %v2639_v28  ;;  %v7026_v1 = vadd.f32 %v6322_v43, %v6877_v40 }
 0x2a8   :  { %v2833_v33 = vpack.c.bf16 %v2645_v11, %v2645_v11  ;;  %v2654_v20 = vrot.slane %v2653_v34, 2  ;;  %v2451_v62 = vpop.f32.mrf.mxu2  ;;  %v3031_v6 = vunpack.c.l.b16 %v2831_v8  ;;  %3497 = vmatpush.bf16.msrb.mxu3 %v4463_v27 }
 0x2a9   :  { %v2649_v49 = vadd.f32 %v2648_v47, %v2647_v44  ;;  %v2660_v18 = vrot.slane %v2659_v37, 2  ;;  %v2501_v55 = vmul.f32 %v2451_v62, %v1055_v23  ;;  %v3032_v60 = vunpack.c.l.b16 %v2832_v56  ;;  %v7908_v23 = vld [vmem:[#allocation20_spill] sm:$0xff] }
 0x2aa   :  { %v3033_v14 = vunpack.c.l.b16 %v2833_v33  ;;  %v2655_v46 = vadd.f32 %v2654_v20, %v2653_v34  ;;  %v3080_v53 = vsel %vm296_vm5, %v3031_v6, %v3079_v51  ;;  %v2324_v52 = vpop.f32.mrf.mxu0  ;;  %v2389_v31 = vpop.f32.mrf.mxu1  ;;  %v7022_v51 = vadd.f32 %v6217_v5, %v6875_v35 }
 0x2ab   :  { %v2650_v21 = vrot.slane %v2649_v49, 1  ;;  %v2661_v13 = vadd.f32 %v2660_v18, %v2659_v37  ;;  %v2664_v12 = vrot.slane %v2501_v55, 4  ;;  %v3067_v63 = vsel %vm298_vm6, %v3032_v60, %v3066_v10 }
 0x2ac   :  { %v3074_v50 = vsel %vm298_vm6, %v3033_v14, %v3073_v59  ;;  %v2656_v0 = vrot.slane %v2655_v46, 1  ;;  %v2502_v57 = vmul.f32 %v2324_v52, %v6972_v48  ;;  %v2503_v39 = vmul.f32 %v2389_v31, %v6968_v24  ;;  %v7907_v24 = vld [vmem:[#allocation13_spill] sm:$0xff] }
 0x2ad   :  { %v2651_v36 = vadd.f32 %v2650_v21, %v2649_v49  ;;  %v2662_v2 = vrot.slane %v2661_v13, 1  ;;  %v2665_v42 = vadd.f32 %v2664_v12, %v2501_v55  ;;  %v7030_v48 = vadd.f32 %v6243_v17, %v6875_v35 }
 0x2ae   :  { %v2657_v4 = vadd.f32 %v2656_v0, %v2655_v46  ;;  %v2670_v10 = vrot.slane %v2502_v57, 4  ;;  %v2676_v15 = vrot.slane %v2503_v39, 4  ;;  %v7034_v44 = vadd.f32 %v7907_v24, %v6877_v40 }
 0x2af   :  { %v2834_v16 = vpack.c.bf16 %v2651_v36, %v2651_v36  ;;  %v2663_v3 = vadd.f32 %v2662_v2, %v2661_v13  ;;  %v2666_v59 = vrot.slane %v2665_v42, 2  ;;  %v7038_v8 = vadd.f32 %v7908_v23, %v6875_v35  ;;  %v7910_v13 = vld [vmem:[#allocation14_spill] sm:$0xff] }
 0x2b0   :  { %v2835_v5 = vpack.c.bf16 %v2657_v4, %v2657_v4  ;;  %v2671_v19 = vadd.f32 %v2670_v10, %v2502_v57  ;;  %v2677_v34 = vadd.f32 %v2676_v15, %v2503_v39  ;;  %v1058_v47 = vadd.f32 %v6652_v54, %v6888_v45  ;;  %v4946_v4 = vld [vmem:[%s7721_s8 + $0x170] sm:$0xf0] }
 0x2b1   :  { %v3034_v28 = vunpack.c.l.b16 %v2834_v16  ;;  %v2836_v11 = vpack.c.bf16 %v2663_v3, %v2663_v3  ;;  %v2667_v43 = vadd.f32 %v2666_v59, %v2665_v42  ;;  %v2454_v38 = vpop.f32.mrf.mxu2  ;;  %v7057_v12 = vadd.f32 %v7910_v13, %v6877_v40  ;;  %v4594_v40 = vld [vmem:[%s7721_s8 + $0x168] sm:$0xf]  ;;  %v4910_v42 = vld [vmem:[%s7721_s8 + $0x50] sm:$0xf0] }
 0x2b2   :  { %v3035_v37 = vunpack.c.l.b16 %v2835_v5  ;;  %v2672_v17 = vrot.slane %v2671_v19, 2  ;;  %v2678_v20 = vrot.slane %v2677_v34, 2  ;;  %v2327_v62 = vpop.f32.mrf.mxu0  ;;  %v2392_v27 = vpop.f32.mrf.mxu1  ;;  %v2504_v18 = vmul.f32 %v2454_v38, %v1058_v47 }
 0x2b3   :  { %v3081_v26 = vsel %vm298_vm6, %v3034_v28, %v3080_v53  ;;  %v3036_v56 = vunpack.c.l.b16 %v2836_v11  ;;  %v2668_v33 = vrot.slane %v2667_v43, 1  ;;  %v2505_v55 = vmul.f32 %v2327_v62, %v6980_v32  ;;  %v7909_v53 = vld [vmem:[#allocation15_spill] sm:$0xff]  ;;  %v4921_v32 = vld [vmem:[%s7721_s8 + $0xac] sm:$0xf] }
 0x2b4   :  { %v7044_v6 = vsel %vm300_vm7, %v3035_v37, %v3067_v63  ;;  %v2673_v49 = vadd.f32 %v2672_v17, %v2671_v19  ;;  %v2679_v14 = vadd.f32 %v2678_v20, %v2677_v34  ;;  %v2506_v46 = vmul.f32 %v2392_v27, %v6976_v29  ;;  %v7911_v28 = vld [vmem:[#allocation18_spill] sm:$0xff]  ;;  %v4943_v17 = vld [vmem:[%s7721_s8 + $0x158] sm:$0xf0]  ;;  %v4970_v62 = vld [vmem:[%s7721_s8 + $0x230] sm:$0xf0] }
 0x2b5   :  { %v7048_v60 = vsel %vm300_vm7, %v3036_v56, %v3074_v50  ;;  %v2669_v54 = vadd.f32 %v2668_v33, %v2667_v43  ;;  %v7053_v21 = vadd.f32 %v7909_v53, %v6875_v35  ;;  %v2682_v52 = vrot.slane %v2504_v18, 4  ;;  %v4500_v35 = vld [vmem:[%s7721_s8 + $0xb4] sm:$0xf0]  ;;  %v4918_v27 = vld [vmem:[%s7721_s8 + $0x94] sm:$0xf] }
 0x2b6   :  { %v2688_v31 = vrot.slane %v2505_v55, 4  ;;  %v1060_v63 = vadd.f32 %v6693_v41, %v6888_v45  ;;  %v2674_v0 = vrot.slane %v2673_v49, 1  ;;  %v2694_v29 = vrot.slane %v2506_v46, 4  ;;  %v4450_v41 = vld [vmem:[%s7721_s8 + $0x48] sm:$0xf] }
 0x2b7   :  { %v2837_v50 = vpack.c.bf16 %v2669_v54, %v2669_v54  ;;  %v7072_v57 = vadd.f32 %v6736_v58, %v6888_v45  ;;  %v2683_v36 = vadd.f32 %v2682_v52, %v2504_v18  ;;  %v4503_v39 = vor.u32 %v4921_v32, %v4500_v35  ;;  %v7912_v35 = vld [vmem:[#allocation16_spill] sm:$0xff] }
 0x2b8   :  { %v2689_v2 = vadd.f32 %v2688_v31, %v2505_v55  ;;  %v2680_v16 = vrot.slane %v2679_v14, 1  ;;  %v2695_v3 = vadd.f32 %v2694_v29, %v2506_v46  ;;  %v4451_v58 = vor.u32 %v4910_v42, %v4450_v41  ;;  %v4438_v46 = vld [vmem:[%s7721_s8 + $0x30] sm:$0xf]  ;;  %v4940_v29 = vld [vmem:[%s7721_s8 + $0x140] sm:$0xf0] }
 0x2b9   :  { %v3037_v10 = vunpack.c.l.b16 %v2837_v50  ;;  %v7085_v59 = vadd.f32 %v6772_v22, %v6888_v45  ;;  %v2684_v15 = vrot.slane %v2683_v36, 2  ;;  %v2457_v5 = vpop.f32.mrf.mxu2  ;;  %3536 = vmatpush.bf16.msrb.mxu2 %v4503_v39  ;;  %v4595_v19 = vor.u32 %v4946_v4, %v4594_v40  ;;  %v4582_v22 = vld [vmem:[%s7721_s8 + $0x150] sm:$0xf] }
 0x2ba   :  { %v2690_v24 = vrot.slane %v2689_v2, 2  ;;  %v7089_v11 = vadd.f32 %v7911_v28, %v6888_v45  ;;  %v2696_v34 = vrot.slane %v2695_v3, 2  ;;  %v2507_v23 = vmul.f32 %v2457_v5, %v1060_v63  ;;  %v2330_v47 = vpop.f32.mrf.mxu0  ;;  %v2395_v37 = vpop.f32.mrf.mxu1  ;;  %3498 = vmatpush.bf16.msrb.mxu3 %v4451_v58 }
 0x2bb   :  { %v7092_v43 = vsel %vm300_vm7, %v3037_v10, %v3081_v26  ;;  %v2675_v38 = vadd.f32 %v2674_v0, %v2673_v49  ;;  %v2685_v56 = vadd.f32 %v2684_v15, %v2683_v36  ;;  %v2508_v20 = vmul.f32 %v2330_v47, %v6991_v7  ;;  %v4690_v26 = vld [vmem:[%s7721_s8 + $0x228] sm:$0xf]  ;;  %3508 = vmatpush.bf16.msrb.mxu0 %v4595_v19  ;;  %v4488_v7 = vld [vmem:[%s7721_s8 + $0x9c] sm:$0xf0]  ;;  %v4570_v0 = vld [vmem:[%s7721_s8 + $0x138] sm:$0xf] }
 0x2bc   :  { %v2691_v33 = vadd.f32 %v2690_v24, %v2689_v2  ;;  %v2681_v18 = vadd.f32 %v2680_v16, %v2679_v14  ;;  %v2697_v55 = vadd.f32 %v2696_v34, %v2695_v3  ;;  %v2700_v49 = vrot.slane %v2507_v23, 4  ;;  %v4907_v14 = vld [vmem:[%s7721_s8 + $0x38] sm:$0xf0] }
 0x2bd   :  { %v2509_v54 = vmul.f32 %v2395_v37, %v6984_v61  ;;  %v2686_v53 = vrot.slane %v2685_v56, 1  ;;  %v2706_v52 = vrot.slane %v2508_v20, 4  ;;  %v4691_v31 = vor.u32 %v4970_v62, %v4690_v26  ;;  %v7913_v37 = vld [vmem:[#allocation17_spill] sm:$0xff] }
 0x2be   :  { %v2692_v13 = vrot.slane %v2691_v33, 1  ;;  %v2698_v32 = vrot.slane %v2697_v55, 1  ;;  %v2701_v63 = vadd.f32 %v2700_v49, %v2507_v23  ;;  %v4583_v61 = vor.u32 %v4943_v17, %v4582_v22  ;;  %v7914_v17 = vld [vmem:[#allocation44_spill] sm:$0xff] }
 0x2bf   :  { %v2712_v50 = vrot.slane %v2509_v54, 4  ;;  %v7128_v40 = vadd.f32 %v7912_v35, %v6888_v45  ;;  %v2838_v36 = vpack.c.bf16 %v2675_v38, %v2675_v38  ;;  %v2707_v2 = vadd.f32 %v2706_v52, %v2508_v20  ;;  %3522 = vmatpush.bf16.msrb.mxu1 %v4691_v31  ;;  %v4678_v31 = vld [vmem:[%s7721_s8 + $0x210] sm:$0xf] }
 0x2c0   :  { %v4491_v41 = vor.u32 %v4918_v27, %v4488_v7  ;;  %v2699_v42 = vadd.f32 %v2698_v32, %v2697_v55  ;;  %v2702_v39 = vrot.slane %v2701_v63, 2  ;;  %3509 = vmatpush.bf16.msrb.mxu0 %v4583_v61  ;;  %v4439_v10 = vor.u32 %v4907_v14, %v4438_v46  ;;  %v4904_v7 = vld [vmem:[%s7721_s8 + $0x20] sm:$0xf0] }
 0x2c1   :  { %v2713_v4 = vadd.f32 %v2712_v50, %v2509_v54  ;;  %v2839_v16 = vpack.c.bf16 %v2681_v18, %v2681_v18  ;;  %v2687_v3 = vadd.f32 %v2686_v53, %v2685_v56  ;;  %v2708_v58 = vrot.slane %v2707_v2, 2  ;;  %v2460_v15 = vpop.f32.mrf.mxu2  ;;  %v4476_v18 = vld [vmem:[%s7721_s8 + $0x84] sm:$0xf0] }
 0x2c2   :  { %3537 = vmatpush.bf16.msrb.mxu2 %v4491_v41  ;;  %v4571_v24 = vor.u32 %v4940_v29, %v4570_v0  ;;  %v2693_v5 = vadd.f32 %v2692_v13, %v2691_v33  ;;  %v2703_v19 = vadd.f32 %v2702_v39, %v2701_v63  ;;  %v2510_v34 = vmul.f32 %v2460_v15, %v7072_v57  ;;  %v2333_v23 = vpop.f32.mrf.mxu0  ;;  %v2398_v47 = vpop.f32.mrf.mxu1  ;;  %v4915_v57 = vld [vmem:[%s7721_s8 + $0x7c] sm:$0xf] }
 0x2c3   :  { %v2714_v28 = vrot.slane %v2713_v4, 2  ;;  %3499 = vmatpush.bf16.msrb.mxu3 %v4439_v10  ;;  %v7133_v22 = vadd.f32 %v7913_v37, %v6888_v45  ;;  %v7137_v38 = vadd.f32 %v7914_v17, %v6888_v45  ;;  %v7139_v56 = vunpack.c.l.b16 %v2838_v36  ;;  %v4558_v17 = vld [vmem:[%s7721_s8 + $0x120] sm:$0xf] }
 0x2c4   :  { %v2511_v20 = vmul.f32 %v2333_v23, %v7001_v9  ;;  %v2842_v33 = vpack.c.bf16 %v2699_v42, %v2699_v42  ;;  %v2704_v26 = vrot.slane %v2703_v19, 1  ;;  %v2718_v27 = vrot.slane %v2510_v34, 4  ;;  %3510 = vmatpush.bf16.msrb.mxu0 %v4571_v24  ;;  %v4426_v9 = vld [vmem:[%s7721_s8 + $0x18] sm:$0xf] }
 0x2c5   :  { %v2715_v62 = vadd.f32 %v2714_v28, %v2713_v4  ;;  %v3039_v55 = vunpack.c.l.b16 %v2839_v16  ;;  %v2709_v45 = vadd.f32 %v2708_v58, %v2707_v2  ;;  %v2512_v54 = vmul.f32 %v2398_v47, %v6995_v30  ;;  %v4967_v30 = vld [vmem:[%s7721_s8 + $0x218] sm:$0xf0] }
 0x2c6   :  { %v2724_v49 = vrot.slane %v2511_v20, 4  ;;  %v2840_v46 = vpack.c.bf16 %v2687_v3, %v2687_v3  ;;  %v2841_v53 = vpack.c.bf16 %v2693_v5, %v2693_v5  ;;  %v2719_v52 = vadd.f32 %v2718_v27, %v2510_v34  ;;  %v4464_v27 = vld [vmem:[%s7721_s8 + $0x6c] sm:$0xf0] }
 0x2c7   :  { %v2716_v13 = vrot.slane %v2715_v62, 1  ;;  %v2705_v14 = vadd.f32 %v2704_v26, %v2703_v19  ;;  %v2730_v63 = vrot.slane %v2512_v54, 4  ;;  %v4479_v50 = vor.u32 %v4915_v57, %v4476_v18 }
 0x2c8   :  { %v2725_v32 = vadd.f32 %v2724_v49, %v2511_v20  ;;  %v3042_v61 = vunpack.c.l.b16 %v2842_v33  ;;  %v2720_v29 = vrot.slane %v2719_v52, 2  ;;  %v4427_v35 = vor.u32 %v4904_v7, %v4426_v9 }
 0x2c9   :  { %v2717_v0 = vadd.f32 %v2716_v13, %v2715_v62  ;;  %v2710_v36 = vrot.slane %v2709_v45, 1  ;;  %v2731_v41 = vadd.f32 %v2730_v63, %v2512_v54  ;;  %v2463_v42 = vpop.f32.mrf.mxu2  ;;  %3538 = vmatpush.bf16.msrb.mxu2 %v4479_v50  ;;  %v4679_v39 = vor.u32 %v4967_v30, %v4678_v31  ;;  %v4901_v54 = vld [vmem:[%s7721_s8 + $0x8] sm:$0xf0] }
 0x2ca   :  { %v2726_v2 = vrot.slane %v2725_v32, 2  ;;  %v3040_v4 = vunpack.c.l.b16 %v2840_v46  ;;  %v2721_v16 = vadd.f32 %v2720_v29, %v2719_v52  ;;  %v2513_v3 = vmul.f32 %v2463_v42, %v7085_v59  ;;  %v2336_v58 = vpop.f32.mrf.mxu0  ;;  %v2401_v15 = vpop.f32.mrf.mxu1  ;;  %3500 = vmatpush.bf16.msrb.mxu3 %v4427_v35  ;;  %v4937_v59 = vld [vmem:[%s7721_s8 + $0x128] sm:$0xf0] }
 0x2cb   :  { %v2845_v10 = vpack.c.bf16 %v2717_v0, %v2717_v0  ;;  %v3041_v24 = vunpack.c.l.b16 %v2841_v53  ;;  %v2843_v5 = vpack.c.bf16 %v2705_v14, %v2705_v14  ;;  %v2732_v19 = vrot.slane %v2731_v41, 2  ;;  %3523 = vmatpush.bf16.msrb.mxu1 %v4679_v39 }
 0x2cc   :  { %v2514_v28 = vmul.f32 %v2336_v58, %v7022_v51  ;;  %v3090_v34 = vsel %vm288_vm1, %v3042_v61, %v3039_v55  ;;  %v2722_v47 = vrot.slane %v2721_v16, 1  ;;  %v2736_v37 = vrot.slane %v2513_v3, 4  ;;  %v4912_v51 = vld [vmem:[%s7721_s8 + $0x64] sm:$0xf] }
 0x2cd   :  { %v3045_v23 = vunpack.c.l.b16 %v2845_v10  ;;  %v7170_v20 = vadd.f32 %v2710_v36, %v2709_v45  ;;  %v2727_v33 = vadd.f32 %v2726_v2, %v2725_v32  ;;  %v2733_v26 = vadd.f32 %v2732_v19, %v2731_v41  ;;  %v4414_v45 = vld [vmem:[%s7721_s8] sm:$0xf] }
 0x2ce   :  { %v2742_v62 = vrot.slane %v2514_v28, 4  ;;  %v2723_v18 = vadd.f32 %v2722_v47, %v2721_v16  ;;  %v2737_v55 = vadd.f32 %v2736_v37, %v2513_v3  ;;  %v2515_v49 = vmul.f32 %v2401_v15, %v7013_v25  ;;  %v4666_v16 = vld [vmem:[%s7721_s8 + $0x1f8] sm:$0xf] }
 0x2cf   :  { %v7179_v57 = vsel %vm290_vm2, %v3045_v23, %v3090_v34  ;;  %v3043_v9 = vunpack.c.l.b16 %v2843_v5  ;;  %v2734_v7 = vrot.slane %v2733_v26, 1  ;;  %v4559_v53 = vor.u32 %v4937_v59, %v4558_v17  ;;  %v4964_v5 = vld [vmem:[%s7721_s8 + $0x200] sm:$0xf0]  ;;  %v4945_v34 = vld [vmem:[%s7721_s8 + $0x16c] sm:$0xf] }
 0x2d0   :  { %v2743_v46 = vadd.f32 %v2742_v62, %v2514_v28  ;;  %v2846_v13 = vpack.c.bf16 %v2723_v18, %v2723_v18  ;;  %v2738_v52 = vrot.slane %v2737_v55, 2  ;;  %v2748_v31 = vrot.slane %v2515_v49, 4  ;;  %v4596_v59 = vld [vmem:[%s7721_s8 + $0x174] sm:$0xf0] }
 0x2d1   :  { %v4467_v30 = vor.u32 %v4912_v51, %v4464_v27  ;;  %v2728_v14 = vrot.slane %v2727_v33, 1  ;;  %v2735_v32 = vadd.f32 %v2734_v7, %v2733_v26  ;;  %v2466_v25 = vpop.f32.mrf.mxu2  ;;  %3511 = vmatpush.bf16.msrb.mxu0 %v4559_v53  ;;  %v4415_v50 = vor.u32 %v4901_v54, %v4414_v45 }
 0x2d2   :  { %v2744_v63 = vrot.slane %v2743_v46, 2  ;;  %v3046_v61 = vunpack.c.l.b16 %v2846_v13  ;;  %v2739_v0 = vadd.f32 %v2738_v52, %v2737_v55  ;;  %v2749_v29 = vadd.f32 %v2748_v31, %v2515_v49  ;;  %v2339_v36 = vpop.f32.mrf.mxu0  ;;  %v2404_v2 = vpop.f32.mrf.mxu1 }
 0x2d3   :  { %v2516_v35 = vmul.f32 %v2466_v25, %v7089_v11  ;;  %3539 = vmatpush.bf16.msrb.mxu2 %v4467_v30  ;;  %v3097_v41 = vsel %vm288_vm1, %v3043_v9, %v3040_v4  ;;  %v2848_v42 = vpack.c.bf16 %v2735_v32, %v2735_v32  ;;  %v2517_v10 = vmul.f32 %v2339_v36, %v7030_v48 }
 0x2d4   :  { %v2745_v39 = vadd.f32 %v2744_v63, %v2743_v46  ;;  %3501 = vmatpush.bf16.msrb.mxu3 %v4415_v50  ;;  %v7195_v3 = vsel %vm290_vm2, %v3046_v61, %v3097_v41  ;;  %v2740_v58 = vrot.slane %v2739_v0, 1  ;;  %v2750_v15 = vrot.slane %v2749_v29, 2 }
 0x2d5   :  { %v2754_v11 = vrot.slane %v2516_v35, 4  ;;  %v7202_v4 = vsel %vm288_vm1, %v3041_v24, %v7139_v56  ;;  %v7204_v48 = vadd.f32 %v2728_v14, %v2727_v33  ;;  %v2760_v28 = vrot.slane %v2517_v10, 4  ;;  %v4546_v56 = vld [vmem:[%s7721_s8 + $0x108] sm:$0xf]  ;;  %v4934_v24 = vld [vmem:[%s7721_s8 + $0x110] sm:$0xf0] }
 0x2d6   :  { %v2746_v19 = vrot.slane %v2745_v39, 1  ;;  %v2741_v23 = vadd.f32 %v2740_v58, %v2739_v0  ;;  %v2751_v47 = vadd.f32 %v2750_v15, %v2749_v29  ;;  %v2518_v17 = vmul.f32 %v2404_v2, %v7026_v1  ;;  %v4909_v29 = vld [vmem:[%s7721_s8 + $0x4c] sm:$0xf] }
 0x2d7   :  { %v2755_v37 = vadd.f32 %v2754_v11, %v2516_v35  ;;  %v2844_v33 = vpack.c.bf16 %v7170_v20, %v7170_v20  ;;  %v3048_v26 = vunpack.c.l.b16 %v2848_v42  ;;  %v2761_v62 = vadd.f32 %v2760_v28, %v2517_v10  ;;  %v4452_v35 = vld [vmem:[%s7721_s8 + $0x54] sm:$0xf0]  ;;  %v4654_v10 = vld [vmem:[%s7721_s8 + $0x1e0] sm:$0xf] }
 0x2d8   :  { %v4667_v51 = vor.u32 %v4964_v5, %v4666_v16  ;;  %v7221_v27 = vadd.f32 %v2746_v19, %v2745_v39  ;;  %v2752_v1 = vrot.slane %v2751_v47, 1  ;;  %v2766_v55 = vrot.slane %v2518_v17, 4  ;;  %v4961_v16 = vld [vmem:[%s7721_s8 + $0x1e8] sm:$0xf0] }
 0x2d9   :  { %v2756_v18 = vrot.slane %v2755_v37, 2  ;;  %v2849_v49 = vpack.c.bf16 %v2741_v23, %v2741_v23  ;;  %v2762_v45 = vrot.slane %v2761_v62, 2  ;;  %v2469_v54 = vpop.f32.mrf.mxu2  ;;  %v4599_v9 = vor.u32 %v4945_v34, %v4596_v59 }
 0x2da   :  { %3524 = vmatpush.bf16.msrb.mxu1 %v4667_v51  ;;  %v4547_v7 = vor.u32 %v4934_v24, %v4546_v56  ;;  %v2847_v46 = vpack.c.bf16 %v7204_v48, %v7204_v48  ;;  %v2753_v53 = vadd.f32 %v2752_v1, %v2751_v47  ;;  %v2767_v20 = vadd.f32 %v2766_v55, %v2518_v17  ;;  %v2342_v52 = vpop.f32.mrf.mxu0  ;;  %v2407_v31 = vpop.f32.mrf.mxu1  ;;  %v4942_v48 = vld [vmem:[%s7721_s8 + $0x154] sm:$0xf]  ;;  %v4534_v24 = vld [vmem:[%s7721_s8 + $0xf0] sm:$0xf] }
 0x2db   :  { %v2757_v13 = vadd.f32 %v2756_v18, %v2755_v37  ;;  %v3044_v30 = vunpack.c.l.b16 %v2844_v33  ;;  %v2763_v14 = vadd.f32 %v2762_v45, %v2761_v62  ;;  %v2519_v32 = vmul.f32 %v2469_v54, %v7128_v40  ;;  %3550 = vmatpush.bf16.msra.mxu3 %v4599_v9  ;;  %v4931_v33 = vld [vmem:[%s7721_s8 + $0xf8] sm:$0xf0]  ;;  %v4906_v45 = vld [vmem:[%s7721_s8 + $0x34] sm:$0xf]  ;;  %v4440_v54 = vld [vmem:[%s7721_s8 + $0x3c] sm:$0xf0] }
 0x2dc   :  { %v2520_v63 = vmul.f32 %v2342_v52, %v7038_v8  ;;  %3512 = vmatpush.bf16.msrb.mxu0 %v4547_v7  ;;  %v3092_v25 = vsel %vm292_vm3, %v3048_v26, %v7179_v57  ;;  %v2851_v50 = vpack.c.bf16 %v2753_v53, %v2753_v53  ;;  %v2768_v0 = vrot.slane %v2767_v20, 2 }
 0x2dd   :  { %v2758_v61 = vrot.slane %v2757_v13, 1  ;;  %v3049_v36 = vunpack.c.l.b16 %v2849_v49  ;;  %v2850_v8 = vpack.c.bf16 %v7221_v27, %v7221_v27  ;;  %v2772_v40 = vrot.slane %v2519_v32, 4 }
 0x2de   :  { %v2778_v2 = vrot.slane %v2520_v63, 4  ;;  %v3051_v41 = vunpack.c.l.b16 %v2851_v50  ;;  %v2769_v57 = vadd.f32 %v2768_v0, %v2767_v20  ;;  %v2521_v39 = vmul.f32 %v2407_v31, %v7034_v44  ;;  %v4584_v44 = vld [vmem:[%s7721_s8 + $0x15c] sm:$0xf0] }
 0x2df   :  { %v2759_v42 = vadd.f32 %v2758_v61, %v2757_v13  ;;  %v2764_v58 = vrot.slane %v2763_v14, 1  ;;  %v2773_v15 = vadd.f32 %v2772_v40, %v2519_v32  ;;  %v4455_v5 = vor.u32 %v4909_v29, %v4452_v35  ;;  %v4958_v32 = vld [vmem:[%s7721_s8 + $0x1d0] sm:$0xf0]  ;;  %v4928_v29 = vld [vmem:[%s7721_s8 + $0xe0] sm:$0xf0] }
 0x2e0   :  { %v2779_v11 = vadd.f32 %v2778_v2, %v2520_v63  ;;  %v7251_v19 = vsel %vm294_vm4, %v3051_v41, %v3092_v25  ;;  %v2770_v34 = vrot.slane %v2769_v57, 1  ;;  %v2784_v23 = vrot.slane %v2521_v39, 4  ;;  %v4939_v63 = vld [vmem:[%s7721_s8 + $0x13c] sm:$0xf]  ;;  %v4428_v2 = vld [vmem:[%s7721_s8 + $0x24] sm:$0xf0] }
 0x2e1   :  { %v2852_v28 = vpack.c.bf16 %v2759_v42, %v2759_v42  ;;  %v3047_v47 = vunpack.c.l.b16 %v2847_v46  ;;  %v2774_v37 = vrot.slane %v2773_v15, 2  ;;  %3540 = vmatpush.bf16.msrb.mxu2 %v4455_v5  ;;  %v4655_v59 = vor.u32 %v4961_v16, %v4654_v10  ;;  %v2472_v56 = vpop.f32.mrf.mxu2  ;;  %v4630_v10 = vld [vmem:[%s7721_s8 + $0x1b0] sm:$0xf]  ;;  %v4936_v5 = vld [vmem:[%s7721_s8 + $0x124] sm:$0xf] }
 0x2e2   :  { %v2780_v17 = vrot.slane %v2779_v11, 2  ;;  %v2771_v62 = vadd.f32 %v2770_v34, %v2769_v57  ;;  %v2785_v51 = vadd.f32 %v2784_v23, %v2521_v39  ;;  %v4587_v27 = vor.u32 %v4942_v48, %v4584_v44  ;;  %v2345_v9 = vpop.f32.mrf.mxu0  ;;  %v2410_v13 = vpop.f32.mrf.mxu1  ;;  %v4560_v48 = vld [vmem:[%s7721_s8 + $0x12c] sm:$0xf0] }
 0x2e3   :  { %v3052_v26 = vunpack.c.l.b16 %v2852_v28  ;;  %v3099_v1 = vsel %vm292_vm3, %v3049_v36, %v7195_v3  ;;  %v2765_v18 = vadd.f32 %v2764_v58, %v2763_v14  ;;  %3525 = vmatpush.bf16.msrb.mxu1 %v4655_v59  ;;  %v2522_v49 = vmul.f32 %v2472_v56, %v7133_v22  ;;  %v4642_v22 = vld [vmem:[%s7721_s8 + $0x1c8] sm:$0xf] }
 0x2e4   :  { %v2781_v55 = vadd.f32 %v2780_v17, %v2779_v11  ;;  %v3050_v7 = vunpack.c.l.b16 %v2850_v8  ;;  %v2786_v53 = vrot.slane %v2785_v51, 2  ;;  %3551 = vmatpush.bf16.msra.mxu3 %v4587_v27  ;;  %v4535_v3 = vor.u32 %v4931_v33, %v4534_v24  ;;  %v4900_v17 = vld [vmem:[%s7721_s8 + $0x4] sm:$0xf]  ;;  %v4692_v27 = vld [vmem:[%s7721_s8 + $0x234] sm:$0xf0] }
 0x2e5   :  { %v7269_v46 = vsel %vm294_vm4, %v3052_v26, %v3099_v1  ;;  %v3084_v20 = vsel %vm290_vm2, %v3044_v30, %v7202_v4  ;;  %v2854_v52 = vpack.c.bf16 %v2771_v62, %v2771_v62  ;;  %v2775_v31 = vadd.f32 %v2774_v37, %v2773_v15  ;;  %v4572_v4 = vld [vmem:[%s7721_s8 + $0x144] sm:$0xf0]  ;;  %v4522_v30 = vld [vmem:[%s7721_s8 + $0xd8] sm:$0xf]  ;;  %v4925_v37 = vld [vmem:[%s7721_s8 + $0xc8] sm:$0xf0] }
 0x2e6   :  { %v2790_v14 = vrot.slane %v2522_v49, 4  ;;  %v3085_v25 = vsel %vm292_vm3, %v3047_v47, %v3084_v20  ;;  %v2787_v50 = vadd.f32 %v2786_v53, %v2785_v51  ;;  %3513 = vmatpush.bf16.msrb.mxu0 %v4535_v3  ;;  %v4443_v61 = vor.u32 %v4906_v45, %v4440_v54  ;;  %v4510_v47 = vld [vmem:[%s7721_s8 + $0xc0] sm:$0xf]  ;;  %v4416_v62 = vld [vmem:[%s7721_s8 + $0xc] sm:$0xf0] }
 0x2e7   :  { %v2523_v0 = vmul.f32 %v2345_v9, %v7053_v21  ;;  %v2853_v35 = vpack.c.bf16 %v2765_v18, %v2765_v18  ;;  %v2782_v36 = vrot.slane %v2781_v55, 1  ;;  %v2524_v40 = vmul.f32 %v2410_v13, %v7057_v12  ;;  %v4903_v21 = vld [vmem:[%s7721_s8 + $0x1c] sm:$0xf]  ;;  %v4969_v51 = vld [vmem:[%s7721_s8 + $0x22c] sm:$0xf] }
 0x2e8   :  { %v2791_v8 = vadd.f32 %v2790_v14, %v2522_v49  ;;  %v7301_v41 = vsel %vm294_vm4, %v3050_v7, %v3085_v25  ;;  %v2788_v42 = vrot.slane %v2787_v50, 1  ;;  %3541 = vmatpush.bf16.msrb.mxu2 %v4443_v61  ;;  %v4643_v39 = vor.u32 %v4958_v32, %v4642_v22  ;;  %v4955_v12 = vld [vmem:[%s7721_s8 + $0x1b8] sm:$0xf0]  ;;  %v4602_v45 = vld [vmem:[%s7721_s8 + $0x170] sm:$0xf] }
 0x2e9   :  { %v2796_v57 = vrot.slane %v2523_v0, 4  ;;  %v3054_v16 = vunpack.c.l.b16 %v2854_v52  ;;  %v2776_v58 = vrot.slane %v2775_v31, 1  ;;  %v2802_v11 = vrot.slane %v2524_v40, 4  ;;  %v2475_v26 = vpop.f32.mrf.mxu2  ;;  %v4947_v54 = vld [vmem:[%s7721_s8 + $0x178] sm:$0xf0] }
 0x2ea   :  { %v2792_v15 = vrot.slane %v2791_v8, 2  ;;  %v2789_v44 = vadd.f32 %v2788_v42, %v2787_v50  ;;  %3526 = vmatpush.bf16.msrb.mxu1 %v4643_v39  ;;  %v4575_v34 = vor.u32 %v4939_v63, %v4572_v4  ;;  %v4523_v23 = vor.u32 %v4928_v29, %v4522_v30  ;;  %v4618_v13 = vld [vmem:[%s7721_s8 + $0x198] sm:$0xf]  ;;  %v4952_v22 = vld [vmem:[%s7721_s8 + $0x1a0] sm:$0xf0] }
 0x2eb   :  { %v2797_v28 = vadd.f32 %v2796_v57, %v2523_v0  ;;  %v7324_v59 = vunpack.c.l.b16 %v2853_v35  ;;  %v2783_v56 = vadd.f32 %v2782_v36, %v2781_v55  ;;  %v2803_v33 = vadd.f32 %v2802_v11, %v2524_v40  ;;  %v4966_v63 = vld [vmem:[%s7721_s8 + $0x214] sm:$0xf]  ;;  %v4590_v4 = vld [vmem:[%s7721_s8 + $0x158] sm:$0xf]  ;;  %v4944_v30 = vld [vmem:[%s7721_s8 + $0x160] sm:$0xf0] }
 0x2ec   :  { %v2793_v24 = vadd.f32 %v2792_v15, %v2791_v8  ;;  %v2857_v1 = vpack.c.bf16 %v2789_v44, %v2789_v44  ;;  %3552 = vmatpush.bf16.msra.mxu3 %v4575_v34  ;;  %3514 = vmatpush.bf16.msrb.mxu0 %v4523_v23  ;;  %v4431_v55 = vor.u32 %v4903_v21, %v4428_v2  ;;  %v4606_v40 = vld [vmem:[%s7721_s8 + $0x180] sm:$0xf]  ;;  %v4949_v21 = vld [vmem:[%s7721_s8 + $0x188] sm:$0xf0]  ;;  %v4506_v11 = vld [vmem:[%s7721_s8 + $0xb0] sm:$0xf] }
 0x2ed   :  { %v2798_v18 = vrot.slane %v2797_v28, 2  ;;  %v4631_v49 = vor.u32 %v4955_v12, %v4630_v10  ;;  %v3094_v9 = vsel %vm296_vm5, %v3054_v16, %v7251_v19  ;;  %v7343_v7 = vadd.f32 %v2776_v58, %v2775_v31  ;;  %v4933_v19 = vld [vmem:[%s7721_s8 + $0x10c] sm:$0xf]  ;;  %v4548_v31 = vld [vmem:[%s7721_s8 + $0x114] sm:$0xf0] }
 0x2ee   :  { %v2794_v53 = vrot.slane %v2793_v24, 1  ;;  %v2804_v3 = vrot.slane %v2803_v33, 2  ;;  %v3057_v20 = vunpack.c.l.b16 %v2857_v1  ;;  %3542 = vmatpush.bf16.msrb.mxu2 %v4431_v55  ;;  %v4563_v14 = vor.u32 %v4936_v5, %v4560_v48  ;;  %v4930_v10 = vld [vmem:[%s7721_s8 + $0xf4] sm:$0xf]  ;;  %v4536_v12 = vld [vmem:[%s7721_s8 + $0xfc] sm:$0xf0] }
 0x2ef   :  { %v2799_v52 = vadd.f32 %v2798_v18, %v2797_v28  ;;  %3527 = vmatpush.bf16.msrb.mxu1 %v4631_v49  ;;  %v2525_v32 = vmul.f32 %v2475_v26, %v7137_v38  ;;  %v2856_v25 = vpack.c.bf16 %v2783_v56, %v2783_v56  ;;  %v4511_v61 = vor.u32 %v4925_v37, %v4510_v47  ;;  %v4680_v38 = vld [vmem:[%s7721_s8 + $0x21c] sm:$0xf0]  ;;  %v4923_v5 = vld [vmem:[%s7721_s8 + $0xb8] sm:$0xf0]  ;;  %v4668_v47 = vld [vmem:[%s7721_s8 + $0x204] sm:$0xf0] }
 0x2f0   :  { %v2805_v50 = vadd.f32 %v2804_v3, %v2803_v33  ;;  %v4419_v0 = vor.u32 %v4900_v17, %v4416_v62  ;;  %v7371_v29 = vsel %vm298_vm6, %v3057_v20, %v3094_v9  ;;  %3553 = vmatpush.bf16.msra.mxu3 %v4563_v14  ;;  %v4695_v8 = vor.u32 %v4969_v51, %v4692_v27  ;;  %v4963_v23 = vld [vmem:[%s7721_s8 + $0x1fc] sm:$0xf]  ;;  %v4578_v37 = vld [vmem:[%s7721_s8 + $0x140] sm:$0xf]  ;;  %v4941_v26 = vld [vmem:[%s7721_s8 + $0x148] sm:$0xf0] }
 0x2f1   :  { %v2800_v35 = vrot.slane %v2799_v52, 1  ;;  %v2808_v36 = vrot.slane %v2525_v32, 4  ;;  %v7379_v2 = vadd.f32 %v2794_v53, %v2793_v24  ;;  %3515 = vmatpush.bf16.msrb.mxu0 %v4511_v61  ;;  %v4603_v57 = vor.u32 %v4947_v54, %v4602_v45  ;;  %v4927_v62 = vld [vmem:[%s7721_s8 + $0xdc] sm:$0xf]  ;;  %v4524_v18 = vld [vmem:[%s7721_s8 + $0xe4] sm:$0xf0] }
 0x2f2   :  { %v2806_v42 = vrot.slane %v2805_v50, 1  ;;  %v4619_v39 = vor.u32 %v4952_v22, %v4618_v13  ;;  %3543 = vmatpush.bf16.msrb.mxu2 %v4419_v0  ;;  %v4551_v15 = vor.u32 %v4933_v19, %v4548_v31  ;;  %v3056_v48 = vunpack.c.l.b16 %v2856_v25  ;;  %v4494_v55 = vld [vmem:[%s7721_s8 + $0x98] sm:$0xf]  ;;  %v4920_v49 = vld [vmem:[%s7721_s8 + $0xa0] sm:$0xf0] }
 0x2f3   :  { %v2801_v16 = vadd.f32 %v2800_v35, %v2799_v52  ;;  %v2809_v58 = vadd.f32 %v2808_v36, %v2525_v32  ;;  %v4683_v28 = vor.u32 %v4966_v63, %v4680_v38  ;;  %v4591_v34 = vor.u32 %v4944_v30, %v4590_v4  ;;  %v4960_v22 = vld [vmem:[%s7721_s8 + $0x1e4] sm:$0xf]  ;;  %v4566_v20 = vld [vmem:[%s7721_s8 + $0x128] sm:$0xf]  ;;  %v4938_v31 = vld [vmem:[%s7721_s8 + $0x130] sm:$0xf0] }
 0x2f4   :  { %v2807_v44 = vadd.f32 %v2806_v42, %v2805_v50  ;;  %3528 = vmatpush.bf16.msrb.mxu1 %v4619_v39  ;;  %3554 = vmatpush.bf16.msra.mxu3 %v4551_v15  ;;  %v4607_v24 = vor.u32 %v4949_v21, %v4606_v40  ;;  %v4539_v33 = vor.u32 %v4930_v10, %v4536_v12  ;;  %v4924_v63 = vld [vmem:[%s7721_s8 + $0xc4] sm:$0xf]  ;;  %v4512_v50 = vld [vmem:[%s7721_s8 + $0xcc] sm:$0xf0]  ;;  %v4482_v61 = vld [vmem:[%s7721_s8 + $0x80] sm:$0xf] }
 0x2f5   :  { %3564 = vmatpush.bf16.msra.mxu0 %v4695_v8  ;;  %v2859_v17 = vpack.c.bf16 %v2801_v16, %v2801_v16  ;;  %v2810_v56 = vrot.slane %v2809_v58, 2  ;;  %v3087_v51 = vsel %vm296_vm5, %v7324_v59, %v7301_v41  ;;  %v4507_v1 = vor.u32 %v4923_v5, %v4506_v11  ;;  %v4917_v0 = vld [vmem:[%s7721_s8 + $0x88] sm:$0xf0]  ;;  %v4698_v36 = vld [vmem:[%s7721_s8 + $0x230] sm:$0xf] }
 0x2f6   :  { %3592 = vmatpush.bf16.msra.mxu2 %v4603_v57  ;;  %v2860_v27 = vpack.c.bf16 %v2807_v44, %v2807_v44  ;;  %v2855_v45 = vpack.c.bf16 %v7343_v7, %v7343_v7  ;;  %v4671_v41 = vor.u32 %v4963_v23, %v4668_v47  ;;  %v3088_v59 = vsel %vm298_vm6, %v3056_v48, %v3087_v51  ;;  %v4656_v7 = vld [vmem:[%s7721_s8 + $0x1ec] sm:$0xf0]  ;;  %v4971_v8 = vld [vmem:[%s7721_s8 + $0x238] sm:$0xf0]  ;;  %v4470_v16 = vld [vmem:[%s7721_s8 + $0x68] sm:$0xf] }
 0x2f7   :  { %v3059_v54 = vunpack.c.l.b16 %v2859_v17  ;;  %v2811_v9 = vadd.f32 %v2810_v56, %v2809_v58  ;;  %v2858_v53 = vpack.c.bf16 %v7379_v2, %v7379_v2  ;;  %v4579_v13 = vor.u32 %v4941_v26, %v4578_v37  ;;  %v4554_v39 = vld [vmem:[%s7721_s8 + $0x110] sm:$0xf]  ;;  %v4935_v10 = vld [vmem:[%s7721_s8 + $0x118] sm:$0xf0]  ;;  %v4914_v58 = vld [vmem:[%s7721_s8 + $0x70] sm:$0xf0] }
 0x2f8   :  { %v3060_v3 = vunpack.c.l.b16 %v2860_v27  ;;  %3529 = vmatpush.bf16.msrb.mxu1 %v4607_v24  ;;  %3555 = vmatpush.bf16.msra.mxu3 %v4539_v33  ;;  %v4527_v32 = vor.u32 %v4927_v62, %v4524_v18  ;;  %v4495_v19 = vor.u32 %v4920_v49, %v4494_v55  ;;  %v3055_v4 = vunpack.c.l.b16 %v2855_v45  ;;  %v4686_v48 = vld [vmem:[%s7721_s8 + $0x218] sm:$0xf]  ;;  %v4968_v44 = vld [vmem:[%s7721_s8 + $0x220] sm:$0xf0]  ;;  %v4954_v23 = vld [vmem:[%s7721_s8 + $0x1b4] sm:$0xf] }
 0x2f9   :  { %3565 = vmatpush.bf16.msra.mxu0 %v4683_v28  ;;  %v3089_v52 = vsel %vm300_vm7, %v3059_v54, %v3088_v59  ;;  %v2812_v14 = vrot.slane %v2811_v9, 1  ;;  %v4659_v35 = vor.u32 %v4960_v22, %v4656_v7  ;;  %v3058_v40 = vunpack.c.l.b16 %v2858_v53  ;;  %v4542_v17 = vld [vmem:[%s7721_s8 + $0xf8] sm:$0xf]  ;;  %v4932_v56 = vld [vmem:[%s7721_s8 + $0x100] sm:$0xf0] }
 0x2fa   :  { %3593 = vmatpush.bf16.msra.mxu2 %v4591_v34  ;;  %v3096_v25 = vsel %vm300_vm7, %v3060_v3, %v7371_v29  ;;  %v7453_v38 = vpack.c.b16 %v3089_v52, %v7044_v6  ;;  %v4567_v21 = vor.u32 %v4938_v31, %v4566_v20  ;;  %v4957_v6 = vld [vmem:[%s7721_s8 + $0x1cc] sm:$0xf]  ;;  %v4515_v42 = vor.u32 %v4924_v63, %v4512_v50  ;;  %v4458_v26 = vld [vmem:[%s7721_s8 + $0x50] sm:$0xf]  ;;  %v4911_v62 = vld [vmem:[%s7721_s8 + $0x58] sm:$0xf0] }
 0x2fb   :  { %v2813_v30 = vadd.f32 %v2812_v14, %v2811_v9  ;;  %v7456_v29 = vpack.c.b16 %v3096_v25, %v7048_v60  ;;  %v4644_v60 = vld [vmem:[%s7721_s8 + $0x1d4] sm:$0xf0]  ;;  %v4483_v57 = vor.u32 %v4917_v0, %v4482_v61  ;;  %v4699_v12 = vor.u32 %v4971_v8, %v4698_v36  ;;  %v4674_v27 = vld [vmem:[%s7721_s8 + $0x200] sm:$0xf]  ;;  %v4951_v18 = vld [vmem:[%s7721_s8 + $0x19c] sm:$0xf] }
 0x2fc   :  { %3578 = vmatpush.bf16.msra.mxu1 %v4507_v1  ;;  %3502 = vmatmul.bf16.vlgmr.msrb.gmra.mxu3 %v7453_v38  ;;  %v3101_v15 = vsel %vm296_vm5, %v3055_v4, %v7269_v46  ;;  %v4647_v5 = vor.u32 %v4957_v6, %v4644_v60  ;;  %v4555_v34 = vor.u32 %v4935_v10, %v4554_v39  ;;  %v4632_v46 = vld [vmem:[%s7721_s8 + $0x1bc] sm:$0xf0]  ;;  %v4965_v1 = vld [vmem:[%s7721_s8 + $0x208] sm:$0xf0]  ;;  %v4620_v55 = vld [vmem:[%s7721_s8 + $0x1a4] sm:$0xf0] }
 0x2fd   :  { %3566 = vmatpush.bf16.msra.mxu0 %v4671_v41  ;;  %v2861_v2 = vpack.c.bf16 %v2813_v30, %v2813_v30  ;;  %3556 = vmatpush.bf16.msra.mxu3 %v4527_v32  ;;  %v3102_v28 = vsel %vm298_vm6, %v3058_v40, %v3101_v15  ;;  %v4471_v37 = vor.u32 %v4914_v58, %v4470_v16  ;;  %v4530_v45 = vld [vmem:[%s7721_s8 + $0xe0] sm:$0xf]  ;;  %v4929_v54 = vld [vmem:[%s7721_s8 + $0xe8] sm:$0xf0]  ;;  %v4446_v41 = vld [vmem:[%s7721_s8 + $0x38] sm:$0xf] }
 0x2fe   :  { %3594 = vmatpush.bf16.msra.mxu2 %v4579_v13  ;;  %3516 = vmatmul.bf16.vlgmr.msrb.gmra.mxu0 %v7456_v29  ;;  %v4687_v24 = vor.u32 %v4968_v44, %v4686_v48  ;;  %v4635_v51 = vor.u32 %v4954_v23, %v4632_v46  ;;  %v4459_v49 = vor.u32 %v4911_v62, %v4458_v26  ;;  %v4908_v59 = vld [vmem:[%s7721_s8 + $0x40] sm:$0xf0]  ;;  %v4662_v3 = vld [vmem:[%s7721_s8 + $0x1e8] sm:$0xf]  ;;  %v4962_v13 = vld [vmem:[%s7721_s8 + $0x1f0] sm:$0xf0] }
 0x2ff   :  { %3544 = vmatmul.bf16.vlgmr.msrb.gmra.mxu2 %v7453_v38  ;;  %v3061_v11 = vunpack.c.l.b16 %v2861_v2  ;;  %v4675_v9 = vor.u32 %v4965_v1, %v4674_v27  ;;  %v4623_v53 = vor.u32 %v4951_v18, %v4620_v55  ;;  %v4531_v22 = vor.u32 %v4929_v54, %v4530_v45  ;;  %v4948_v7 = vld [vmem:[%s7721_s8 + $0x184] sm:$0xf]  ;;  %v4608_v20 = vld [vmem:[%s7721_s8 + $0x18c] sm:$0xf0]  ;;  %v4518_v14 = vld [vmem:[%s7721_s8 + $0xc8] sm:$0xf] }
 0x300   :  { %3579 = vmatpush.bf16.msra.mxu1 %v4495_v19  ;;  %v4447_v52 = vor.u32 %v4908_v59, %v4446_v41  ;;  %v4926_v32 = vld [vmem:[%s7721_s8 + $0xd0] sm:$0xf0]  ;;  %v4663_v19 = vor.u32 %v4962_v13, %v4662_v3  ;;  %v4434_v31 = vld [vmem:[%s7721_s8 + $0x20] sm:$0xf]  ;;  %v4905_v63 = vld [vmem:[%s7721_s8 + $0x28] sm:$0xf0]  ;;  %v4611_v25 = vor.u32 %v4948_v7, %v4608_v20 }
 0x301   :  { %3567 = vmatpush.bf16.msra.mxu0 %v4659_v35  ;;  %v3103_v47 = vsel %vm300_vm7, %v3061_v11, %v3102_v28  ;;  %3557 = vmatpush.bf16.msra.mxu3 %v4515_v42  ;;  %v4650_v50 = vld [vmem:[%s7721_s8 + $0x1d0] sm:$0xf]  ;;  %v4959_v61 = vld [vmem:[%s7721_s8 + $0x1d8] sm:$0xf0]  ;;  %v4519_v0 = vor.u32 %v4926_v32, %v4518_v14  ;;  %v4435_v4 = vor.u32 %v4905_v63, %v4434_v31  ;;  %v4422_v35 = vld [vmem:[%s7721_s8 + $0x8] sm:$0xf] }
 0x302   :  { %3595 = vmatpush.bf16.msra.mxu2 %v4567_v21  ;;  %v7508_v33 = vpack.c.b16 %v3103_v47, %v7092_v43  ;;  %v4543_v43 = vor.u32 %v4932_v56, %v4542_v17  ;;  %v4651_v30 = vor.u32 %v4959_v61, %v4650_v50  ;;  %v4902_v36 = vld [vmem:[%s7721_s8 + $0x10] sm:$0xf0]  ;;  %v4638_v8 = vld [vmem:[%s7721_s8 + $0x1b8] sm:$0xf]  ;;  %v4956_v40 = vld [vmem:[%s7721_s8 + $0x1c0] sm:$0xf0] }
 0x303   :  { %v4423_v21 = vor.u32 %v4902_v36, %v4422_v35  ;;  %v4639_v6 = vor.u32 %v4956_v40, %v4638_v8  ;;  %v4626_v60 = vld [vmem:[%s7721_s8 + $0x1a0] sm:$0xf]  ;;  %v4953_v2 = vld [vmem:[%s7721_s8 + $0x1a8] sm:$0xf0]  ;;  %v4950_v39 = vld [vmem:[%s7721_s8 + $0x190] sm:$0xf0] }
 0x304   :  { %3580 = vmatpush.bf16.msra.mxu1 %v4483_v57  ;;  %v4627_v42 = vor.u32 %v4953_v2, %v4626_v60  ;;  %v4614_v57 = vld [vmem:[%s7721_s8 + $0x188] sm:$0xf]  ;;  %v5003_v10 = vld [vmem:[%s7716_s3 + $0x38] sm:$0xff]  ;;  %v4998_v15 = vld [vmem:[%s7716_s3 + $0x10] sm:$0xff] }
 0x305   :  { %3606 = vmatpush.bf16.msrb.mxu3 %v4699_v12  ;;  %3568 = vmatpush.bf16.msra.mxu0 %v4647_v5  ;;  %v5002_v12 = vld [vmem:[%s7716_s3 + $0x30] sm:$0xff]  ;;  %v5001_v16 = vld [vmem:[%s7716_s3 + $0x28] sm:$0xff]  ;;  %v4999_v58 = vld [vmem:[%s7716_s3 + $0x18] sm:$0xff] }
 0x306   :  { %3596 = vmatpush.bf16.msra.mxu2 %v4555_v34  ;;  %3530 = vmatmul.bf16.vlgmr.msrb.gmra.mxu1 %v7508_v33  ;;  %v4997_v11 = vld [vmem:[%s7716_s3 + $0x8] sm:$0xff]  ;;  %v4996_v5 = vld [vmem:[%s7716_s3] sm:$0xff]  ;;  %v7916_v44 = vld [vmem:[#allocation8_spill] sm:$0xff] }
 0x307   :  { %v7915_v48 = vld [vmem:[#allocation6_spill] sm:$0xff]  ;;  %v4979_v28 = vld [vmem:[%s7723_s10 + $0x38] sm:$0xff]  ;;  %v4978_v34 = vld [vmem:[%s7723_s10 + $0x30] sm:$0xff] }
 0x308   :  { %3581 = vmatpush.bf16.msra.mxu1 %v4471_v37  ;;  %v7917_v23 = vld [vmem:[#allocation10_spill] sm:$0xff]  ;;  %v4976_v47 = vld [vmem:[%s7723_s10 + $0x20] sm:$0xff]  ;;  %v4987_v37 = vld [vmem:[%s7723_s10 + $0x78] sm:$0xff] }
 0x309   :  { %3607 = vmatpush.bf16.msrb.mxu3 %v4687_v24  ;;  %3569 = vmatpush.bf16.msra.mxu0 %v4635_v51  ;;  %v4977_v46 = vld [vmem:[%s7723_s10 + $0x28] sm:$0xff]  ;;  %v4975_v17 = vld [vmem:[%s7723_s10 + $0x18] sm:$0xff]  ;;  %v4986_v56 = vld [vmem:[%s7723_s10 + $0x70] sm:$0xff] }
 0x30a   :  { %3597 = vmatpush.bf16.msra.mxu2 %v4543_v43  ;;  %v4974_v24 = vld [vmem:[%s7723_s10 + $0x10] sm:$0xff]  ;;  %v4985_v26 = vld [vmem:[%s7723_s10 + $0x68] sm:$0xff]  ;;  %v4984_v51 = vld [vmem:[%s7723_s10 + $0x60] sm:$0xff] }
 0x30b   :  { %v4973_v62 = vld [vmem:[%s7723_s10 + $0x8] sm:$0xff]  ;;  %v4995_v27 = vld [vmem:[%s7723_s10 + $0xb8] sm:$0xff]  ;;  %v4972_v1 = vld [vmem:[%s7723_s10] sm:$0xff] }
 0x30c   :  { %3582 = vmatpush.bf16.msra.mxu1 %v4459_v49  ;;  %3558 = vmatmul.bf16.vlgmr.msra.gmra.mxu3 %v7456_v29  ;;  %v4983_v43 = vld [vmem:[%s7723_s10 + $0x58] sm:$0xff]  ;;  %v4994_v18 = vld [vmem:[%s7723_s10 + $0xb0] sm:$0xff]  ;;  %v4993_v49 = vld [vmem:[%s7723_s10 + $0xa8] sm:$0xff] }
 0x30d   :  { %3608 = vmatpush.bf16.msrb.mxu3 %v4675_v9  ;;  %3570 = vmatpush.bf16.msra.mxu0 %v4623_v53  ;;  %v4982_v55 = vld [vmem:[%s7723_s10 + $0x50] sm:$0xff]  ;;  %v2958_v54 = vld [vmem:[%s7722_s9] sm:$0x7]  ;;  %v4981_v41 = vld [vmem:[%s7723_s10 + $0x48] sm:$0xff] }
 0x30e   :  { %3598 = vmatpush.bf16.msra.mxu2 %v4531_v22  ;;  %v7919_v9 = vld [vmem:[#allocation5_spill] sm:$0xff]  ;;  %v2960_v53 = vperm.slane %v2958_v54, 0  ;;  %v4991_v7 = vld [vmem:[%s7723_s10 + $0x98] sm:$0xff]  ;;  %v4990_v14 = vld [vmem:[%s7723_s10 + $0x90] sm:$0xff] }
 0x30f   :  { %v4992_v3 = vld [vmem:[%s7723_s10 + $0xa0] sm:$0xff]  ;;  %v4989_v50 = vld [vmem:[%s7723_s10 + $0x88] sm:$0xff]  ;;  %v7920_v35 = vld [vmem:[#allocation7_spill] sm:$0xff] }
 0x310   :  { %3583 = vmatpush.bf16.msra.mxu1 %v4447_v52  ;;  %v4980_v13 = vld [vmem:[%s7723_s10 + $0x40] sm:$0xff] }
 0x311   :  { %3609 = vmatpush.bf16.msrb.mxu3 %v4663_v19  ;;  %3571 = vmatpush.bf16.msra.mxu0 %v4611_v25  ;;  %v4988_v40 = vld [vmem:[%s7723_s10 + $0x80] sm:$0xff] }
 0x312   :  { %3599 = vmatpush.bf16.msra.mxu2 %v4519_v0 }
 0x314   :  { %3584 = vmatpush.bf16.msra.mxu1 %v4435_v4  ;;  %3572 = vmatmul.bf16.vlgmr.msra.gmra.mxu0 %v7508_v33 }
 0x315   :  { %3610 = vmatpush.bf16.msrb.mxu3 %v4651_v30  ;;  %3600 = vmatmul.bf16.vlgmr.msra.gmra.mxu2 %v7456_v29  ;;  %v4615_v29 = vor.u32 %v4950_v39, %v4614_v57 }
 0x316   :  { %3815 = vmatpush.bf16.msrb.mxu0 %v4979_v28  ;;  %3843 = vmatpush.bf16.msrb.mxu2 %v4995_v27 }
 0x318   :  { %3585 = vmatpush.bf16.msra.mxu1 %v4423_v21  ;;  %v2961_v21 = vperm.slane %v2958_v54, 1 }
 0x319   :  { %3611 = vmatpush.bf16.msrb.mxu3 %v4639_v6 }
 0x31a   :  { %3816 = vmatpush.bf16.msrb.mxu0 %v4978_v34  ;;  %3844 = vmatpush.bf16.msrb.mxu2 %v4994_v18 }
 0x31b   :  { %3586 = vmatmul.bf16.vlgmr.msra.gmra.mxu1 %v7453_v38  ;;  %v5000_v38 = vld [vmem:[%s7716_s3 + $0x20] sm:$0xff] }
 0x31c   :  { %3829 = vmatpush.bf16.msrb.mxu1 %v4987_v37 }
 0x31d   :  { %3612 = vmatpush.bf16.msrb.mxu3 %v4627_v42 }
 0x31e   :  { %3817 = vmatpush.bf16.msrb.mxu0 %v4977_v46  ;;  %3845 = vmatpush.bf16.msrb.mxu2 %v4993_v49 }
 0x320   :  { %3830 = vmatpush.bf16.msrb.mxu1 %v4986_v56  ;;  %v7922_v56 = vld [vmem:[#allocation12_spill] sm:$0xff] }
 0x321   :  { %3613 = vmatpush.bf16.msrb.mxu3 %v4615_v29 }
 0x322   :  { %3818 = vmatpush.bf16.msrb.mxu0 %v4976_v47  ;;  %3846 = vmatpush.bf16.msrb.mxu2 %v4992_v3 }
 0x324   :  { %3614 = vmatmul.bf16.vlgmr.msrb.gmra.mxu3 %v7508_v33  ;;  %v7918_v33 = vld [vmem:[#allocation11_spill] sm:$0xff]  ;;  %3831 = vmatpush.bf16.msrb.mxu1 %v4985_v26 }
 0x325   :  { %3921 = vmatpush.bf16.msra.mxu3 %v5003_v10 }
 0x326   :  { %3819 = vmatpush.bf16.msrb.mxu0 %v4975_v17  ;;  %3847 = vmatpush.bf16.msrb.mxu2 %v4991_v7 }
 0x328   :  { %3832 = vmatpush.bf16.msrb.mxu1 %v4984_v51 }
 0x329   :  { %3922 = vmatpush.bf16.msra.mxu3 %v5002_v12 }
 0x32a   :  { %3820 = vmatpush.bf16.msrb.mxu0 %v4974_v24  ;;  %3848 = vmatpush.bf16.msrb.mxu2 %v4990_v14 }
 0x32c   :  { %3833 = vmatpush.bf16.msrb.mxu1 %v4983_v43 }
 0x32d   :  { %3923 = vmatpush.bf16.msra.mxu3 %v5001_v16 }
 0x32e   :  { %3821 = vmatpush.bf16.msrb.mxu0 %v4973_v62  ;;  %3849 = vmatpush.bf16.msrb.mxu2 %v4989_v50 }
 0x330   :  { %3834 = vmatpush.bf16.msrb.mxu1 %v4982_v55 }
 0x331   :  { %3924 = vmatpush.bf16.msra.mxu3 %v5000_v38 }
 0x332   :  { %3822 = vmatpush.bf16.msrb.mxu0 %v4972_v1  ;;  %3850 = vmatpush.bf16.msrb.mxu2 %v4988_v40 }
 0x334   :  { %3835 = vmatpush.bf16.msrb.mxu1 %v4981_v41 }
 0x335   :  { %3925 = vmatpush.bf16.msra.mxu3 %v4999_v58  ;;  %v7921_v58 = vld [vmem:[#allocation9_spill] sm:$0xff] }
 0x338   :  { %3836 = vmatpush.bf16.msrb.mxu1 %v4980_v13 }
 0x339   :  { %3926 = vmatpush.bf16.msra.mxu3 %v4998_v15 }
 0x33d   :  { %3927 = vmatpush.bf16.msra.mxu3 %v4997_v11  ;;  %v2962_v11 = vperm.slane %v2958_v54, 2 }
 0x341   :  { %3928 = vmatpush.bf16.msra.mxu3 %v4996_v5 }
 0x344   :  { %3929 = vmatmul.bf16.vlgmr.msra.gmra.mxu3 %v7915_v48 }
 0x354   :  { %3934 = vmatmul.bf16.gmra.mxu3 %v7916_v44 }
 0x364   :  { %3939 = vmatmul.bf16.gmra.mxu3 %v7917_v23 }
 0x374   :  { %3944 = vmatmul.bf16.gmra.mxu3 %v7918_v33 }
 0x37b   :  { %v3517_v45 = vpop.f32.mrf.mxu0 }
 0x37f   :  { %v3503_v59 = vpop.f32.mrf.mxu3 }
 0x380   :  { %v3504_v20 = vadd.f32 %v3503_v59, %v2960_v53 }
 0x382   :  { %v3518_v19 = vadd.f32 %v3517_v45, %v3504_v20  ;;  %v3545_v63 = vpop.f32.mrf.mxu2 }
 0x383   :  { %v3531_v22 = vpop.f32.mrf.mxu1  ;;  %v3519_v52 = vpop.f32.mrf.mxu0  ;;  %v3546_v60 = vadd.f32 %v3545_v63, %v2961_v21  ;;  %v3993_v63 = vlaneseq }
 0x384   :  { %3949 = vmatmul.bf16.gmra.mxu3 %v7919_v9  ;;  %v3532_v0 = vadd.f32 %v3531_v22, %v3518_v19 }
 0x387   :  { %v3505_v32 = vpop.f32.mrf.mxu3 }
 0x388   :  { %v3506_v31 = vadd.f32 %v3505_v32, %v2960_v53 }
 0x38a   :  { %v3520_v25 = vadd.f32 %v3519_v52, %v3506_v31  ;;  %v3547_v6 = vpop.f32.mrf.mxu2 }
 0x38b   :  { %v3533_v61 = vpop.f32.mrf.mxu1  ;;  %v3548_v2 = vadd.f32 %v3547_v6, %v2961_v21 }
 0x38c   :  { %v3534_v4 = vadd.f32 %v3533_v61, %v3520_v25  ;;  %v3994_v25 = vshrl.u32 %v3993_v63, 7 }
 0x38e   :  { %v3620_v30 = vpack.c.bf16 %v3534_v4, %v3532_v0  ;;  %v3995_v50 = vadd.s32 8, %v3994_v25  ;;  %v3998_v61 = vmul.u32 8, %v3994_v25  ;;  %v3997_v4 = vand.u32 127, %v3993_v63 }
 0x38f   :  { %v3559_v8 = vpop.f32.mrf.mxu3 }
 0x390   :  { %3823 = vmatmul.bf16.vlgmr.msrb.gmra.mxu0 %v3620_v30  ;;  %v3560_v42 = vadd.f32 %v3559_v8, %v3546_v60  ;;  %v3999_v0 = vmul.u32 8, %v3995_v50  ;;  %v4002_v30 = vadd.s32 8, %v3998_v61  ;;  %vm4000_vm1 = vcmp.ge.s32.totalorder %v3997_v4, %v3998_v61 }
 0x391   :  { %v3573_v36 = vpop.f32.mrf.mxu0 }
 0x392   :  { %v3574_v10 = vadd.f32 %v3573_v36, %v3560_v42  ;;  %vm4004_vm2 = vcmp.lt.s32.totalorder %v3997_v4, %v4002_v30  ;;  %vm4001_vm3 = vcmp.ge.s32.totalorder %v3997_v4, %v3999_v0 }
 0x393   :  { %vm4006_vm5 = vmand %vm4000_vm1, %vm4004_vm2 }
 0x394   :  { %3954 = vmatmul.bf16.gmra.mxu3 %v7920_v35  ;;  %v4003_v35 = vadd.s32 8, %v3999_v0 }
 0x396   :  { %vm4005_vm4 = vcmp.lt.s32.totalorder %v3997_v4, %v4003_v35 }
 0x397   :  { %v3561_v57 = vpop.f32.mrf.mxu3  ;;  %vm4007_vm6 = vmand %vm4001_vm3, %vm4005_vm4 }
 0x398   :  { %v3562_v39 = vadd.f32 %v3561_v57, %v3548_v2  ;;  %v3587_v12 = vpop.f32.mrf.mxu1  ;;  %v3601_v15 = vpop.f32.mrf.mxu2 }
 0x399   :  { %v3575_v29 = vpop.f32.mrf.mxu0  ;;  %v3588_v44 = vadd.f32 %v3587_v12, %v2962_v11 }
 0x39a   :  { %v3576_v16 = vadd.f32 %v3575_v29, %v3562_v39 }
 0x39b   :  { %v3602_v23 = vadd.f32 %v3601_v15, %v3588_v44 }
 0x39c   :  { %v3621_v38 = vpack.c.bf16 %v3576_v16, %v3574_v10  ;;  %v4020_v16 = vld [vmem:[%s7715_s2] sm:$0x1] }
 0x39e   :  { %3837 = vmatmul.bf16.vlgmr.msrb.gmra.mxu1 %v3621_v38 }
 0x3a0   :  { %v3589_v5 = vpop.f32.mrf.mxu1  ;;  %v3603_v34 = vpop.f32.mrf.mxu2 }
 0x3a1   :  { %v3590_v28 = vadd.f32 %v3589_v5, %v2962_v11 }
 0x3a3   :  { %v3604_v46 = vadd.f32 %v3603_v34, %v3590_v28 }
 0x3a4   :  { %3959 = vmatmul.bf16.gmra.mxu3 %v7921_v58 }
 0x3a7   :  { %v3615_v48 = vpop.f32.mrf.mxu3 }
 0x3a8   :  { %v3616_v37 = vadd.f32 %v3615_v48, %v3602_v23 }
 0x3af   :  { %v3617_v47 = vpop.f32.mrf.mxu3 }
 0x3b0   :  { %v3618_v17 = vadd.f32 %v3617_v47, %v3604_v46 }
 0x3b2   :  { %v3622_v24 = vpack.c.bf16 %v3618_v17, %v3616_v37 }
 0x3b4   :  { %3964 = vmatmul.bf16.gmra.mxu3 %v7922_v56  ;;  %3851 = vmatmul.bf16.vlgmr.msrb.gmra.mxu2 %v3622_v24 }
 0x3c7   :  { %v3930_v33 = vpop.f32.mrf.mxu3 }
 0x3cf   :  { %v3932_v26 = vpop.f32.mrf.mxu3 }
 0x3d7   :  { %v3935_v62 = vpop.f32.mrf.mxu3 }
 0x3df   :  { %v3937_v51 = vpop.f32.mrf.mxu3 }
 0x3e7   :  { %v3940_v27 = vpop.f32.mrf.mxu3 }
 0x3ef   :  { %v3942_v1 = vpop.f32.mrf.mxu3 }
 0x3f7   :  { %v3945_v43 = vpop.f32.mrf.mxu3 }
 0x3ff   :  { %v3947_v18 = vpop.f32.mrf.mxu3 }
 0x407   :  { %v3950_v55 = vpop.f32.mrf.mxu3 }
 0x40d   :  { %v3824_v13 = vpop.f32.mrf.mxu0 }
 0x40f   :  { %v3952_v49 = vpop.f32.mrf.mxu3 }
 0x415   :  { %v3826_v14 = vpop.f32.mrf.mxu0 }
 0x417   :  { %v3955_v45 = vpop.f32.mrf.mxu3 }
 0x41b   :  { %v3838_v3 = vpop.f32.mrf.mxu1 }
 0x41c   :  { %v3839_v7 = vadd.f32 %v3838_v3, %v3824_v13 }
 0x41f   :  { %v3957_v54 = vpop.f32.mrf.mxu3 }
 0x423   :  { %v3840_v52 = vpop.f32.mrf.mxu1 }
 0x424   :  { %v3841_v19 = vadd.f32 %v3840_v52, %v3826_v14 }
 0x427   :  { %v3960_v9 = vpop.f32.mrf.mxu3 }
 0x42f   :  { %v3962_v41 = vpop.f32.mrf.mxu3 }
 0x437   :  { %v3965_v59 = vpop.f32.mrf.mxu3  ;;  %v3852_v22 = vpop.f32.mrf.mxu2 }
 0x438   :  { %v3853_v20 = vadd.f32 %v3852_v22, %v3839_v7 }
 0x43f   :  { %v3967_v53 = vpop.f32.mrf.mxu3  ;;  %v3854_v32 = vpop.f32.mrf.mxu2 }
 0x440   :  { %3970 = vmatpush.xpose.msra.mxu0 %v3967_v53  ;;  %v3855_v31 = vadd.f32 %v3854_v32, %v3841_v19 }
 0x444   :  { %3971 = vmatpush.xpose.msra.mxu0 %v3965_v59 }
 0x448   :  { %3972 = vmatpush.xpose.msra.mxu0 %v3962_v41 }
 0x44c   :  { %3973 = vmatpush.xpose.msra.mxu0 %v3960_v9 }
 0x450   :  { %3974 = vmatpush.xpose.msra.mxu0 %v3957_v54 }
 0x454   :  { %3975 = vmatpush.xpose.msra.mxu0 %v3955_v45 }
 0x458   :  { %3976 = vmatpush.xpose.msra.mxu0 %v3952_v49 }
 0x45c   :  { %3977 = vmatpush.xpose.msra.mxu0 %v3950_v55 }
 0x460   :  { %3978 = vmatpush.xpose.msra.mxu0 %v3947_v18 }
 0x464   :  { %3979 = vmatpush.xpose.msra.mxu0 %v3945_v43 }
 0x468   :  { %3980 = vmatpush.xpose.msra.mxu0 %v3942_v1 }
 0x46c   :  { %3981 = vmatpush.xpose.msra.mxu0 %v3940_v27 }
 0x470   :  { %3982 = vmatpush.xpose.msra.mxu0 %v3937_v51 }
 0x474   :  { %3983 = vmatpush.xpose.msra.mxu0 %v3935_v62 }
 0x478   :  { %3984 = vmatpush.xpose.msra.mxu0 %v3932_v26 }
 0x47c   :  { %3985 = vmatpush.xpose.msra.mxu0 %v3930_v33 }
 0x47f   :  { %3986 = vmatmul.f32.vlgmr.msra.gmra.mxu0 %v3853_v20 }
 0x487   :  { %3989 = vmatmul.f32.gmra.mxu0 %v3855_v31 }
 0x4fc   :  { %v3987_v36 = vpop.f32.mrf.mxu0 }
 0x4fd   :  { %v4008_v40 = vsel %vm4006_vm5, %v3987_v36, 0.0 }
 0x504   :  { %v3990_v8 = vpop.f32.mrf.mxu0 }
 0x505   :  { %v4009_v21 = vsel %vm4007_vm6, %v3990_v8, 0.0 }
 0x506   :  { %v4010_v6 = vadd.f32 %v4009_v21, %v4008_v40 }
 0x508   :  { %v4011_v60 = vrot.slane %v4010_v6, 4 }
 0x50a   :  { %v4012_v2 = vadd.f32 %v4011_v60, %v4010_v6 }
 0x50c   :  { %v4013_v42 = vrot.slane %v4012_v2, 2 }
 0x50e   :  { %v4014_v57 = vadd.f32 %v4013_v42, %v4012_v2 }
 0x510   :  { %v4015_v39 = vrot.slane %v4014_v57, 1 }
 0x512   :  { %v4016_v29 = vadd.f32 %v4015_v39, %v4014_v57 }
 0x514   :  { %v4017_v10 = vmul.f32 0.088388346, %v4016_v29 }
 0x516   :  { %5082 = vtanh.f32 %v4017_v10 }
 0x51c   :  { %v5083_v12 = vpop.eup %5082 }
 0x51d   :  { %v4019_v38 = vmul.f32 10.0, %v5083_v12 }
 0x51f   :  { %v4021_v58 = vadd.f32 %v4020_v16, %v4019_v38 }
 0x521   :  { %4022 = vst [vmem:[%s7725_s12] sm:$0x1] %v4021_v58 }
 0x522   :  { %4027 = vsyncpa [#allocation3], 1 }

</bundles_post_ra>
